<compile_context>
chip_gen: v7x
topology: tpu7x:2x2x1
jax: 0.10.0
libtpu: 0.0.40
codegen_flags: <defaults>
</compile_context>

<pallas_src>
import functools

import jax
import jax.numpy as jnp
import numpy as np
from jax.experimental import pallas as pl
from jax.experimental.pallas import tpu as pltpu

EPS = 1e-5   # PyTorch BatchNorm2d default eps
PAD = 2      # canvas padding: 1 halo row/col for the 3x3 conv / deconv phases
             # plus 1 slack row/col so every shifted slice stays in-bounds.


# ----------------------------------------------------------------------------
# Fused kernel: conv1x1+BN+ReLU -> conv3x3+BN+ReLU -> ConvTranspose2d(4,2,1)
# Channel-major layout; `bt` zero-padded image canvases are packed along the
# lane axis, so a vertical image shift is a flat lane shift of `wp`.
# ----------------------------------------------------------------------------
def _upsample_fused_kernel(x_ref, m_ref, w1_ref, t1_ref, w2_ref, t2_ref,
                           w3_ref, b3_ref, o_ref, y1_ref, y2_ref,
                           y1s_ref, y2s_ref, *, wp):
    cin, L = y1_ref.shape
    cout = y2_ref.shape[0]
    c0 = wp + 1                  # first lane whose full +-(wp+1) halo stays in-bounds
    core = L - 2 * (wp + 1)      # lanes computed per step (covers every interior pixel)
    # The 9 shifted-slab offsets (dy, dx in {-1,0,1}); shared by the 3x3 conv
    # and by all four transposed-conv output phases.
    offs = [dy * wp + dx for dy in (-1, 0, 1) for dx in (-1, 0, 1)]
    HI = jax.lax.Precision.HIGHEST

    # ---- conv1x1 + BN1 + ReLU: one lane-dense matmul over the full canvas ----
    y1 = jnp.dot(w1_ref[...], x_ref[0],
                 preferred_element_type=jnp.float32, precision=HI)
    # The interior mask re-zeroes the padding ring (ReLU(shift) != 0 there) so
    # the 3x3 conv below sees proper zero padding.
    y1_ref[...] = jnp.maximum(y1 + t1_ref[...], 0.0) * m_ref[...]

    # ---- conv3x3 (pad=1) + BN2 + ReLU: ONE K-packed matmul (K = 9*cin) ----
    for k, d in enumerate(offs):
        y1s_ref[k * cin:(k + 1) * cin, :] = y1_ref[:, c0 + d:c0 + d + core]
    acc2 = jnp.dot(w2_ref[...], y1s_ref[...],
                   preferred_element_type=jnp.float32, precision=HI)
    # Only [c0, c0+core) of y2 is ever written.  The unwritten head/tail lanes
    # are read by the stack below, but they feed ONLY padding-ring outputs the
    # wrapper discards (interior outputs never read them) -> no zero fill.
    y2_ref[:, c0:c0 + core] = (jnp.maximum(acc2 + t2_ref[...], 0.0)
                               * m_ref[:, c0:c0 + core])

    # ---- ConvTranspose2d(k=4, s=2, p=1): all 4 sub-pixel phases in ONE dot ----
    # The same 9 shifted y2 slabs feed every phase; w3_ref holds zeros for the
    # taps a phase does not use.
    for k, d in enumerate(offs):
        y2s_ref[k * cout:(k + 1) * cout, :] = y2_ref[:, c0 + d:c0 + d + core]
    o_ref[0, :, c0:c0 + core] = (
        jnp.dot(w3_ref[...], y2s_ref[...],
                preferred_element_type=jnp.float32, precision=HI)
        + b3_ref[...])
    # o_ref's padding-ring lanes (and lanes outside [c0, c0+core)) are left as
    # stale VMEM on purpose; the wrapper slices the ring off before any use.


# ----------------------------------------------------------------------------
# Parameters (BatchNorm in inference mode with synthetic running stats)
# ----------------------------------------------------------------------------
def init_params(key, in_channels, out_channels):
    ks = jax.random.split(key, 14)

    def rnd(k, shape, scale=0.1):
        return scale * jax.random.normal(k, shape, dtype=jnp.float32)

    return {
        "w1": rnd(ks[0], (in_channels, in_channels, 1, 1)),
        "b1": rnd(ks[1], (in_channels,)),
        "w2": rnd(ks[2], (out_channels, in_channels, 3, 3)),
        "b2": rnd(ks[3], (out_channels,)),
        "w3": rnd(ks[4], (out_channels, out_channels, 4, 4)),  # (in=out, out, 4, 4)
        "b3": rnd(ks[5], (out_channels,)),
        "bn1_gamma": 1.0 + rnd(ks[6], (in_channels,)),
        "bn1_beta": rnd(ks[7], (in_channels,)),
        "bn1_mean": rnd(ks[8], (in_channels,)),
        "bn1_var": 1.0 + 0.1 * jax.random.uniform(ks[9], (in_channels,)),
        "bn2_gamma": 1.0 + rnd(ks[10], (out_channels,)),
        "bn2_beta": rnd(ks[11], (out_channels,)),
        "bn2_mean": rnd(ks[12], (out_channels,)),
        "bn2_var": 1.0 + 0.1 * jax.random.uniform(ks[13], (out_channels,)),
    }


def _pick_block_batch(n, max_bt=8):
    """Images packed per grid step along the lane axis.

    Amortizes the ~0.35us per-grid-step pipeline overhead and widens every
    matmul RHS / store; for larger batches keep >= 2 grid steps so v7x's two
    TensorCores both get work (v5e/v6e have a single TC)."""
    best = 1
    for b in range(1, min(n, max_bt) + 1):
        if n % b == 0 and (n // b >= 2 or n <= 2):
            best = b
    return best


# ----------------------------------------------------------------------------
# Wrapper: NCHW in / NCHW out; all conv math happens inside ONE pallas_call.
# ----------------------------------------------------------------------------
def upsample_forward(params, upsampled_nchw, shortcut_nchw, *, block_batch=None):
    x = jnp.concatenate([upsampled_nchw, shortcut_nchw], axis=1)   # (N, Cin, H, W)
    n, cin, h, w = x.shape
    cout = params["w2"].shape[0]
    hp, wp = h + 2 * PAD, w + 2 * PAD
    sp = hp * wp
    bt = _pick_block_batch(n) if block_batch is None else block_batch
    assert n % bt == 0
    ng = n // bt
    L = bt * sp                       # lanes per grid step (bt canvases side by side)
    core = L - 2 * (wp + 1)

    # Zero-padded flat canvases, bt images packed along the lane axis
    # (channel-major); XLA fuses the pad + pack transpose into one copy pass.
    xc = jnp.pad(x, ((0, 0), (0, 0), (PAD, PAD), (PAD, PAD))).reshape(n, cin, sp)
    xc = xc.reshape(ng, bt, cin, sp).transpose(0, 2, 1, 3).reshape(ng, cin, L)

    # Interior (real-image) mask, one copy per packed image.
    mask = (jnp.zeros((hp, wp), jnp.float32)
            .at[PAD:PAD + h, PAD:PAD + w].set(1.0).reshape(1, sp))
    mask = jnp.tile(mask, (1, bt))

    # ---- fold BatchNorm (inference) + pre-pack 2-D lane-friendly weights ----
    s1 = params["bn1_gamma"] * jax.lax.rsqrt(params["bn1_var"] + EPS)
    w1f = s1[:, None] * params["w1"][:, :, 0, 0]                               # (cin, cin)
    t1 = (params["bn1_beta"] + (params["b1"] - params["bn1_mean"]) * s1)[:, None]

    s2 = params["bn2_gamma"] * jax.lax.rsqrt(params["bn2_var"] + EPS)
    # conv3x3 taps packed K-major to match the 9-slab stack: (cout, 9*cin).
    w2p = jnp.transpose(params["w2"] * s2[:, None, None, None],
                        (0, 2, 3, 1)).reshape(cout, 9 * cin)
    t2 = (params["bn2_beta"] + (params["b2"] - params["bn2_mean"]) * s2)[:, None]

    # Transposed-conv taps for all 4 sub-pixel phases packed into a single
    # (4*cout, 9*cout) matrix over the shared 9-slab y2 stack (unused taps = 0).
    w3 = params["w3"]                                                          # (in, out, 4, 4)
    w3p = jnp.zeros((4 * cout, 9 * cout), jnp.float32)
    for py in range(2):
        for px in range(2):
            ph = 2 * py + px
            for dy in range(2):
                for dx in range(2):
                    k = (py + dy) * 3 + (px + dx)      # slab of offset (py+dy-1, px+dx-1)
                    ky, kx = 3 - py - 2 * dy, 3 - px - 2 * dx
                    w3p = w3p.at[ph * cout:(ph + 1) * cout,
                                 k * cout:(k + 1) * cout].set(w3[:, :, ky, kx].T)
    b3p = jnp.tile(params["b3"][:, None], (4, 1))                              # (4*cout, 1)

    cost = pl.CostEstimate(
        flops=2 * (cin * cin + 9 * cin * cout + 16 * cout * cout) * h * w * n,
        transcendentals=0,
        bytes_accessed=4 * (cin + 5 * cout) * sp * n)

    # TODO(synk): for large H*W (canvases no longer fitting v7x's 64 MiB VMEM)
    # add a grid axis tiling H with a 2-row halo instead of whole-image canvases.
    # TODO(synk): fuse the phase de-interleave below into the downstream
    # consumer (or emit a ring-free compacted output) to drop that HBM pass.
    kernel = functools.partial(_upsample_fused_kernel, wp=wp)
    out = pl.pallas_call(
        kernel,
        out_shape=jax.ShapeDtypeStruct((ng, 4 * cout, L), jnp.float32),
        grid=(ng,),
        in_specs=[
            pl.BlockSpec((1, cin, L), lambda i: (i, 0, 0)),        # packed x canvases
            pl.BlockSpec((1, L), lambda i: (0, 0)),                # interior mask
            pl.BlockSpec((cin, cin), lambda i: (0, 0)),            # conv1x1 (BN folded)
            pl.BlockSpec((cin, 1), lambda i: (0, 0)),              # shift 1
            pl.BlockSpec((cout, 9 * cin), lambda i: (0, 0)),       # conv3x3, K-packed
            pl.BlockSpec((cout, 1), lambda i: (0, 0)),             # shift 2
            pl.BlockSpec((4 * cout, 9 * cout), lambda i: (0, 0)),  # deconv, phase+K packed
            pl.BlockSpec((4 * cout, 1), lambda i: (0, 0)),         # deconv bias
        ],
        out_specs=pl.BlockSpec((1, 4 * cout, L), lambda i: (i, 0, 0)),
        scratch_shapes=[
            pltpu.VMEM((cin, L), jnp.float32),          # y1 canvas
            pltpu.VMEM((cout, L), jnp.float32),         # y2 canvas
            pltpu.VMEM((9 * cin, core), jnp.float32),   # stacked shifted y1 slabs
            pltpu.VMEM((9 * cout, core), jnp.float32),  # stacked shifted y2 slabs
        ],
        compiler_params=pltpu.CompilerParams(
            # Batch-parallel grid; on v7x verify in xprof that both TCs get
            # steps (fall back to CORE_PARALLEL / core_map if one idles).
            dimension_semantics=("parallel",),
            # Raise scoped VMEM above the 16/32 MiB defaults (v5e/v6e/v7x);
            # this kernel's footprint (~0.5 KB per lane) stays far below every
            # generation's physical VMEM at these sizes.
            vmem_limit_bytes=64 * 1024 * 1024),
        cost_estimate=cost,
    )(xc, mask, w1f, t1, w2p, t2, w3p, b3p)

    # Phase-packed padded canvases -> NCHW (single reshape/transpose pass; the
    # stale padding-ring lanes are dropped here before any use).
    out = out.reshape(ng, 2, 2, cout, bt, hp, wp)
    out = out[:, :, :, :, :, PAD:PAD + h, PAD:PAD + w]
    out = jnp.transpose(out, (0, 4, 3, 5, 1, 6, 2))      # (ng, bt, cout, h, py, w, px)
    return out.reshape(n, cout, 2 * h, 2 * w)


# ----------------------------------------------------------------------------
# Pure-JAX reference (lax convs, full f32 precision) for the correctness check
# ----------------------------------------------------------------------------
def upsample_reference(params, upsampled, shortcut):
    x = jnp.concatenate([upsampled, shortcut], axis=1)

    def bn(z, g, b, m, v):
        g = g[None, :, None, None]; b = b[None, :, None, None]
        m = m[None, :, None, None]; v = v[None, :, None, None]
        return (z - m) / jnp.sqrt(v + EPS) * g + b

    dn = ("NCHW", "OIHW", "NCHW")
    y = jax.lax.conv_general_dilated(x, params["w1"], (1, 1), "VALID",
                                     dimension_numbers=dn, precision="highest")
    y = y + params["b1"][None, :, None, None]
    y = jax.nn.relu(bn(y, params["bn1_gamma"], params["bn1_beta"],
                       params["bn1_mean"], params["bn1_var"]))
    y = jax.lax.conv_general_dilated(y, params["w2"], (1, 1), ((1, 1), (1, 1)),
                                     dimension_numbers=dn, precision="highest")
    y = y + params["b2"][None, :, None, None]
    y = jax.nn.relu(bn(y, params["bn2_gamma"], params["bn2_beta"],
                       params["bn2_mean"], params["bn2_var"]))
    w_eq = jnp.transpose(params["w3"], (1, 0, 2, 3))[:, :, ::-1, ::-1]
    y = jax.lax.conv_general_dilated(y, w_eq, (1, 1), ((2, 2), (2, 2)),
                                     lhs_dilation=(2, 2), dimension_numbers=dn,
                                     precision="highest")
    return y + params["b3"][None, :, None, None]


if __name__ == "__main__":
    key = jax.random.PRNGKey(0)
    k_up, k_sc, k_par = jax.random.split(key, 3)

    batch, up_c, sc_c, hw = 2, 2, 2, 16
    in_channels = up_c + sc_c          # channel count after the concat
    out_channels = 4

    upsampled = jax.random.normal(k_up, (batch, up_c, hw, hw), dtype=jnp.float32)
    shortcut = jax.random.normal(k_sc, (batch, sc_c, hw, hw), dtype=jnp.float32)
    params = init_params(k_par, in_channels, out_channels)

    fwd = jax.jit(upsample_forward)
    out = jax.block_until_ready(fwd(params, upsampled, shortcut))
    assert out.shape == (batch, out_channels, 2 * hw, 2 * hw), out.shape

    ref = jax.block_until_ready(upsample_reference(params, upsampled, shortcut))
    np.testing.assert_allclose(np.asarray(out), np.asarray(ref),
                               rtol=1e-5, atol=1e-5)

    print("KERNEL_OK")
</pallas_src>

<mosaic_0001>
module attributes {stable_mosaic.version = 11 : i64} {
  func.func @_upsample_fused_kernel(%arg0: i32, %arg1: memref<1x4x800xf32, #tpu.memory_space<vmem>>, %arg2: memref<1x800xf32, #tpu.memory_space<vmem>>, %arg3: memref<4x4xf32, #tpu.memory_space<vmem>>, %arg4: memref<4x1xf32, #tpu.memory_space<vmem>>, %arg5: memref<4x36xf32, #tpu.memory_space<vmem>>, %arg6: memref<4x1xf32, #tpu.memory_space<vmem>>, %arg7: memref<16x36xf32, #tpu.memory_space<vmem>>, %arg8: memref<16x1xf32, #tpu.memory_space<vmem>>, %arg9: memref<1x16x800xf32, #tpu.memory_space<vmem>>, %arg10: memref<4x800xf32, #tpu.memory_space<vmem>>, %arg11: memref<4x800xf32, #tpu.memory_space<vmem>>, %arg12: memref<36x758xf32, #tpu.memory_space<vmem>>, %arg13: memref<36x758xf32, #tpu.memory_space<vmem>>) attributes {dimension_semantics = [#tpu.dimension_semantics<parallel>], iteration_bounds = array<i64: 1>, scalar_prefetch = 0 : i64, scratch_operands = 4 : i64, tpu.core_type = #tpu.core_type<tc>, window_params = [{transform_indices = @transform_0, window_bounds = array<i64: 1, 4, 800>}, {pipeline_mode = #tpu.pipeline_mode<synchronous>, transform_indices = @transform_1, window_bounds = array<i64: 1, 800>}, {pipeline_mode = #tpu.pipeline_mode<synchronous>, transform_indices = @transform_2, window_bounds = array<i64: 4, 4>}, {pipeline_mode = #tpu.pipeline_mode<synchronous>, transform_indices = @transform_3, window_bounds = array<i64: 4, 1>}, {pipeline_mode = #tpu.pipeline_mode<synchronous>, transform_indices = @transform_4, window_bounds = array<i64: 4, 36>}, {pipeline_mode = #tpu.pipeline_mode<synchronous>, transform_indices = @transform_5, window_bounds = array<i64: 4, 1>}, {pipeline_mode = #tpu.pipeline_mode<synchronous>, transform_indices = @transform_6, window_bounds = array<i64: 16, 36>}, {pipeline_mode = #tpu.pipeline_mode<synchronous>, transform_indices = @transform_7, window_bounds = array<i64: 16, 1>}, {transform_indices = @transform_8, window_bounds = array<i64: 1, 16, 800>}]} {
    %c0 = arith.constant 0 : index
    %c0_0 = arith.constant 0 : index
    %0 = vector.load %arg3[%c0, %c0_0] : memref<4x4xf32, #tpu.memory_space<vmem>>, vector<4x4xf32>
    %c0_1 = arith.constant 0 : index
    %c0_2 = arith.constant 0 : index
    %c0_3 = arith.constant 0 : index
    %1 = vector.load %arg1[%c0_1, %c0_2, %c0_3] : memref<1x4x800xf32, #tpu.memory_space<vmem>>, vector<1x4x800xf32>
    %2 = vector.shape_cast %1 : vector<1x4x800xf32> to vector<4x800xf32>
    %cst = arith.constant dense<0.000000e+00> : vector<4x800xf32>
    %3 = tpu.matmul %0, %2, %cst {dimension_numbers = #tpu.dot_dimension_numbers<[1], [0], [0], [1], [0, 0, 1, 1], [], []>, precision = #tpu.contract_precision<fp32>} : vector<4x4xf32>, vector<4x800xf32>, vector<4x800xf32> -> vector<4x800xf32>
    %c0_4 = arith.constant 0 : index
    %c0_5 = arith.constant 0 : index
    %4 = vector.load %arg4[%c0_4, %c0_5] : memref<4x1xf32, #tpu.memory_space<vmem>>, vector<4x1xf32>
    %5 = vector.broadcast %4 : vector<4x1xf32> to vector<4x800xf32>
    %6 = arith.addf %3, %5 : vector<4x800xf32>
    %cst_6 = arith.constant 0.000000e+00 : f32
    %7 = vector.broadcast %cst_6 : f32 to vector<4x800xf32>
    %8 = arith.maximumf %6, %7 : vector<4x800xf32>
    %c0_7 = arith.constant 0 : index
    %c0_8 = arith.constant 0 : index
    %9 = vector.load %arg2[%c0_7, %c0_8] : memref<1x800xf32, #tpu.memory_space<vmem>>, vector<1x800xf32>
    %10 = vector.broadcast %9 : vector<1x800xf32> to vector<4x800xf32>
    %11 = arith.mulf %8, %10 : vector<4x800xf32>
    %c0_9 = arith.constant 0 : index
    %c0_10 = arith.constant 0 : index
    %12 = vector.load %arg10[%c0_9, %c0_10] : memref<4x800xf32, #tpu.memory_space<vmem>>, vector<4x800xf32>
    tpu.vector_store %arg10[%c0_9, %c0_10], %11 {strides = array<i32>} : memref<4x800xf32, #tpu.memory_space<vmem>>, vector<4x800xf32>,
    %c0_11 = arith.constant 0 : index
    %c0_12 = arith.constant 0 : index
    %13 = vector.load %arg10[%c0_11, %c0_12] : memref<4x800xf32, #tpu.memory_space<vmem>>, vector<4x758xf32>
    %c0_13 = arith.constant 0 : index
    %c0_14 = arith.constant 0 : index
    %14 = vector.load %arg12[%c0_13, %c0_14] : memref<36x758xf32, #tpu.memory_space<vmem>>, vector<4x758xf32>
    tpu.vector_store %arg12[%c0_13, %c0_14], %13 {strides = array<i32>} : memref<36x758xf32, #tpu.memory_space<vmem>>, vector<4x758xf32>,
    %c0_15 = arith.constant 0 : index
    %c1 = arith.constant 1 : index
    %15 = vector.load %arg10[%c0_15, %c1] : memref<4x800xf32, #tpu.memory_space<vmem>>, vector<4x758xf32>
    %c4 = arith.constant 4 : index
    %c0_16 = arith.constant 0 : index
    %16 = vector.load %arg12[%c4, %c0_16] : memref<36x758xf32, #tpu.memory_space<vmem>>, vector<4x758xf32>
    tpu.vector_store %arg12[%c4, %c0_16], %15 {strides = array<i32>} : memref<36x758xf32, #tpu.memory_space<vmem>>, vector<4x758xf32>,
    %c0_17 = arith.constant 0 : index
    %c2 = arith.constant 2 : index
    %17 = vector.load %arg10[%c0_17, %c2] : memref<4x800xf32, #tpu.memory_space<vmem>>, vector<4x758xf32>
    %c8 = arith.constant 8 : index
    %c0_18 = arith.constant 0 : index
    %18 = vector.load %arg12[%c8, %c0_18] : memref<36x758xf32, #tpu.memory_space<vmem>>, vector<4x758xf32>
    tpu.vector_store %arg12[%c8, %c0_18], %17 {strides = array<i32>} : memref<36x758xf32, #tpu.memory_space<vmem>>, vector<4x758xf32>,
    %c0_19 = arith.constant 0 : index
    %c20 = arith.constant 20 : index
    %19 = vector.load %arg10[%c0_19, %c20] : memref<4x800xf32, #tpu.memory_space<vmem>>, vector<4x758xf32>
    %c12 = arith.constant 12 : index
    %c0_20 = arith.constant 0 : index
    %20 = vector.load %arg12[%c12, %c0_20] : memref<36x758xf32, #tpu.memory_space<vmem>>, vector<4x758xf32>
    tpu.vector_store %arg12[%c12, %c0_20], %19 {strides = array<i32>} : memref<36x758xf32, #tpu.memory_space<vmem>>, vector<4x758xf32>,
    %c0_21 = arith.constant 0 : index
    %c21 = arith.constant 21 : index
    %21 = vector.load %arg10[%c0_21, %c21] : memref<4x800xf32, #tpu.memory_space<vmem>>, vector<4x758xf32>
    %c16 = arith.constant 16 : index
    %c0_22 = arith.constant 0 : index
    %22 = vector.load %arg12[%c16, %c0_22] : memref<36x758xf32, #tpu.memory_space<vmem>>, vector<4x758xf32>
    tpu.vector_store %arg12[%c16, %c0_22], %21 {strides = array<i32>} : memref<36x758xf32, #tpu.memory_space<vmem>>, vector<4x758xf32>,
    %c0_23 = arith.constant 0 : index
    %c22 = arith.constant 22 : index
    %23 = vector.load %arg10[%c0_23, %c22] : memref<4x800xf32, #tpu.memory_space<vmem>>, vector<4x758xf32>
    %c20_24 = arith.constant 20 : index
    %c0_25 = arith.constant 0 : index
    %24 = vector.load %arg12[%c20_24, %c0_25] : memref<36x758xf32, #tpu.memory_space<vmem>>, vector<4x758xf32>
    tpu.vector_store %arg12[%c20_24, %c0_25], %23 {strides = array<i32>} : memref<36x758xf32, #tpu.memory_space<vmem>>, vector<4x758xf32>,
    %c0_26 = arith.constant 0 : index
    %c40 = arith.constant 40 : index
    %25 = vector.load %arg10[%c0_26, %c40] : memref<4x800xf32, #tpu.memory_space<vmem>>, vector<4x758xf32>
    %c24 = arith.constant 24 : index
    %c0_27 = arith.constant 0 : index
    %26 = vector.load %arg12[%c24, %c0_27] : memref<36x758xf32, #tpu.memory_space<vmem>>, vector<4x758xf32>
    tpu.vector_store %arg12[%c24, %c0_27], %25 {strides = array<i32>} : memref<36x758xf32, #tpu.memory_space<vmem>>, vector<4x758xf32>,
    %c0_28 = arith.constant 0 : index
    %c41 = arith.constant 41 : index
    %27 = vector.load %arg10[%c0_28, %c41] : memref<4x800xf32, #tpu.memory_space<vmem>>, vector<4x758xf32>
    %c28 = arith.constant 28 : index
    %c0_29 = arith.constant 0 : index
    %28 = vector.load %arg12[%c28, %c0_29] : memref<36x758xf32, #tpu.memory_space<vmem>>, vector<4x758xf32>
    tpu.vector_store %arg12[%c28, %c0_29], %27 {strides = array<i32>} : memref<36x758xf32, #tpu.memory_space<vmem>>, vector<4x758xf32>,
    %c0_30 = arith.constant 0 : index
    %c42 = arith.constant 42 : index
    %29 = vector.load %arg10[%c0_30, %c42] : memref<4x800xf32, #tpu.memory_space<vmem>>, vector<4x758xf32>
    %c32 = arith.constant 32 : index
    %c0_31 = arith.constant 0 : index
    %30 = vector.load %arg12[%c32, %c0_31] : memref<36x758xf32, #tpu.memory_space<vmem>>, vector<4x758xf32>
    tpu.vector_store %arg12[%c32, %c0_31], %29 {strides = array<i32>} : memref<36x758xf32, #tpu.memory_space<vmem>>, vector<4x758xf32>,
    %c0_32 = arith.constant 0 : index
    %c0_33 = arith.constant 0 : index
    %31 = vector.load %arg5[%c0_32, %c0_33] : memref<4x36xf32, #tpu.memory_space<vmem>>, vector<4x36xf32>
    %c0_34 = arith.constant 0 : index
    %c0_35 = arith.constant 0 : index
    %32 = vector.load %arg12[%c0_34, %c0_35] : memref<36x758xf32, #tpu.memory_space<vmem>>, vector<36x758xf32>
    %cst_36 = arith.constant dense<0.000000e+00> : vector<4x758xf32>
    %33 = tpu.matmul %31, %32, %cst_36 {dimension_numbers = #tpu.dot_dimension_numbers<[1], [0], [0], [1], [0, 0, 1, 1], [], []>, precision = #tpu.contract_precision<fp32>} : vector<4x36xf32>, vector<36x758xf32>, vector<4x758xf32> -> vector<4x758xf32>
    %c0_37 = arith.constant 0 : index
    %c0_38 = arith.constant 0 : index
    %34 = vector.load %arg6[%c0_37, %c0_38] : memref<4x1xf32, #tpu.memory_space<vmem>>, vector<4x1xf32>
    %35 = vector.broadcast %34 : vector<4x1xf32> to vector<4x758xf32>
    %36 = arith.addf %33, %35 : vector<4x758xf32>
    %cst_39 = arith.constant 0.000000e+00 : f32
    %37 = vector.broadcast %cst_39 : f32 to vector<4x758xf32>
    %38 = arith.maximumf %36, %37 : vector<4x758xf32>
    %c0_40 = arith.constant 0 : index
    %c21_41 = arith.constant 21 : index
    %39 = vector.load %arg2[%c0_40, %c21_41] : memref<1x800xf32, #tpu.memory_space<vmem>>, vector<1x758xf32>
    %40 = vector.broadcast %39 : vector<1x758xf32> to vector<4x758xf32>
    %41 = arith.mulf %38, %40 : vector<4x758xf32>
    %c0_42 = arith.constant 0 : index
    %c21_43 = arith.constant 21 : index
    %42 = vector.load %arg11[%c0_42, %c21_43] : memref<4x800xf32, #tpu.memory_space<vmem>>, vector<4x758xf32>
    tpu.vector_store %arg11[%c0_42, %c21_43], %41 {strides = array<i32>} : memref<4x800xf32, #tpu.memory_space<vmem>>, vector<4x758xf32>,
    %c0_44 = arith.constant 0 : index
    %c0_45 = arith.constant 0 : index
    %43 = vector.load %arg11[%c0_44, %c0_45] : memref<4x800xf32, #tpu.memory_space<vmem>>, vector<4x758xf32>
    %c0_46 = arith.constant 0 : index
    %c0_47 = arith.constant 0 : index
    %44 = vector.load %arg13[%c0_46, %c0_47] : memref<36x758xf32, #tpu.memory_space<vmem>>, vector<4x758xf32>
    tpu.vector_store %arg13[%c0_46, %c0_47], %43 {strides = array<i32>} : memref<36x758xf32, #tpu.memory_space<vmem>>, vector<4x758xf32>,
    %c0_48 = arith.constant 0 : index
    %c1_49 = arith.constant 1 : index
    %45 = vector.load %arg11[%c0_48, %c1_49] : memref<4x800xf32, #tpu.memory_space<vmem>>, vector<4x758xf32>
    %c4_50 = arith.constant 4 : index
    %c0_51 = arith.constant 0 : index
    %46 = vector.load %arg13[%c4_50, %c0_51] : memref<36x758xf32, #tpu.memory_space<vmem>>, vector<4x758xf32>
    tpu.vector_store %arg13[%c4_50, %c0_51], %45 {strides = array<i32>} : memref<36x758xf32, #tpu.memory_space<vmem>>, vector<4x758xf32>,
    %c0_52 = arith.constant 0 : index
    %c2_53 = arith.constant 2 : index
    %47 = vector.load %arg11[%c0_52, %c2_53] : memref<4x800xf32, #tpu.memory_space<vmem>>, vector<4x758xf32>
    %c8_54 = arith.constant 8 : index
    %c0_55 = arith.constant 0 : index
    %48 = vector.load %arg13[%c8_54, %c0_55] : memref<36x758xf32, #tpu.memory_space<vmem>>, vector<4x758xf32>
    tpu.vector_store %arg13[%c8_54, %c0_55], %47 {strides = array<i32>} : memref<36x758xf32, #tpu.memory_space<vmem>>, vector<4x758xf32>,
    %c0_56 = arith.constant 0 : index
    %c20_57 = arith.constant 20 : index
    %49 = vector.load %arg11[%c0_56, %c20_57] : memref<4x800xf32, #tpu.memory_space<vmem>>, vector<4x758xf32>
    %c12_58 = arith.constant 12 : index
    %c0_59 = arith.constant 0 : index
    %50 = vector.load %arg13[%c12_58, %c0_59] : memref<36x758xf32, #tpu.memory_space<vmem>>, vector<4x758xf32>
    tpu.vector_store %arg13[%c12_58, %c0_59], %49 {strides = array<i32>} : memref<36x758xf32, #tpu.memory_space<vmem>>, vector<4x758xf32>,
    %c0_60 = arith.constant 0 : index
    %c21_61 = arith.constant 21 : index
    %51 = vector.load %arg11[%c0_60, %c21_61] : memref<4x800xf32, #tpu.memory_space<vmem>>, vector<4x758xf32>
    %c16_62 = arith.constant 16 : index
    %c0_63 = arith.constant 0 : index
    %52 = vector.load %arg13[%c16_62, %c0_63] : memref<36x758xf32, #tpu.memory_space<vmem>>, vector<4x758xf32>
    tpu.vector_store %arg13[%c16_62, %c0_63], %51 {strides = array<i32>} : memref<36x758xf32, #tpu.memory_space<vmem>>, vector<4x758xf32>,
    %c0_64 = arith.constant 0 : index
    %c22_65 = arith.constant 22 : index
    %53 = vector.load %arg11[%c0_64, %c22_65] : memref<4x800xf32, #tpu.memory_space<vmem>>, vector<4x758xf32>
    %c20_66 = arith.constant 20 : index
    %c0_67 = arith.constant 0 : index
    %54 = vector.load %arg13[%c20_66, %c0_67] : memref<36x758xf32, #tpu.memory_space<vmem>>, vector<4x758xf32>
    tpu.vector_store %arg13[%c20_66, %c0_67], %53 {strides = array<i32>} : memref<36x758xf32, #tpu.memory_space<vmem>>, vector<4x758xf32>,
    %c0_68 = arith.constant 0 : index
    %c40_69 = arith.constant 40 : index
    %55 = vector.load %arg11[%c0_68, %c40_69] : memref<4x800xf32, #tpu.memory_space<vmem>>, vector<4x758xf32>
    %c24_70 = arith.constant 24 : index
    %c0_71 = arith.constant 0 : index
    %56 = vector.load %arg13[%c24_70, %c0_71] : memref<36x758xf32, #tpu.memory_space<vmem>>, vector<4x758xf32>
    tpu.vector_store %arg13[%c24_70, %c0_71], %55 {strides = array<i32>} : memref<36x758xf32, #tpu.memory_space<vmem>>, vector<4x758xf32>,
    %c0_72 = arith.constant 0 : index
    %c41_73 = arith.constant 41 : index
    %57 = vector.load %arg11[%c0_72, %c41_73] : memref<4x800xf32, #tpu.memory_space<vmem>>, vector<4x758xf32>
    %c28_74 = arith.constant 28 : index
    %c0_75 = arith.constant 0 : index
    %58 = vector.load %arg13[%c28_74, %c0_75] : memref<36x758xf32, #tpu.memory_space<vmem>>, vector<4x758xf32>
    tpu.vector_store %arg13[%c28_74, %c0_75], %57 {strides = array<i32>} : memref<36x758xf32, #tpu.memory_space<vmem>>, vector<4x758xf32>,
    %c0_76 = arith.constant 0 : index
    %c42_77 = arith.constant 42 : index
    %59 = vector.load %arg11[%c0_76, %c42_77] : memref<4x800xf32, #tpu.memory_space<vmem>>, vector<4x758xf32>
    %c32_78 = arith.constant 32 : index
    %c0_79 = arith.constant 0 : index
    %60 = vector.load %arg13[%c32_78, %c0_79] : memref<36x758xf32, #tpu.memory_space<vmem>>, vector<4x758xf32>
    tpu.vector_store %arg13[%c32_78, %c0_79], %59 {strides = array<i32>} : memref<36x758xf32, #tpu.memory_space<vmem>>, vector<4x758xf32>,
    %c0_80 = arith.constant 0 : index
    %c0_81 = arith.constant 0 : index
    %61 = vector.load %arg7[%c0_80, %c0_81] : memref<16x36xf32, #tpu.memory_space<vmem>>, vector<16x36xf32>
    %c0_82 = arith.constant 0 : index
    %c0_83 = arith.constant 0 : index
    %62 = vector.load %arg13[%c0_82, %c0_83] : memref<36x758xf32, #tpu.memory_space<vmem>>, vector<36x758xf32>
    %cst_84 = arith.constant dense<0.000000e+00> : vector<16x758xf32>
    %63 = tpu.matmul %61, %62, %cst_84 {dimension_numbers = #tpu.dot_dimension_numbers<[1], [0], [0], [1], [0, 0, 1, 1], [], []>, precision = #tpu.contract_precision<fp32>} : vector<16x36xf32>, vector<36x758xf32>, vector<16x758xf32> -> vector<16x758xf32>
    %c0_85 = arith.constant 0 : index
    %c0_86 = arith.constant 0 : index
    %64 = vector.load %arg8[%c0_85, %c0_86] : memref<16x1xf32, #tpu.memory_space<vmem>>, vector<16x1xf32>
    %65 = vector.broadcast %64 : vector<16x1xf32> to vector<16x758xf32>
    %66 = arith.addf %63, %65 : vector<16x758xf32>
    %c0_87 = arith.constant 0 : index
    %c0_88 = arith.constant 0 : index
    %c21_89 = arith.constant 21 : index
    %67 = vector.load %arg9[%c0_87, %c0_88, %c21_89] : memref<1x16x800xf32, #tpu.memory_space<vmem>>, vector<1x16x758xf32>
    %68 = vector.shape_cast %67 : vector<1x16x758xf32> to vector<16x758xf32>
    %69 = vector.shape_cast %66 : vector<16x758xf32> to vector<1x16x758xf32>
    tpu.vector_store %arg9[%c0_87, %c0_88, %c21_89], %69 {strides = array<i32>} : memref<1x16x800xf32, #tpu.memory_space<vmem>>, vector<1x16x758xf32>,
    return
  }
  func.func @transform_0(%arg0: i32) -> (i32, i32, i32) {
    %c0_i32 = arith.constant 0 : i32
    %c0_i32_0 = arith.constant 0 : i32
    %c0_i32_1 = arith.constant 0 : i32
    return %arg0, %c0_i32, %c0_i32_0 : i32, i32, i32
  }
  func.func @transform_1(%arg0: i32) -> (i32, i32) {
    %c0_i32 = arith.constant 0 : i32
    %c0_i32_0 = arith.constant 0 : i32
    %c0_i32_1 = arith.constant 0 : i32
    return %c0_i32, %c0_i32_0 : i32, i32
  }
  func.func @transform_2(%arg0: i32) -> (i32, i32) {
    %c0_i32 = arith.constant 0 : i32
    %c0_i32_0 = arith.constant 0 : i32
    %c0_i32_1 = arith.constant 0 : i32
    return %c0_i32, %c0_i32_0 : i32, i32
  }
  func.func @transform_3(%arg0: i32) -> (i32, i32) {
    %c0_i32 = arith.constant 0 : i32
    %c0_i32_0 = arith.constant 0 : i32
    %c0_i32_1 = arith.constant 0 : i32
    return %c0_i32, %c0_i32_0 : i32, i32
  }
  func.func @transform_4(%arg0: i32) -> (i32, i32) {
    %c0_i32 = arith.constant 0 : i32
    %c0_i32_0 = arith.constant 0 : i32
    %c0_i32_1 = arith.constant 0 : i32
    return %c0_i32, %c0_i32_0 : i32, i32
  }
  func.func @transform_5(%arg0: i32) -> (i32, i32) {
    %c0_i32 = arith.constant 0 : i32
    %c0_i32_0 = arith.constant 0 : i32
    %c0_i32_1 = arith.constant 0 : i32
    return %c0_i32, %c0_i32_0 : i32, i32
  }
  func.func @transform_6(%arg0: i32) -> (i32, i32) {
    %c0_i32 = arith.constant 0 : i32
    %c0_i32_0 = arith.constant 0 : i32
    %c0_i32_1 = arith.constant 0 : i32
    return %c0_i32, %c0_i32_0 : i32, i32
  }
  func.func @transform_7(%arg0: i32) -> (i32, i32) {
    %c0_i32 = arith.constant 0 : i32
    %c0_i32_0 = arith.constant 0 : i32
    %c0_i32_1 = arith.constant 0 : i32
    return %c0_i32, %c0_i32_0 : i32, i32
  }
  func.func @transform_8(%arg0: i32) -> (i32, i32, i32) {
    %c0_i32 = arith.constant 0 : i32
    %c0_i32_0 = arith.constant 0 : i32
    %c0_i32_1 = arith.constant 0 : i32
    return %arg0, %c0_i32, %c0_i32_0 : i32, i32, i32
  }
}

</mosaic_0001>

<bundles_post_ra>
// kernel: upsample_forward.1
= control target key start
LH: loop header
LB: loop body
LE: loop exit
PB: predicated region body
PF: predicated region fallthrough
CT: control target
= control target key end

     0   :  { %13 = vsyncpa [#allocation7], 0  ;;  %s9208_s0 = inlined_call_operand.hbm [shape: f32[1,4,800], index: 0, kind: input, shape index: {}]   ;;  %s9209_s1 = inlined_call_operand.hbm [shape: f32[1,800], index: 1, kind: input, shape index: {}]   ;;  %s9210_s2 = inlined_call_operand.hbm [shape: f32[4,4], index: 2, kind: input, shape index: {}]   ;;  %s9211_s3 = inlined_call_operand.hbm [shape: f32[4,1], index: 3, kind: input, shape index: {}]   ;;  %s9212_s4 = inlined_call_operand.hbm [shape: f32[4,36], index: 4, kind: input, shape index: {}]   ;;  %s9213_s5 = inlined_call_operand.hbm [shape: f32[4,1], index: 5, kind: input, shape index: {}]   ;;  %s9214_s6 = inlined_call_operand.hbm [shape: f32[16,36], index: 6, kind: input, shape index: {}]   ;;  %s9215_s7 = inlined_call_operand.hbm [shape: f32[16,1], index: 7, kind: input, shape index: {}]   ;;  %s9216_s8 = inlined_call_operand.hbm [shape: f32[1,16,800], index: 8, kind: output, shape index: {}]  }
   0x1   :  { %14 = vsyncpa [#allocation10], 0 }
   0x2   :  { %15 = vsyncpa [#allocation13], 0 }
   0x3   :  { %16 = vsyncpa [#allocation16], 0 }
   0x4   :  { %17 = vsyncpa [#allocation19], 0 }
   0x5   :  { %18 = vsyncpa [#allocation8], 0  ;;  %s7421_s27 = smov [#allocation9]   ;;  %s7422_s29 = smov [#allocation12]  }
   0x6   :  { %s35_s28 = sshll.u32 %s7421_s27, 4  ;;  %s55_s30 = sshll.u32 %s7422_s29, 4  ;;  %s36_s28 = int_to_ptr.vmem [resolvable:$true] %s35_s28  ;;  %s56_s30 = int_to_ptr.vmem [resolvable:$true] %s55_s30 }
   0x7   :  { %s7211_s11 = scalar_lea.hbm %s9209_s1, 112 }
   0x8   :  { %p7212_p0 = scmp.ne.s32.totalorder %s9209_s1, %s7211_s11  ;;  %p7215_p1 = scmp.lt.u32.totalorder %s7211_s11, %s9209_s1 }
   0xa   :  { %p7217_p2 = pnand %p7215_p1, %p7212_p0 }
   0xc   :  { %7220 = shalt.err (!%p7217_p2)
}
   0xd   :  { %s7221_s16 = scalar_lea.vmem %s36_s28, 112  ;;  %s7225_s17 = scalar_lea.vmem %s36_s28, 128 }
   0xe   :  { %p7222_p3 = scmp.ne.s32.totalorder %s36_s28, %s7221_s16  ;;  %p7226_p4 = scmp.lt.s32.totalorder %s36_s28, %s36_s28 }
   0xf   :  { %p7227_p5 = scmp.lt.s32.totalorder %s7225_s17, %s7221_s16 }
  0x11   :  { %p7228_p6 = por %p7227_p5, %p7226_p4 }
  0x13   :  { %p7229_p7 = pnand %p7228_p6, %p7222_p3 }
  0x15   :  { %7232 = shalt.err (!%p7229_p7)
}
  0x16   :  { %38 = dma.hbm_to_vmem [thread:$0]  %s9209_s1, 112, %s36_s28, [#allocation10]  }
  0x17   :  { %s7233_s22 = scalar_lea.hbm %s9211_s3, 64 }
  0x18   :  { %p7234_p8 = scmp.ne.s32.totalorder %s9211_s3, %s7233_s22  ;;  %p7237_p9 = scmp.lt.u32.totalorder %s7233_s22, %s9211_s3 }
  0x1a   :  { %p7239_p10 = pnand %p7237_p9, %p7234_p8 }
  0x1c   :  { %7242 = shalt.err (!%p7239_p10)
}
  0x1d   :  { %s7243_s27 = scalar_lea.vmem %s56_s30, 64  ;;  %p7248_p12 = scmp.lt.s32.totalorder %s56_s30, %s56_s30 }
  0x1e   :  { %p7244_p11 = scmp.ne.s32.totalorder %s56_s30, %s7243_s27  ;;  %p7249_p13 = scmp.lt.s32.totalorder %s7243_s27, %s7243_s27 }
  0x20   :  { %p7250_p0 = por %p7249_p13, %p7248_p12 }
  0x22   :  { %p7251_p1 = pnand %p7250_p0, %p7244_p11 }
  0x24   :  { %7254 = shalt.err (!%p7251_p1)
}
  0x25   :  { %58 = dma.hbm_to_vmem [thread:$0]  %s9211_s3, 64, %s56_s30, [#allocation13]  }
  0x26   :  { %s7423_s29 = smov [#allocation15]   ;;  %s7424_s10 = smov [#allocation6]  }
  0x27   :  { %s75_s9 = sshll.u32 %s7423_s29, 4  ;;  %s25_s11 = sshll.u32 %s7424_s10, 4  ;;  %s76_s9 = int_to_ptr.vmem [resolvable:$true] %s75_s9  ;;  %s26_s11 = int_to_ptr.vmem [resolvable:$true] %s25_s11 }
  0x28   :  { %s7255_s14 = scalar_lea.hbm %s9213_s5, 64 }
  0x29   :  { %p7256_p2 = scmp.ne.s32.totalorder %s9213_s5, %s7255_s14  ;;  %p7259_p3 = scmp.lt.u32.totalorder %s7255_s14, %s9213_s5 }
  0x2b   :  { %p7261_p4 = pnand %p7259_p3, %p7256_p2 }
  0x2d   :  { %7264 = shalt.err (!%p7261_p4)
}
  0x2e   :  { %s7265_s3 = scalar_lea.vmem %s76_s9, 64  ;;  %p7270_p6 = scmp.lt.s32.totalorder %s76_s9, %s76_s9 }
  0x2f   :  { %p7266_p5 = scmp.ne.s32.totalorder %s76_s9, %s7265_s3  ;;  %p7271_p7 = scmp.lt.s32.totalorder %s7265_s3, %s7265_s3 }
  0x31   :  { %p7272_p8 = por %p7271_p7, %p7270_p6 }
  0x33   :  { %p7273_p9 = pnand %p7272_p8, %p7266_p5 }
  0x35   :  { %7276 = shalt.err (!%p7273_p9)
}
  0x36   :  { %78 = dma.hbm_to_vmem [thread:$0]  %s9213_s5, 64, %s76_s9, [#allocation16]  }
  0x37   :  { %s7277_s22 = scalar_lea.hbm %s9208_s0, 448 }
  0x38   :  { %p7278_p10 = scmp.ne.s32.totalorder %s9208_s0, %s7277_s22  ;;  %p7281_p11 = scmp.lt.u32.totalorder %s7277_s22, %s9208_s0 }
  0x3a   :  { %p7283_p12 = pnand %p7281_p11, %p7278_p10 }
  0x3c   :  { %7286 = shalt.err (!%p7283_p12)
}
  0x3d   :  { %s7287_s27 = scalar_lea.vmem %s26_s11, 448  ;;  %p7292_p0 = scmp.lt.s32.totalorder %s26_s11, %s26_s11 }
  0x3e   :  { %p7288_p13 = scmp.ne.s32.totalorder %s26_s11, %s7287_s27  ;;  %p7293_p1 = scmp.lt.s32.totalorder %s7287_s27, %s7287_s27 }
  0x40   :  { %p7294_p2 = por %p7293_p1, %p7292_p0 }
  0x42   :  { %p7295_p3 = pnand %p7294_p2, %p7288_p13 }
  0x44   :  { %7298 = shalt.err (!%p7295_p3)
}
  0x45   :  { %28 = dma.hbm_to_vmem [thread:$0]  %s9208_s0, 448, %s26_s11, [#allocation7]  }
  0x46   :  { %s7425_s28 = smov [#allocation11]   ;;  %s7426_s9 = smov [#allocation14]  }
  0x47   :  { %s45_s29 = sshll.u32 %s7425_s28, 4  ;;  %s65_s10 = sshll.u32 %s7426_s9, 4  ;;  %s46_s29 = int_to_ptr.vmem [resolvable:$true] %s45_s29  ;;  %s66_s10 = int_to_ptr.vmem [resolvable:$true] %s65_s10 }
  0x48   :  { %s7299_s14 = scalar_lea.hbm %s9210_s2, 64 }
  0x49   :  { %p7300_p4 = scmp.ne.s32.totalorder %s9210_s2, %s7299_s14  ;;  %p7303_p5 = scmp.lt.u32.totalorder %s7299_s14, %s9210_s2 }
  0x4b   :  { %p7305_p6 = pnand %p7303_p5, %p7300_p4 }
  0x4d   :  { %7308 = shalt.err (!%p7305_p6)
}
  0x4e   :  { %s7309_s0 = scalar_lea.vmem %s46_s29, 64  ;;  %p7314_p8 = scmp.lt.s32.totalorder %s46_s29, %s46_s29 }
  0x4f   :  { %p7310_p7 = scmp.ne.s32.totalorder %s46_s29, %s7309_s0  ;;  %p7315_p9 = scmp.lt.s32.totalorder %s7309_s0, %s7309_s0 }
  0x51   :  { %p7316_p10 = por %p7315_p9, %p7314_p8 }
  0x53   :  { %p7317_p11 = pnand %p7316_p10, %p7310_p7 }
  0x55   :  { %7320 = shalt.err (!%p7317_p11)
}
  0x56   :  { %48 = dma.hbm_to_vmem [thread:$0]  %s9210_s2, 64, %s46_s29, [#allocation10]  }
  0x57   :  { %s7321_s20 = scalar_lea.hbm %s9212_s4, 64 }
  0x58   :  { %p7322_p12 = scmp.ne.s32.totalorder %s9212_s4, %s7321_s20  ;;  %p7325_p13 = scmp.lt.u32.totalorder %s7321_s20, %s9212_s4 }
  0x5a   :  { %p7327_p0 = pnand %p7325_p13, %p7322_p12 }
  0x5c   :  { %7330 = shalt.err (!%p7327_p0)
}
  0x5d   :  { %s7331_s25 = scalar_lea.vmem %s66_s10, 64  ;;  %p7336_p2 = scmp.lt.s32.totalorder %s66_s10, %s66_s10 }
  0x5e   :  { %p7332_p1 = scmp.ne.s32.totalorder %s66_s10, %s7331_s25  ;;  %p7337_p3 = scmp.lt.s32.totalorder %s7331_s25, %s7331_s25 }
  0x60   :  { %p7338_p4 = por %p7337_p3, %p7336_p2 }
  0x62   :  { %p7339_p5 = pnand %p7338_p4, %p7332_p1 }
  0x64   :  { %7342 = shalt.err (!%p7339_p5)
}
  0x65   :  { %68 = dma.hbm_to_vmem [thread:$0]  %s9212_s4, 64, %s66_s10, [#allocation13]  }
  0x66   :  { %s7427_s27 = smov [#allocation17]   ;;  %s7343_s29 = scalar_lea.hbm %s9214_s6, 256 }
  0x67   :  { %s84_s5 = sshll.u32 %s7427_s27, 4  ;;  %p7344_p6 = scmp.ne.s32.totalorder %s9214_s6, %s7343_s29  ;;  %s85_s5 = int_to_ptr.vmem [resolvable:$true] %s84_s5 }
  0x68   :  { %p7347_p7 = scmp.lt.u32.totalorder %s7343_s29, %s9214_s6 }
  0x6a   :  { %p7349_p8 = pnand %p7347_p7, %p7344_p6 }
  0x6c   :  { %7352 = shalt.err (!%p7349_p8)
}
  0x6d   :  { %s7353_s15 = scalar_lea.vmem %s85_s5, 256  ;;  %p7358_p10 = scmp.lt.s32.totalorder %s85_s5, %s85_s5 }
  0x6e   :  { %p7354_p9 = scmp.ne.s32.totalorder %s85_s5, %s7353_s15  ;;  %p7359_p11 = scmp.lt.s32.totalorder %s7353_s15, %s7353_s15 }
  0x70   :  { %p7360_p12 = por %p7359_p11, %p7358_p10 }
  0x72   :  { %p7361_p13 = pnand %p7360_p12, %p7354_p9 }
  0x74   :  { %7364 = shalt.err (!%p7361_p13)
}
  0x75   :  { %s7428_s4 = smov 128   ;;  %s7429_s10 = smov 8  }
  0x76   :  { %90 = dma.hbm_to_vmem [thread:$0]  %s9214_s6, 256, %s85_s5, [#allocation16], %s7428_s4, %s7428_s4, %s7429_s10  }
  0x77   :  { %s7430_s18 = smov [#allocation18]   ;;  %s7365_s30 = scalar_lea.hbm %s9215_s7, 256 }
  0x78   :  { %s96_s0 = sshll.u32 %s7430_s18, 4  ;;  %p7366_p0 = scmp.ne.s32.totalorder %s9215_s7, %s7365_s30  ;;  %s97_s0 = int_to_ptr.vmem [resolvable:$true] %s96_s0 }
  0x79   :  { %p7369_p1 = scmp.lt.u32.totalorder %s7365_s30, %s9215_s7 }
  0x7b   :  { %p7371_p2 = pnand %p7369_p1, %p7366_p0 }
  0x7d   :  { %7374 = shalt.err (!%p7371_p2)
}
  0x7e   :  { %s7375_s23 = scalar_lea.vmem %s97_s0, 256  ;;  %p7380_p4 = scmp.lt.s32.totalorder %s97_s0, %s97_s0 }
  0x7f   :  { %p7376_p3 = scmp.ne.s32.totalorder %s97_s0, %s7375_s23  ;;  %p7381_p5 = scmp.lt.s32.totalorder %s7375_s23, %s7375_s23 }
  0x81   :  { %p7382_p6 = por %p7381_p5, %p7380_p4 }
  0x83   :  { %p7383_p7 = pnand %p7382_p6, %p7376_p3 }
  0x85   :  { %7386 = shalt.err (!%p7383_p7)
}
  0x86   :  { %102 = dma.hbm_to_vmem [thread:$0]  %s9215_s7, 256, %s97_s0, [#allocation19], %s7428_s4, %s7428_s4, %s7429_s10  }
  0x87   :  { %7409 = dma.done.wait [#allocation7], 448  }
  0x88   :  { %7410 = vsyncadd [#allocation7], 4294966848 }
  0x89   :  { %7411 = dma.done.wait [#allocation10], 176  }
  0x8a   :  { %7412 = vsyncadd [#allocation10], 4294967120 }
  0x8b   :  { %7413 = dma.done.wait [#allocation13], 128  }
  0x8c   :  { %7414 = vsyncadd [#allocation13], 4294967168 }
  0x8d   :  { %7415 = dma.done.wait [#allocation16], 320  }
  0x8e   :  { %7416 = vsyncadd [#allocation16], 4294966976 }
  0x8f   :  { %7417 = dma.done.wait [#allocation19], 256  }
  0x90   :  { %7418 = vsyncadd [#allocation19], 4294967040  ;;  %v9225_v0 = vmov 0.0   ;;  %v7432_v1 = vmov 0   ;;  %vm149_vm0 = vcmask 1043456   ;;  %vm145_vm1 = vcmask 31744  }
  0x91   :  { %230 = vmatprep.mubr.f32.mxu0 %v9225_v0  ;;  %695 = vmatprep.mubr.f32.mxu1 %v9225_v0  ;;  %v128_v2 = vld [vmem:[#allocation6] sm:$0xff]  ;;  %v129_v3 = vld [vmem:[#allocation6 + $0x8] sm:$0xff]  ;;  %v130_v38 = vld [vmem:[#allocation6 + $0x10] sm:$0xff]  ;;  %vm7433_vm2 = vmmov 0   ;;  %v2014_v59 = vlaneseq  ;;  %s7434_s7 = smov 127   ;;  %s7435_s25 = smov 108  }
  0x92   :  { %7192 = vset.pattern.permute.xlu0 %v7432_v1  ;;  %7193 = vset.pattern.permute.xlu1 %v7432_v1  ;;  %v127_v4 = vld [vmem:[#allocation11] sm:$0xf]  ;;  %v142_v5 = vcombine.high %v128_v2, %v128_v2  ;;  %v143_v6 = vcombine.high %v129_v3, %v129_v3  ;;  %v150_v7 = vsel %vm149_vm0, %v128_v2, 0  ;;  %v154_v8 = vsel %vm149_vm0, %v129_v3, 0  ;;  %v132_v12 = vld [vmem:[#allocation12] sm:$0xf] }
  0x93   :  { %v7591_v9 = vand.u32 4294901760, %v150_v7  ;;  %v7593_v10 = vand.u32 4294901760, %v154_v8  ;;  %v147_v11 = vsel %vm145_vm1, %v127_v4, 0  ;;  %135 = vperm.xlu0 %7192, %v132_v12   ;;  %v144_v39 = vcombine.high %v130_v38, %v130_v38  ;;  %v131_v41 = vld [vmem:[#allocation6 + $0x18] sm:$0xf]  ;;  %s7436_s2 = smov 126  }
  0x94   :  { %v152_v13 = vsel %vm149_vm0, %v142_v5, 0  ;;  %v156_v14 = vsel %vm149_vm0, %v143_v6, 0  ;;  %v7597_v15 = vand.u32 4294901760, %v147_v11  ;;  %v158_v42 = vsel %vm149_vm0, %v130_v38, 0  ;;  %v7716_v1 = vld [vmem:[#allocation9] sm:$0x7f] }
  0x95   :  { %v7599_v16 = vand.u32 4294901760, %v152_v13  ;;  %v7601_v17 = vand.u32 4294901760, %v156_v14  ;;  %v249_v18 = vsub.f32 %v150_v7, %v7591_v9  ;;  %v714_v19 = vsub.f32 %v154_v8, %v7593_v10  ;;  %s7437_s26 = smov 107   ;;  %s7438_s27 = smov 106  }
  0x96   :  { %v7606_v20 = vsub.f32 %v147_v11, %v7597_v15  ;;  %v160_v40 = vsel %vm149_vm0, %v144_v39, 0  ;;  %v162_v44 = vsel %vm149_vm0, %v131_v41, 0  ;;  %v7644_v45 = vand.u32 4294901760, %v158_v42  ;;  %s7439_s5 = smov 88   ;;  %s7440_s1 = smov 87  }
  0x97   :  { %165 = vmatprep.subr.mxu0 %v7599_v16  ;;  %630 = vmatprep.subr.mxu1 %v7601_v17  ;;  %v243_v21 = vsub.f32 %v152_v13, %v7599_v16  ;;  %v250_v22 = vand.u32 4294901760, %v249_v18  ;;  %v708_v23 = vsub.f32 %v156_v14, %v7601_v17  ;;  %v715_v24 = vand.u32 4294901760, %v714_v19  ;;  %s7441_s28 = smov 86   ;;  %s7442_s29 = smov 21  }
  0x98   :  { %167 = vmatpush1.msra.mxu0 %v7591_v9  ;;  %632 = vmatpush1.msra.mxu1 %v7593_v10  ;;  %v7615_v25 = vand.u32 4294901760, %v7606_v20  ;;  %v7639_v43 = vand.u32 4294901760, %v160_v40  ;;  %v7648_v46 = vand.u32 4294901760, %v162_v44  ;;  %v1179_v48 = vsub.f32 %v158_v42, %v7644_v45  ;;  %s7443_s9 = smov [#allocation20]  }
  0x99   :  { %v244_v26 = vand.u32 4294901760, %v243_v21  ;;  %v251_v27 = vsub.f32 %v249_v18, %v250_v22  ;;  %v709_v28 = vand.u32 4294901760, %v708_v23  ;;  %v716_v29 = vsub.f32 %v714_v19, %v715_v24  ;;  %s6666_s12 = sshll.u32 %s7443_s9, 4  ;;  %s6667_s12 = int_to_ptr.vmem [resolvable:$true] %s6666_s12 }
  0x9a   :  { %v234_v30 = vsub.f32 %v7606_v20, %v7615_v25  ;;  %v1173_v47 = vsub.f32 %v160_v40, %v7639_v43  ;;  %v1637_v49 = vsub.f32 %v162_v44, %v7648_v46  ;;  %v1180_v51 = vand.u32 4294901760, %v1179_v48  ;;  %s7387_s13 = scalar_lea.vmem %s6667_s12, 1792  ;;  %p7392_p9 = scmp.lt.s32.totalorder %s6667_s12, %s6667_s12 }
  0x9b   :  { %v245_v31 = vsub.f32 %v243_v21, %v244_v26  ;;  %v710_v32 = vsub.f32 %v708_v23, %v709_v28  ;;  %v252_v34 = vand.u32 4294901760, %v251_v27  ;;  %v717_v35 = vand.u32 4294901760, %v716_v29  ;;  %p7388_p8 = scmp.ne.s32.totalorder %s6667_s12, %s7387_s13  ;;  %p7393_p10 = scmp.lt.s32.totalorder %s7387_s13, %s7387_s13 }
  0x9c   :  { %v7619_v33 = vand.u32 4294901760, %v234_v30  ;;  %v1174_v50 = vand.u32 4294901760, %v1173_v47  ;;  %v1638_v52 = vand.u32 4294901760, %v1637_v49  ;;  %v1181_v54 = vsub.f32 %v1179_v48, %v1180_v51 }
  0x9d   :  { %v246_v36 = vand.u32 4294901760, %v245_v31  ;;  %v711_v37 = vand.u32 4294901760, %v710_v32  ;;  %v7710_v60 = vshrl.u32 %v2014_v59, 7  ;;  %vm2071_vm3 = vcmask 257024   ;;  %p7394_p11 = por %p7393_p10, %p7392_p9 }
  0x9e   :  { %236 = vmatmul.mubr.f32.vlgmr.msra.gmra.mrb[0].mxu0 %v7619_v33  ;;  %701 = vmatmul.mubr.f32.vlgmr.msra.gmra.mrb[0].mxu1 %v7619_v33  ;;  %v1175_v53 = vsub.f32 %v1173_v47, %v1174_v50  ;;  %v1639_v55 = vsub.f32 %v1637_v49, %v1638_v52  ;;  %v1182_v57 = vand.u32 4294901760, %v1181_v54  ;;  %vm2090_vm4 = vcmask 961536  }
  0x9f   :  { %247 = vmatprep.subr.mxu0 %v246_v36  ;;  %712 = vmatprep.subr.mxu1 %v711_v37  ;;  %v2016_v61 = vsub.s32 0, %v7710_v60  ;;  %v2024_v62 = vsub.s32 2, %v7710_v60  ;;  %v2020_v2 = vsub.s32 1, %v7710_v60  ;;  %v9233_v3 = vsub.s32 3, %v7710_v60  ;;  %p7395_p12 = pnand %p7394_p11, %p7388_p8 }
  0xa0   :  { %253 = vmatpush1.msra.mxu0 %v252_v34  ;;  %718 = vmatpush1.msra.mxu1 %v717_v35  ;;  %v1176_v56 = vand.u32 4294901760, %v1175_v53  ;;  %v1640_v58 = vand.u32 4294901760, %v1639_v55  ;;  %v9230_v30 = vsub.s32 4, %v7710_v60  ;;  %v9223_v31 = vsub.s32 6, %v7710_v60 }
  0xa1   :  { %316 = vmatprep.mubr.f32.mxu0 %v9225_v0  ;;  %781 = vmatprep.mubr.f32.mxu1 %v9225_v0  ;;  %v2017_v7 = vrot.slane %v7716_v1, %v2016_v61  ;;  %v2021_v13 = vrot.slane %v7716_v1, %v2020_v2  ;;  %v9224_v32 = vsub.s32 5, %v7710_v60  ;;  %vm2113_vm5 = vcmask 1039360  }
  0xa2   :  { %326 = vmatprep.subr.mxu0 %v243_v21  ;;  %791 = vmatprep.subr.mxu1 %v708_v23  ;;  %v2033_v36 = vrot.slane %v7716_v1, %v9230_v30  ;;  %v2041_v38 = vrot.slane %v7716_v1, %v9223_v31  ;;  %vm2153_vm6 = vcmask 1031168   ;;  %vm2197_vm7 = vcmask 883712  }
  0xa3   :  { %v2037_v42 = vrot.slane %v7716_v1, %v9224_v32  ;;  %vm2241_vm8 = vcmask 875520   ;;  %vm2286_vm9 = vcmask 867328   ;;  %vm2375_vm10 = vcmask 711680  }
  0xa4   :  { %vm2330_vm11 = vcmask 719872   ;;  %vm2475_vm12 = vcmask 293888   ;;  %vm2419_vm13 = vcmask 703488   ;;  %vm2130_vm14 = vcmask 965636  }
  0xa5   :  { %vm4300_vm15 = vcmask 1043624   ;;  %vm4301_vm1 = vcmask 1047556  }
  0xa6   :  { %318 = vmatmul.mubr.f32.vlgmr.msra.gmra.mrb[0].mxu0 %v7597_v15  ;;  %783 = vmatmul.mubr.f32.vlgmr.msra.gmra.mrb[0].mxu1 %v7597_v15 }
  0xa7   :  { %329 = vmatpush1.msra.mxu0 %v249_v18  ;;  %794 = vmatpush1.msra.mxu1 %v714_v19 }
  0xa8   :  { %392 = vmatprep.mubr.f32.mxu0 %v9225_v0  ;;  %857 = vmatprep.mubr.f32.mxu1 %v9225_v0 }
  0xa9   :  { %402 = vmatprep.subr.mxu0 %v7599_v16  ;;  %867 = vmatprep.subr.mxu1 %v7601_v17 }
  0xae   :  { %395 = vmatmul.mubr.f32.vlgmr.msra.gmra.mrb[0].mxu0 %v7606_v20  ;;  %860 = vmatmul.mubr.f32.vlgmr.msra.gmra.mrb[0].mxu1 %v7606_v20 }
  0xaf   :  { %404 = vmatpush1.msra.mxu0 %v7591_v9  ;;  %869 = vmatpush1.msra.mxu1 %v7593_v10 }
  0xb0   :  { %467 = vmatprep.mubr.f32.mxu0 %v9225_v0  ;;  %932 = vmatprep.mubr.f32.mxu1 %v9225_v0 }
  0xb1   :  { %480 = vmatprep.subr.mxu0 %v244_v26  ;;  %945 = vmatprep.subr.mxu1 %v709_v28 }
  0xb6   :  { %471 = vmatmul.mubr.f32.vlgmr.msra.gmra.mrb[0].mxu0 %v7615_v25  ;;  %936 = vmatmul.mubr.f32.vlgmr.msra.gmra.mrb[0].mxu1 %v7615_v25 }
  0xb7   :  { %484 = vmatpush1.msra.mxu0 %v250_v22  ;;  %949 = vmatpush1.msra.mxu1 %v715_v24 }
  0xb8   :  { %547 = vmatprep.mubr.f32.mxu0 %v9225_v0  ;;  %1012 = vmatprep.mubr.f32.mxu1 %v9225_v0 }
  0xb9   :  { %556 = vmatprep.subr.mxu0 %v7599_v16  ;;  %1021 = vmatprep.subr.mxu1 %v7601_v17 }
  0xbe   :  { %549 = vmatmul.mubr.f32.vlgmr.msra.gmra.mrb[0].mxu0 %v7597_v15  ;;  %1014 = vmatmul.mubr.f32.vlgmr.msra.gmra.mrb[0].mxu1 %v7597_v15 }
  0xbf   :  { %558 = vmatpush1.msra.mxu0 %v7591_v9  ;;  %1023 = vmatpush1.msra.mxu1 %v7593_v10  ;;  %v2025_v9 = vrot.slane %v7716_v1, %v2024_v62 }
  0xc0   :  { %621 = vmatprep.mubr.f32.mxu0 %v9225_v0  ;;  %1086 = vmatprep.mubr.f32.mxu1 %v9225_v0 }
  0xc1   :  { %1095 = vmatprep.subr.mxu0 %v7639_v43  ;;  %6694 = vmatprep.subr.mxu1 %v9225_v0 }
  0xc6   :  { %623 = vmatmul.mubr.f32.vlgmr.msra.gmra.mrb[0].mxu0 %v7597_v15  ;;  %1088 = vmatmul.mubr.f32.vlgmr.msra.gmra.mrb[0].mxu1 %v7597_v15 }
  0xc7   :  { %1097 = vmatpush1.msra.mxu0 %v7644_v45  ;;  %1160 = vmatprep.mubr.f32.mxu0 %v9225_v0 }
  0xc8   :  { %6695 = vmatpush3.msra.mxu1 %v7648_v46  ;;  %6696 = vmatprep.mubr.msk.f32.mxu1 %vm7433_vm2, %v9225_v0 }
  0xc9   :  { %1177 = vmatprep.subr.mxu0 %v1176_v56  ;;  %6699 = vmatprep.subr.mxu1 %v9225_v0 }
  0xca   :  { %1166 = vmatmul.mubr.f32.vlgmr.msra.gmra.mrb[2].mxu0 %v7619_v33  ;;  %6697 = vmatmul.mubr.f32.vlgmr.msra.gmra.mrb[2].mxu1 %v7619_v33 }
  0xcb   :  { %1183 = vmatpush1.msra.mxu0 %v1182_v57  ;;  %1246 = vmatprep.mubr.f32.mxu0 %v9225_v0 }
  0xcc   :  { %6700 = vmatpush3.msra.mxu1 %v1640_v58  ;;  %6701 = vmatprep.mubr.msk.f32.mxu1 %vm7433_vm2, %v9225_v0 }
  0xcd   :  { %1256 = vmatprep.subr.mxu0 %v1173_v47  ;;  %6704 = vmatprep.subr.mxu1 %v9225_v0 }
  0xd2   :  { %1248 = vmatmul.mubr.f32.vlgmr.msra.gmra.mrb[2].mxu0 %v7597_v15  ;;  %6702 = vmatmul.mubr.f32.vlgmr.msra.gmra.mrb[2].mxu1 %v7597_v15 }
  0xd3   :  { %1259 = vmatpush1.msra.mxu0 %v1179_v48  ;;  %1322 = vmatprep.mubr.f32.mxu0 %v9225_v0 }
  0xd4   :  { %6705 = vmatpush3.msra.mxu1 %v1637_v49  ;;  %6706 = vmatprep.mubr.msk.f32.mxu1 %vm7433_vm2, %v9225_v0 }
  0xd5   :  { %1332 = vmatprep.subr.mxu0 %v7639_v43  ;;  %6709 = vmatprep.subr.mxu1 %v9225_v0 }
  0xda   :  { %1325 = vmatmul.mubr.f32.vlgmr.msra.gmra.mrb[2].mxu0 %v7606_v20  ;;  %6707 = vmatmul.mubr.f32.vlgmr.msra.gmra.mrb[2].mxu1 %v7606_v20 }
  0xdb   :  { %1334 = vmatpush1.msra.mxu0 %v7644_v45  ;;  %1397 = vmatprep.mubr.f32.mxu0 %v9225_v0 }
  0xdc   :  { %6710 = vmatpush3.msra.mxu1 %v7648_v46  ;;  %6711 = vmatprep.mubr.msk.f32.mxu1 %vm7433_vm2, %v9225_v0 }
  0xdd   :  { %1410 = vmatprep.subr.mxu0 %v1174_v50  ;;  %6714 = vmatprep.subr.mxu1 %v9225_v0 }
  0xe2   :  { %1401 = vmatmul.mubr.f32.vlgmr.msra.gmra.mrb[2].mxu0 %v7615_v25  ;;  %6712 = vmatmul.mubr.f32.vlgmr.msra.gmra.mrb[2].mxu1 %v7615_v25 }
  0xe3   :  { %1414 = vmatpush1.msra.mxu0 %v1180_v51  ;;  %1477 = vmatprep.mubr.f32.mxu0 %v9225_v0 }
  0xe4   :  { %6715 = vmatpush3.msra.mxu1 %v1638_v52  ;;  %6716 = vmatprep.mubr.msk.f32.mxu1 %vm7433_vm2, %v9225_v0 }
  0xe5   :  { %1486 = vmatprep.subr.mxu0 %v7639_v43  ;;  %6719 = vmatprep.subr.mxu1 %v9225_v0 }
  0xea   :  { %1479 = vmatmul.mubr.f32.vlgmr.msra.gmra.mrb[2].mxu0 %v7597_v15  ;;  %6717 = vmatmul.mubr.f32.vlgmr.msra.gmra.mrb[2].mxu1 %v7597_v15 }
  0xeb   :  { %1488 = vmatpush1.msra.mxu0 %v7644_v45  ;;  %1551 = vmatprep.mubr.f32.mxu0 %v9225_v0 }
  0xec   :  { %6720 = vmatpush3.msra.mxu1 %v7648_v46  ;;  %6721 = vmatprep.mubr.msk.f32.mxu1 %vm7433_vm2, %v9225_v0  ;;  %vm4290_vm2 = vcmask 171008  }
  0xf2   :  { %1553 = vmatmul.mubr.f32.vlgmr.msra.gmra.mrb[2].mxu0 %v7597_v15  ;;  %6722 = vmatmul.mubr.f32.vlgmr.msra.gmra.mrb[2].mxu1 %v7597_v15  ;;  %v2029_v15 = vrot.slane %v7716_v1, %v9233_v3 }
  0xf3   :  { %2571 = vmatprep.mubr.f32.mxu0 %v9225_v0  ;;  %3140 = vmatprep.mubr.f32.mxu1 %v9225_v0 }
 0x112   :  { %v7714_v63 = vpop.permute.xlu0 %135 }
 0x199   :  { %v624_v4 = vpop.f32.mrb[0].mxu0  ;;  %v1089_v5 = vpop.f32.mrb[0].mxu1 }
 0x19a   :  { %v7012_v6 = vadd.f32 %v624_v4, %v7714_v63  ;;  %v7014_v8 = vadd.f32 %v1089_v5, %v7714_v63  ;;  %v626_v10 = vpop.f32.mrb[1].mxu0  ;;  %v1091_v11 = vpop.f32.mrb[1].mxu1 }
 0x19b   :  { %v7013_v12 = vadd.f32 %v626_v10, %v7714_v63  ;;  %v7015_v14 = vadd.f32 %v1091_v11, %v7714_v63 }
 0x19c   :  { %v2005_v16 = vmax.f32 %v7012_v6, 0.0  ;;  %v2007_v17 = vmax.f32 %v7014_v8, 0.0 }
 0x19d   :  { %v2006_v18 = vmax.f32 %v7013_v12, 0.0  ;;  %v2008_v19 = vmax.f32 %v7015_v14, 0.0 }
 0x19e   :  { %v2049_v20 = vmul.f32 %v2017_v7, %v2005_v16  ;;  %v2051_v21 = vmul.f32 %v2025_v9, %v2007_v17 }
 0x19f   :  { %v2050_v22 = vmul.f32 %v2021_v13, %v2006_v18  ;;  %v2052_v23 = vmul.f32 %v2029_v15, %v2008_v19 }
 0x1a0   :  { %v7207_v28 = vcombine.low %v2051_v21, %v2051_v21  ;;  %v7208_v29 = vcombine.low %v2049_v20, %v2049_v20 }
 0x1a1   :  { %v7736_v24 = vcombine.low %v2049_v20, %v2050_v22  ;;  %v7738_v25 = vcombine.low %v2051_v21, %v2052_v23  ;;  %v7740_v26 = vcombine.low %v2050_v22, %v2050_v22  ;;  %v7743_v27 = vcombine.low %v2052_v23, %v2052_v23 }
 0x1a3   :  { %2085 = vst [vmem:[#allocation4] sm:$0xf] %v7736_v24  ;;  %2087 = vst [vmem:[#allocation4 + $0x10] sm:$0xf] %v7738_v25  ;;  %2107 = vrot.lane.b32.xlu1 %v7738_v25, %s7434_s7  ;;  %2103 = vrot.lane.b32.xlu0 %v7736_v24, %s7434_s7 }
 0x1a4   :  { %2086 = vst [vmem:[#allocation4 + $0x8] sm:$0xf] %v7740_v26  ;;  %2088 = vst [vmem:[#allocation4 + $0x18] sm:$0xf] %v7743_v27 }
 0x1a7   :  { %2185 = vrot.lane.b32.xlu1 %v7736_v24, %s7435_s25  ;;  %2145 = vrot.lane.b32.xlu0 %v7738_v25, %s7436_s2 }
 0x1ab   :  { %2189 = vrot.lane.b32.xlu1 %v7738_v25, %s7435_s25  ;;  %2141 = vrot.lane.b32.xlu0 %v7736_v24, %s7436_s2 }
 0x1af   :  { %2231 = vrot.lane.b32.xlu1 %v7738_v25, %s7437_s26  ;;  %2274 = vrot.lane.b32.xlu0 %v7736_v24, %s7438_s27 }
 0x1b3   :  { %2320 = vrot.lane.b32.xlu1 %v7738_v25, %s7439_s5  ;;  %2278 = vrot.lane.b32.xlu0 %v7738_v25, %s7438_s27 }
 0x1b7   :  { %2105 = vrot.lane.b32.xlu1 %v7207_v28, %s7434_s7  ;;  %2363 = vrot.lane.b32.xlu0 %v7736_v24, %s7440_s1 }
 0x1bb   :  { %2143 = vrot.lane.b32.xlu1 %v7740_v26, %s7436_s2  ;;  %2367 = vrot.lane.b32.xlu0 %v7738_v25, %s7440_s1 }
 0x1bf   :  { %2147 = vrot.lane.b32.xlu1 %v7743_v27, %s7436_s2  ;;  %2227 = vrot.lane.b32.xlu0 %v7736_v24, %s7437_s26 }
 0x1c3   :  { %2316 = vrot.lane.b32.xlu0 %v7736_v24, %s7439_s5  ;;  %2101 = vrot.lane.b32.xlu1 %v7208_v29, %s7434_s7 }
 0x1c5   :  { %v1554_v33 = vpop.f32.mrb[2].mxu0  ;;  %v2001_v34 = vpop.f32.mrb[2].mxu1 }
 0x1c6   :  { %v7016_v35 = vadd.f32 %v1554_v33, %v7714_v63  ;;  %v7018_v37 = vadd.f32 %v2001_v34, %v7714_v63  ;;  %v1556_v39 = vpop.f32.mrb[3].mxu0  ;;  %v6723_v40 = vpop.f32.mrb[3].mxu1 }
 0x1c7   :  { %v7017_v41 = vadd.f32 %v1556_v39, %v7714_v63  ;;  %2187 = vrot.lane.b32.xlu0 %v7207_v28, %s7435_s25  ;;  %2183 = vrot.lane.b32.xlu1 %v7208_v29, %s7435_s25 }
 0x1c8   :  { %v2009_v43 = vmax.f32 %v7016_v35, 0.0  ;;  %v2011_v44 = vmax.f32 %v7018_v37, 0.0 }
 0x1c9   :  { %v2010_v45 = vmax.f32 %v7017_v41, 0.0 }
 0x1ca   :  { %v2053_v46 = vmul.f32 %v2033_v36, %v2009_v43  ;;  %v2055_v47 = vmul.f32 %v2041_v38, %v2011_v44 }
 0x1cb   :  { %v2054_v48 = vmul.f32 %v2037_v42, %v2010_v45  ;;  %2229 = vrot.lane.b32.xlu0 %v7740_v26, %s7437_s26  ;;  %2276 = vrot.lane.b32.xlu1 %v7207_v28, %s7438_s27 }
 0x1cc   :  { %2072 = vst.msk [vmem:[#allocation2 + $0x18] sm:$0xf] %vm2071_vm3, %v2055_v47  ;;  %v7210_v51 = vcombine.low %v2053_v46, %v2053_v46  ;;  %vm4302_vm3 = vmor %vm4301_vm1, %vm4300_vm15  ;;  %vm4306_vm15 = vcmask 84992  }
 0x1cd   :  { %v2064_v49 = vcombine.low %v2053_v46, %v2054_v48  ;;  %v7209_v50 = vcombine.low %v2054_v48, %v2054_v48 }
 0x1cf   :  { %2089 = vst [vmem:[#allocation4 + $0x20] sm:$0xf] %v2064_v49  ;;  %2233 = vrot.lane.b32.xlu0 %v7743_v27, %s7437_s26  ;;  %2365 = vrot.lane.b32.xlu1 %v7207_v28, %s7440_s1  ;;  %2091 = vst.msk [vmem:[#allocation4 + $0x28] sm:$0xf] %vm2090_vm4, %v7209_v50 }
 0x1d3   :  { %2318 = vrot.lane.b32.xlu0 %v7740_v26, %s7439_s5  ;;  %2272 = vrot.lane.b32.xlu1 %v7208_v29, %s7438_s27  ;;  %v7197_v52 = vld [vmem:[#allocation2 + $0x18] ss:$0 sps:$4 sm:$0xff]  }
 0x1d4   :  { %v2219_v53 = vld [vmem:[#allocation2 + $0x18] sm:$0xf] }
 0x1d5   :  { %v7198_v54 = vld [vmem:[#allocation2 + $0x18] ss:$0 sps:$4 sm:$0xff]  }
 0x1d6   :  { %v2308_v55 = vld [vmem:[#allocation2 + $0x18] sm:$0xf] }
 0x1d7   :  { %2322 = vrot.lane.b32.xlu0 %v7743_v27, %s7439_s5  ;;  %2361 = vrot.lane.b32.xlu1 %v7208_v29, %s7440_s1  ;;  %v7199_v56 = vld [vmem:[#allocation2 + $0x18] ss:$0 sps:$4 sm:$0xff]  }
 0x1d8   :  { %v2397_v57 = vld [vmem:[#allocation2 + $0x18] sm:$0xf] }
 0x1db   :  { %2149 = vrot.lane.b32.xlu0 %v2064_v49, %s7436_s2  ;;  %2235 = vrot.lane.b32.xlu1 %v2064_v49, %s7437_s26 }
 0x1df   :  { %2109 = vrot.lane.b32.xlu0 %v7210_v51, %s7434_s7  ;;  %2324 = vrot.lane.b32.xlu1 %v2064_v49, %s7439_s5 }
 0x1e3   :  { %2191 = vrot.lane.b32.xlu0 %v7210_v51, %s7435_s25  ;;  %2280 = vrot.lane.b32.xlu1 %v7210_v51, %s7438_s27 }
 0x1e7   :  { %2407 = vrot.lane.b32.xlu0 %v7740_v26, %s7441_s28  ;;  %2369 = vrot.lane.b32.xlu1 %v7210_v51, %s7440_s1 }
 0x1eb   :  { %2411 = vrot.lane.b32.xlu0 %v7743_v27, %s7441_s28  ;;  %2409 = vrot.lane.b32.xlu1 %v7738_v25, %s7441_s28 }
 0x1ef   :  { %2405 = vrot.lane.b32.xlu0 %v7736_v24, %s7441_s28  ;;  %2413 = vrot.lane.b32.xlu1 %v2064_v49, %s7441_s28 }
 0x1f3   :  { %2195 = vrot.lane.b32.xlu0 %v7197_v52, %s7435_s25  ;;  %2193 = vrot.lane.b32.xlu1 %v2064_v49, %s7435_s25 }
 0x1f7   :  { %2239 = vrot.lane.b32.xlu0 %v2219_v53, %s7437_s26  ;;  %2111 = vrot.lane.b32.xlu1 %v2064_v49, %s7434_s7 }
 0x1fb   :  { %2284 = vrot.lane.b32.xlu0 %v7198_v54, %s7438_s27  ;;  %2282 = vrot.lane.b32.xlu1 %v2064_v49, %s7438_s27 }
 0x1ff   :  { %2328 = vrot.lane.b32.xlu0 %v2308_v55, %s7439_s5  ;;  %2237 = vrot.lane.b32.xlu1 %v7209_v50, %s7437_s26  ;;  %v2438_v55 = vld [vmem:[#allocation14] sm:$0xf] }
 0x203   :  { %2151 = vrot.lane.b32.xlu0 %v7209_v50, %s7436_s2  ;;  %2326 = vrot.lane.b32.xlu1 %v7209_v50, %s7439_s5 }
 0x207   :  { %2373 = vrot.lane.b32.xlu0 %v7199_v56, %s7440_s1  ;;  %2371 = vrot.lane.b32.xlu1 %v2064_v49, %s7440_s1 }
 0x20b   :  { %2417 = vrot.lane.b32.xlu0 %v2397_v57, %s7441_s28  ;;  %2415 = vrot.lane.b32.xlu1 %v7209_v50, %s7441_s28 }
 0x215   :  { %v7842_v58 = vpop.permute.xlu1 %2107  ;;  %v2104_v59 = vpop.permute.xlu0 %2103 }
 0x219   :  { %v2186_v63 = vpop.permute.xlu1 %2185  ;;  %v2146_v1 = vpop.permute.xlu0 %2145 }
 0x21d   :  { %v7844_v4 = vpop.permute.xlu1 %2189  ;;  %v2142_v5 = vpop.permute.xlu0 %2141 }
 0x221   :  { %v2232_v6 = vpop.permute.xlu1 %2231  ;;  %v7846_v7 = vpop.permute.xlu0 %2274 }
 0x225   :  { %v7848_v8 = vpop.permute.xlu1 %2320  ;;  %v7850_v9 = vpop.permute.xlu0 %2278 }
 0x229   :  { %v2106_v10 = vpop.permute.xlu1 %2105  ;;  %v7852_v11 = vpop.permute.xlu0 %2363 }
 0x22a   :  { %v2115_v12 = vsel %vm2113_vm5, %v2104_v59, %v2106_v10  ;;  %v2116_v13 = vsel %vm2113_vm5, %v2106_v10, %v7842_v58 }
 0x22b   :  { %2126 = vst [vmem:[#allocation4 + $0x8] sm:$0xf0] %v2115_v12  ;;  %2127 = vst [vmem:[#allocation4 + $0x10] sm:$0xf0] %v2116_v13 }
 0x22d   :  { %v2144_v14 = vpop.permute.xlu1 %2143  ;;  %v7857_v15 = vpop.permute.xlu0 %2367 }
 0x22e   :  { %v2154_v16 = vsel %vm2153_vm6, %v2142_v5, %v2144_v14  ;;  %v2155_v17 = vsel %vm2153_vm6, %v2144_v14, %v2146_v1 }
 0x22f   :  { %2165 = vst [vmem:[#allocation4 + $0x30] sm:$0xf] %v2154_v16  ;;  %2166 = vst [vmem:[#allocation4 + $0x38] sm:$0xf] %v2155_v17 }
 0x231   :  { %v7861_v18 = vpop.permute.xlu1 %2147  ;;  %v2228_v19 = vpop.permute.xlu0 %2227 }
 0x232   :  { %v2156_v20 = vsel %vm2153_vm6, %v2146_v1, %v7861_v18  ;;  %v2440_v38 = vld [vmem:[#allocation4 + $0x8] sm:$0xff]  ;;  %v7897_v12 = vld [vmem:[#allocation4 + $0x10] sm:$0xff] }
 0x233   :  { %2167 = vst [vmem:[#allocation4 + $0x40] sm:$0xf] %v2156_v20  ;;  %v2497_v47 = vand.u32 4294901760, %v2440_v38 }
 0x235   :  { %v2317_v21 = vpop.permute.xlu0 %2316  ;;  %v2102_v22 = vpop.permute.xlu1 %2101 }
 0x236   :  { %v2114_v23 = vsel %vm2113_vm5, %v2102_v22, %v2104_v59 }
 0x237   :  { %2125 = vst [vmem:[#allocation4] sm:$0xf0] %v2114_v23 }
 0x239   :  { %v2188_v24 = vpop.permute.xlu0 %2187  ;;  %v2184_v25 = vpop.permute.xlu1 %2183 }
 0x23a   :  { %v2199_v26 = vsel %vm2197_vm7, %v2186_v63, %v2188_v24  ;;  %v2200_v27 = vsel %vm2197_vm7, %v2188_v24, %v7844_v4  ;;  %v2198_v28 = vsel %vm2197_vm7, %v2184_v25, %v2186_v63  ;;  %v2477_v63 = vsel %vm2475_vm12, %v2438_v55, 0 }
 0x23b   :  { %2211 = vst [vmem:[#allocation4 + $0x38] sm:$0xf0] %v2199_v26  ;;  %2212 = vst [vmem:[#allocation4 + $0x40] sm:$0xf0] %v2200_v27  ;;  %v7901_v13 = vand.u32 4294901760, %v2477_v63  ;;  %v7919_v26 = vsub.f32 %v2440_v38, %v2497_v47 }
 0x23c   :  { %2210 = vst [vmem:[#allocation4 + $0x30] sm:$0xf0] %v2198_v28 }
 0x23d   :  { %v2230_v29 = vpop.permute.xlu0 %2229  ;;  %v2277_v33 = vpop.permute.xlu1 %2276  ;;  %v7917_v25 = vsub.f32 %v2477_v63, %v7901_v13 }
 0x23e   :  { %v2242_v34 = vsel %vm2241_vm8, %v2228_v19, %v2230_v29  ;;  %v2243_v35 = vsel %vm2241_vm8, %v2230_v29, %v2232_v6  ;;  %v2288_v36 = vsel %vm2286_vm9, %v7846_v7, %v2277_v33  ;;  %v2289_v37 = vsel %vm2286_vm9, %v2277_v33, %v7850_v9  ;;  %v2439_v39 = vld [vmem:[#allocation4] sm:$0xff] }
 0x23f   :  { %2254 = vst [vmem:[#allocation4 + $0x60] sm:$0xf] %v2242_v34  ;;  %2255 = vst [vmem:[#allocation4 + $0x68] sm:$0xf] %v2243_v35  ;;  %v2499_v49 = vand.u32 4294901760, %v2439_v39  ;;  %v3068_v19 = vand.u32 4294901760, %v7897_v12 }
 0x240   :  { %2300 = vst [vmem:[#allocation4 + $0x68] sm:$0xf0] %v2288_v36  ;;  %2301 = vst [vmem:[#allocation4 + $0x70] sm:$0xf0] %v2289_v37 }
 0x241   :  { %v2234_v40 = vpop.permute.xlu0 %2233  ;;  %v2366_v41 = vpop.permute.xlu1 %2365  ;;  %v7936_v35 = vsub.f32 %v7897_v12, %v3068_v19 }
 0x242   :  { %v2244_v42 = vsel %vm2241_vm8, %v2232_v6, %v2234_v40  ;;  %v2377_v43 = vsel %vm2375_vm10, %v7852_v11, %v2366_v41  ;;  %v2378_v44 = vsel %vm2375_vm10, %v2366_v41, %v7857_v15  ;;  %v2446_v45 = vld [vmem:[#allocation4 + $0x38] sm:$0xff] }
 0x243   :  { %v2445_v46 = vld [vmem:[#allocation4 + $0x30] sm:$0xff]  ;;  %2256 = vst [vmem:[#allocation4 + $0x70] sm:$0xf] %v2244_v42  ;;  %2389 = vst [vmem:[#allocation4 + $0x98] sm:$0xf0] %v2377_v43  ;;  %v2501_v48 = vand.u32 4294901760, %v2446_v45 }
 0x244   :  { %2390 = vst [vmem:[#allocation4 + $0xa0] sm:$0xf0] %v2378_v44  ;;  %v2503_v50 = vand.u32 4294901760, %v2445_v46  ;;  %v7955_v43 = vand.u32 4294901760, %v7917_v25 }
 0x245   :  { %v2319_v51 = vpop.permute.xlu0 %2318  ;;  %v2273_v52 = vpop.permute.xlu1 %2272  ;;  %v7881_v53 = vpack.c.bf16 %v2501_v48, %v2497_v47  ;;  %v7914_v22 = vsub.f32 %v2446_v45, %v2501_v48 }
 0x246   :  { %v7883_v54 = vpack.c.bf16 %v2503_v50, %v2499_v49  ;;  %v2331_v56 = vsel %vm2330_vm11, %v2317_v21, %v2319_v51  ;;  %v2332_v57 = vsel %vm2330_vm11, %v2319_v51, %v7848_v8  ;;  %v2287_v59 = vsel %vm2286_vm9, %v2273_v52, %v7846_v7  ;;  %v7899_v7 = vld [vmem:[#allocation4 + $0x40] sm:$0xff]  ;;  %9264 = vst [vmem:[#allocation27_spill] sm:$0xff] %v7955_v43 }
 0x247   :  { %2343 = vst [vmem:[#allocation4 + $0x90] sm:$0xf] %v2331_v56  ;;  %2344 = vst [vmem:[#allocation4 + $0x98] sm:$0xf] %v2332_v57  ;;  %6725 = vmatprep.subr.bf16.mxu0 %v7881_v53  ;;  %v2452_v14 = vld [vmem:[#allocation4 + $0x68] sm:$0xff]  ;;  %v7921_v27 = vsub.f32 %v2445_v46, %v2503_v50  ;;  %v9221_v42 = vand.u32 4294901760, %v7914_v22 }
 0x248   :  { %2299 = vst [vmem:[#allocation4 + $0x60] sm:$0xf0] %v2287_v59  ;;  %6727 = vmatpush1.bf16.msra.mxu0 %v7883_v54  ;;  %v2505_v23 = vand.u32 4294901760, %v2452_v14  ;;  %v9219_v50 = vand.u32 4294901760, %v7936_v35  ;;  %v2575_v59 = vsub.f32 %v7917_v25, %v7955_v43 }
 0x249   :  { %v2323_v1 = vpop.permute.xlu0 %2322  ;;  %v2362_v5 = vpop.permute.xlu1 %2361  ;;  %v9217_v44 = vand.u32 4294901760, %v7921_v27  ;;  %v2598_v57 = vsub.f32 %v7914_v22, %v9221_v42 }
 0x24a   :  { %v2333_v6 = vsel %vm2330_vm11, %v7848_v8, %v2323_v1  ;;  %v2376_v10 = vsel %vm2375_vm10, %v2362_v5, %v7852_v11  ;;  %v3072_v8 = vand.u32 4294901760, %v7899_v7  ;;  %v7967_v48 = vld [vmem:[#allocation4 + $0x70] sm:$0xff]  ;;  %v7972_v52 = vsub.f32 %v2452_v14, %v2505_v23 }
 0x24b   :  { %2345 = vst [vmem:[#allocation4 + $0xa0] sm:$0xf] %v2333_v6  ;;  %2388 = vst [vmem:[#allocation4 + $0x90] sm:$0xf0] %v2376_v10  ;;  %v3076_v63 = vand.u32 4294901760, %v7967_v48  ;;  %v3161_v10 = vsub.f32 %v7936_v35, %v9219_v50 }
 0x24c   :  { %v7941_v36 = vsub.f32 %v7899_v7, %v3072_v8 }
 0x24d   :  { %v7903_v16 = vpop.permute.xlu0 %2149  ;;  %v7905_v17 = vpop.permute.xlu1 %2235 }
 0x24e   :  { %v2157_v11 = vsel %vm2153_vm6, %v7861_v18, %v7903_v16  ;;  %v2245_v20 = vsel %vm2241_vm8, %v2234_v40, %v7905_v17  ;;  %v2458_v21 = vld [vmem:[#allocation4 + $0x98] sm:$0xff]  ;;  %v7925_v18 = vsub.f32 %v2439_v39, %v2499_v49  ;;  %v9218_v51 = vand.u32 4294901760, %v7941_v36 }
 0x24f   :  { %2168 = vst [vmem:[#allocation4 + $0x48] sm:$0xf] %v2157_v11  ;;  %2257 = vst [vmem:[#allocation4 + $0x78] sm:$0xf] %v2245_v20  ;;  %v2509_v24 = vand.u32 4294901760, %v2458_v21  ;;  %v7923_v28 = vld [vmem:[#allocation4 + $0x60] sm:$0xff] }
 0x250   :  { %v2507_v40 = vand.u32 4294901760, %v7923_v28  ;;  %v9220_v49 = vand.u32 4294901760, %v7925_v18  ;;  %v3173_v14 = vsub.f32 %v7941_v36, %v9218_v51  ;;  %v8015_v51 = vsub.f32 %v7967_v48, %v3076_v63 }
 0x251   :  { %v7927_v29 = vpop.permute.xlu0 %2109  ;;  %v7929_v33 = vpop.permute.xlu1 %2324  ;;  %v7931_v34 = vpack.c.bf16 %v2509_v24, %v2505_v23  ;;  %v9229_v23 = vand.u32 4294901760, %v7972_v52 }
 0x252   :  { %v2117_v37 = vsel %vm2113_vm5, %v7842_v58, %v7927_v29  ;;  %v2334_v38 = vsel %vm2330_vm11, %v2323_v1, %v7929_v33  ;;  %v7948_v39 = vld [vmem:[#allocation4 + $0x90] sm:$0xff]  ;;  %v9222_v58 = vand.u32 4294901760, %v7919_v26  ;;  %v2592_v6 = vsub.f32 %v7925_v18, %v9220_v49 }
 0x253   :  { %2128 = vst [vmem:[#allocation4 + $0x18] sm:$0xf0] %v2117_v37  ;;  %2346 = vst [vmem:[#allocation4 + $0xa8] sm:$0xf] %v2334_v38  ;;  %6729 = vmatprep.subr.bf16.mxu0 %v7931_v34  ;;  %v2511_v41 = vand.u32 4294901760, %v7948_v39  ;;  %v2459_v38 = vld [vmem:[#allocation4 + $0xa0] sm:$0xff] }
 0x254   :  { %v3080_v0 = vand.u32 4294901760, %v2459_v38 }
 0x255   :  { %v7959_v45 = vpop.permute.xlu0 %2191  ;;  %v7961_v46 = vpop.permute.xlu1 %2280  ;;  %v7965_v47 = vpack.c.bf16 %v2511_v41, %v2507_v40 }
 0x256   :  { %v2201_v55 = vsel %vm2197_vm7, %v7844_v4, %v7959_v45  ;;  %v2290_v56 = vsel %vm2286_vm9, %v7850_v9, %v7961_v46  ;;  %v2586_v4 = vsub.f32 %v7919_v26, %v9222_v58  ;;  %v2604_v9 = vsub.f32 %v7921_v27, %v9217_v44 }
 0x257   :  { %9265 = vst [vmem:[#allocation28_spill] sm:$0xff] %v7965_v47  ;;  %2213 = vst [vmem:[#allocation4 + $0x48] sm:$0xf0] %v2201_v55  ;;  %6731 = vmatpush1.bf16.msra.mxu0 %v7965_v47  ;;  %v2599_v55 = vand.u32 4294901760, %v2598_v57  ;;  %v8010_v44 = vsub.f32 %v2458_v21, %v2509_v24  ;;  %v2593_v57 = vand.u32 4294901760, %v2592_v6  ;;  %v3174_v21 = vand.u32 4294901760, %v3173_v14 }
 0x258   :  { %2302 = vst [vmem:[#allocation4 + $0x78] sm:$0xf0] %v2290_v56  ;;  %v8008_v56 = vand.u32 4294901760, %v2575_v59  ;;  %v2587_v50 = vand.u32 4294901760, %v2586_v4  ;;  %v3162_v59 = vand.u32 4294901760, %v3161_v10  ;;  %v8028_v4 = vsub.f32 %v7972_v52, %v9229_v23 }
 0x259   :  { %v2408_v1 = vpop.permute.xlu0 %2407  ;;  %v7993_v5 = vpop.permute.xlu1 %2369  ;;  %v9227_v6 = vand.u32 4294901760, %v8010_v44  ;;  %v9228_v10 = vand.u32 4294901760, %v8015_v51  ;;  %v8044_v14 = vsub.f32 %v7948_v39, %v2511_v41 }
 0x25a   :  { %v2379_v11 = vsel %vm2375_vm10, %v7857_v15, %v7993_v5  ;;  %v2442_v20 = vld [vmem:[#allocation4 + $0x18] sm:$0xff]  ;;  %v2605_v15 = vand.u32 4294901760, %v2604_v9  ;;  %v8035_v9 = vsub.f32 %v7923_v28, %v2507_v40  ;;  %v8052_v28 = vpack.c.bf16 %v3174_v21, %v3162_v59 }
 0x25b   :  { %2391 = vst [vmem:[#allocation4 + $0xa8] sm:$0xf0] %v2379_v11  ;;  %v3066_v37 = vand.u32 4294901760, %v2442_v20  ;;  %v8021_v11 = vpack.c.bf16 %v3072_v8, %v3068_v19  ;;  %v8032_v8 = vpack.c.bf16 %v2599_v55, %v2587_v50 }
 0x25d   :  { %v2412_v49 = vpop.permute.xlu0 %2411  ;;  %v2410_v42 = vpop.permute.xlu1 %2409  ;;  %v8030_v7 = vsub.f32 %v2442_v20, %v3066_v37 }
 0x25e   :  { %v2421_v24 = vsel %vm2419_vm13, %v2408_v1, %v2410_v42  ;;  %v2422_v58 = vsel %vm2419_vm13, %v2410_v42, %v2412_v49  ;;  %v2448_v31 = vld [vmem:[#allocation4 + $0x48] sm:$0xff]  ;;  %v8037_v42 = vpack.c.bf16 %v2605_v15, %v2593_v57  ;;  %v8057_v57 = vsub.f32 %v2459_v38, %v3080_v0 }
 0x25f   :  { %v2454_v32 = vld [vmem:[#allocation4 + $0x78] sm:$0xff]  ;;  %2433 = vst [vmem:[#allocation4 + $0xc8] sm:$0xf] %v2421_v24  ;;  %2434 = vst [vmem:[#allocation4 + $0xd0] sm:$0xf] %v2422_v58  ;;  %v3070_v12 = vand.u32 4294901760, %v2448_v31  ;;  %v2622_v38 = vsub.f32 %v8010_v44, %v9227_v6 }
 0x260   :  { %v3074_v19 = vand.u32 4294901760, %v2454_v32  ;;  %v9240_v30 = vand.u32 4294901760, %v8057_v57 }
 0x261   :  { %v2406_v58 = vpop.permute.xlu0 %2405  ;;  %v8046_v20 = vpop.permute.xlu1 %2413  ;;  %v8048_v24 = vpack.c.bf16 %v3070_v12, %v3066_v37  ;;  %v8050_v50 = vsub.f32 %v2448_v31, %v3070_v12  ;;  %v9232_v31 = vand.u32 4294901760, %v8030_v7  ;;  %v8079_v12 = vld [vmem:[#allocation9] sm:$0x7f] }
 0x262   :  { %v2420_v40 = vsel %vm2419_vm13, %v2406_v58, %v2408_v1  ;;  %v2423_v55 = vsel %vm2419_vm13, %v2412_v49, %v8046_v20  ;;  %v2460_v15 = vld [vmem:[#allocation4 + $0xa8] sm:$0xff]  ;;  %v8061_v37 = vsub.f32 %v2454_v32, %v3074_v19  ;;  %v2469_v1 = vld [vmem:[#allocation15] sm:$0xf]  ;;  %v8068_v49 = vpack.c.bf16 %v3080_v0, %v3076_v63 }
 0x263   :  { %2432 = vst [vmem:[#allocation4 + $0xc0] sm:$0xf] %v2420_v40  ;;  %2435 = vst [vmem:[#allocation4 + $0xd8] sm:$0xf] %v2423_v55  ;;  %6773 = vmatprep.subr.bf16.mxu1 %v8048_v24  ;;  %v3078_v41 = vand.u32 4294901760, %v2460_v15  ;;  %v9231_v59 = vand.u32 4294901760, %v8050_v50  ;;  %v8077_v32 = vsub.f32 %v8015_v51, %v9228_v10  ;;  %2472 = vperm.xlu1 %7193, %v2469_v1  }
 0x264   :  { %6775 = vmatpush1.bf16.msra.mxu1 %v8021_v11  ;;  %9266 = vst [vmem:[#allocation29_spill] sm:$0xff] %v8068_v49  ;;  %v9234_v63 = vand.u32 4294901760, %v8044_v14  ;;  %v4219_v3 = vrot.slane %v8079_v12, %v2020_v2  ;;  %v3197_v2 = vsub.f32 %v8057_v57, %v9240_v30 }
 0x265   :  { %v2196_v58 = vpop.permute.xlu0 %2195  ;;  %v2194_v40 = vpop.permute.xlu1 %2193  ;;  %v8081_v55 = vpack.c.bf16 %v3078_v41, %v3074_v19  ;;  %v8083_v0 = vsub.f32 %v2460_v15, %v3078_v41  ;;  %v3167_v48 = vsub.f32 %v8050_v50, %v9231_v59  ;;  %v4215_v19 = vrot.slane %v8079_v12, %v2016_v61 }
 0x266   :  { %v2202_v6 = vsel %vm2197_vm7, %v7959_v45, %v2194_v40  ;;  %v2203_v10 = vsel %vm2197_vm7, %v2194_v40, %v2196_v58  ;;  %v2464_v1 = vld [vmem:[#allocation4 + $0xc8] sm:$0xf]  ;;  %v2465_v23 = vld [vmem:[#allocation4 + $0xd0] sm:$0xf]  ;;  %v3155_v45 = vsub.f32 %v8030_v7, %v9232_v31  ;;  %v9243_v58 = vand.u32 4294901760, %v8061_v37 }
 0x267   :  { %9267 = vst [vmem:[#allocation30_spill] sm:$0xff] %v8081_v55  ;;  %2214 = vst [vmem:[#allocation4 + $0x50] sm:$0xf0] %v2202_v6  ;;  %6777 = vmatprep.subr.bf16.mxu1 %v8081_v55  ;;  %v2483_v15 = vsel %vm149_vm0, %v2464_v1, 0  ;;  %v2486_v41 = vsel %vm149_vm0, %v2465_v23, 0  ;;  %v2623_v6 = vand.u32 4294901760, %v2622_v38  ;;  %4240 = vrot.lane.b32.xlu0 %v4215_v19, %s7437_s26  ;;  %v8114_v31 = vsub.f32 %v8044_v14, %v9234_v63 }
 0x268   :  { %2215 = vst.msk [vmem:[#allocation4 + $0x58] sm:$0xf0] %vm2130_vm14, %v2203_v10  ;;  %6779 = vmatpush1.bf16.msra.mxu1 %v8068_v49  ;;  %v8105_v40 = vand.u32 4294901760, %v2483_v15  ;;  %v8107_v61 = vand.u32 4294901760, %v2486_v41  ;;  %v9237_v10 = vand.u32 4294901760, %v8083_v0  ;;  %v3168_v23 = vand.u32 4294901760, %v3167_v48  ;;  %4242 = vrot.lane.b32.xlu1 %v4219_v3, %s7437_s26 }
 0x269   :  { %v2240_v1 = vpop.permute.xlu0 %2239  ;;  %v2112_v59 = vpop.permute.xlu1 %2111  ;;  %v4223_v38 = vrot.slane %v8079_v12, %v2024_v62  ;;  %v3179_v43 = vsub.f32 %v8061_v37, %v9243_v58  ;;  %v9270_v3 = vand.u32 4294901760, %v8035_v9 }
 0x26a   :  { %9268 = vst [vmem:[#allocation31_spill] sm:$0xff] %v8105_v40  ;;  %v2118_v21 = vsel %vm2113_vm5, %v7927_v29, %v2112_v59  ;;  %2131 = vst.msk [vmem:[#allocation4 + $0x28] sm:$0xf0] %vm2130_vm14, %v2112_v59  ;;  %2514 = vmatprep.subr.mxu0 %v8105_v40  ;;  %v2463_v48 = vld [vmem:[#allocation4 + $0xc0] sm:$0xf]  ;;  %v3191_v63 = vsub.f32 %v8083_v0, %v9237_v10  ;;  %v8133_v39 = vsub.f32 %v2483_v15, %v8105_v40 }
 0x26b   :  { %v2466_v19 = vld [vmem:[#allocation4 + $0xd8] sm:$0xf]  ;;  %2129 = vst [vmem:[#allocation4 + $0x20] sm:$0xf0] %v2118_v21  ;;  %v2480_v62 = vsel %vm149_vm0, %v2463_v48, 0  ;;  %v3156_v59 = vand.u32 4294901760, %v3155_v45  ;;  %v8146_v30 = vsub.f32 %v2486_v41, %v8107_v61  ;;  %4244 = vrot.lane.b32.xlu0 %v4223_v38, %s7437_s26  ;;  %v2616_v47 = vsub.f32 %v8035_v9, %v9270_v3 }
 0x26c   :  { %v2489_v29 = vsel %vm149_vm0, %v2466_v19, 0  ;;  %v8141_v10 = vand.u32 4294901760, %v2480_v62  ;;  %v2633_v21 = vand.u32 4294901760, %v8133_v39  ;;  %v9269_v19 = vand.u32 4294901760, %v8028_v4 }
 0x26d   :  { %v8143_v49 = vand.u32 4294901760, %v2489_v29  ;;  %v2285_v15 = vpop.permute.xlu0 %2284  ;;  %v2283_v48 = vpop.permute.xlu1 %2282  ;;  %v6780_v45 = vpack.c.bf16 %v3168_v23, %v3156_v59  ;;  %v3192_v58 = vand.u32 4294901760, %v3191_v63  ;;  %v3180_v4 = vand.u32 4294901760, %v3179_v43 }
 0x26e   :  { %v6736_v40 = vpack.c.bf16 %v2623_v6, %v9269_v19  ;;  %v2291_v55 = vsel %vm2286_vm9, %v7961_v46, %v2283_v48  ;;  %v2292_v41 = vsel %vm2286_vm9, %v2283_v48, %v2285_v15  ;;  %2516 = vmatpush1.msra.mxu0 %v8141_v10  ;;  %v8160_v38 = vsub.f32 %v2480_v62, %v8141_v10 }
 0x26f   :  { %3083 = vmatprep.subr.mxu1 %v8143_v49  ;;  %2303 = vst [vmem:[#allocation4 + $0x80] sm:$0xf0] %v2291_v55  ;;  %2304 = vst.msk [vmem:[#allocation4 + $0x88] sm:$0xf0] %vm2130_vm14, %v2292_v41  ;;  %6733 = vmatprep.subr.bf16.mxu0 %v8032_v8  ;;  %v2629_v63 = vand.u32 4294901760, %v8114_v31  ;;  %v3198_v46 = vand.u32 4294901760, %v3197_v2  ;;  %v8168_v6 = vsub.f32 %v2489_v29, %v8143_v49 }
 0x270   :  { %3085 = vmatpush1.msra.mxu1 %v8107_v61  ;;  %2577 = vmatmul.mubr.f32.vlgmr.msra.gmra.mrb[4].mxu0 %v8008_v56  ;;  %v2634_v55 = vsub.f32 %v8133_v39, %v2633_v21  ;;  %v2639_v23 = vand.u32 4294901760, %v8160_v38  ;;  %v3208_v8 = vand.u32 4294901760, %v8146_v30  ;;  %v9271_v62 = vsub.s32 3, %v7710_v60 }
 0x271   :  { %6781 = vmatprep.subr.bf16.mxu1 %v6780_v45  ;;  %6735 = vmatpush1.bf16.msra.mxu0 %v8037_v42  ;;  %v2329_v31 = vpop.permute.xlu0 %2328  ;;  %v2238_v2 = vpop.permute.xlu1 %2237  ;;  %v6784_v29 = vpack.c.bf16 %v3192_v58, %v3180_v4  ;;  %v2617_v59 = vand.u32 4294901760, %v2616_v47  ;;  %v3202_v15 = vand.u32 4294901760, %v8168_v6  ;;  %v9272_v48 = vsub.s32 4, %v7710_v60 }
 0x272   :  { %v4227_v43 = vrot.slane %v8079_v12, %v9271_v62  ;;  %3146 = vmatmul.mubr.f32.vlgmr.msra.gmra.mrb[4].mxu1 %v8008_v56  ;;  %v2246_v19 = vsel %vm2241_vm8, %v7905_v17, %v2238_v2  ;;  %v2247_v3 = vsel %vm2241_vm8, %v2238_v2, %v2240_v1  ;;  %6737 = vmatprep.subr.bf16.mxu0 %v6736_v40  ;;  %v3186_v42 = vand.u32 4294901760, %v8077_v32 }
 0x273   :  { %v4231_v45 = vrot.slane %v8079_v12, %v9272_v48  ;;  %6783 = vmatpush1.bf16.msra.mxu1 %v8052_v28  ;;  %2258 = vst [vmem:[#allocation4 + $0x80] sm:$0xf] %v2246_v19  ;;  %2259 = vst.msk [vmem:[#allocation4 + $0x88] sm:$0xf] %vm2090_vm4, %v2247_v3  ;;  %v6738_v47 = vpack.c.bf16 %v2629_v63, %v2617_v59  ;;  %v3203_v58 = vsub.f32 %v8168_v6, %v3202_v15  ;;  %v9273_v41 = vmov 0.0  }
 0x274   :  { %6785 = vmatprep.subr.bf16.mxu1 %v6784_v29  ;;  %v2640_v28 = vsub.f32 %v8160_v38, %v2639_v23  ;;  %2697 = vmatprep.mubr.f32.mxu0 %v9273_v41  ;;  %v6786_v17 = vpack.c.bf16 %v3198_v46, %v3186_v42  ;;  %v2635_v1 = vand.u32 4294901760, %v2634_v55  ;;  %v3209_v32 = vsub.f32 %v8146_v30, %v3208_v8 }
 0x275   :  { %3266 = vmatprep.mubr.f32.mxu1 %v9273_v41  ;;  %4246 = vrot.lane.b32.xlu1 %v4227_v43, %s7437_s26  ;;  %v9274_v40 = vsub.s32 5, %v7710_v60  ;;  %v2152_v63 = vpop.permute.xlu0 %2151  ;;  %v2327_v62 = vpop.permute.xlu1 %2326  ;;  %v3204_v2 = vand.u32 4294901760, %v3203_v58  ;;  %v9275_v46 = vsub.s32 6, %v7710_v60  ;;  %v6742_v3 = vpack.c.bf16 %v7921_v27, %v7925_v18 }
 0x276   :  { %6739 = vmatpush1.bf16.msra.mxu0 %v6738_v47  ;;  %4248 = vrot.lane.b32.xlu0 %v4231_v45, %s7437_s26  ;;  %v2158_v29 = vsel %vm2153_vm6, %v7903_v16, %v2152_v63  ;;  %2170 = vst.msk [vmem:[#allocation4 + $0x58] sm:$0xf] %vm2090_vm4, %v2152_v63  ;;  %v2335_v43 = vsel %vm2330_vm11, %v7929_v33, %v2327_v62  ;;  %v2641_v60 = vand.u32 4294901760, %v2640_v28  ;;  %v3210_v48 = vand.u32 4294901760, %v3209_v32  ;;  %v9278_v63 = vld [vmem:[#allocation31_spill] sm:$0xff] }
 0x277   :  { %v4235_v4 = vrot.slane %v8079_v12, %v9274_v40  ;;  %v4239_v55 = vrot.slane %v8079_v12, %v9275_v46  ;;  %6787 = vmatpush1.bf16.msra.mxu1 %v6786_v17  ;;  %v2336_v59 = vsel %vm2330_vm11, %v2327_v62, %v2329_v31  ;;  %2636 = vmatprep.subr.mxu0 %v2635_v1  ;;  %v9279_v62 = vld [vmem:[#allocation29_spill] sm:$0xff]  ;;  %v9281_v46 = vand.u32 4294901760, %v7914_v22 }
 0x278   :  { %2169 = vst [vmem:[#allocation4 + $0x50] sm:$0xf] %v2158_v29  ;;  %2347 = vst [vmem:[#allocation4 + $0xb0] sm:$0xf] %v2335_v43  ;;  %3205 = vmatprep.subr.mxu1 %v3204_v2  ;;  %v6740_v12 = vpack.c.bf16 %v7914_v22, %v7919_v26  ;;  %v6788_v33 = vpack.c.bf16 %v8050_v50, %v8030_v7  ;;  %v6744_v42 = vpack.c.bf16 %v8010_v44, %v7972_v52 }
 0x279   :  { %2348 = vst.msk [vmem:[#allocation4 + $0xb8] sm:$0xf] %vm2090_vm4, %v2336_v59  ;;  %4250 = vrot.lane.b32.xlu1 %v4235_v4, %s7437_s26  ;;  %v2374_v16 = vpop.permute.xlu0 %2373  ;;  %v2372_v45 = vpop.permute.xlu1 %2371  ;;  %v6790_v47 = vpack.c.bf16 %v7941_v36, %v7936_v35  ;;  %v6746_v32 = vpack.c.bf16 %v8044_v14, %v8035_v9  ;;  %v6794_v40 = vpack.c.bf16 %v8057_v57, %v8015_v51  ;;  %v9277_v4 = vld [vmem:[#allocation28_spill] sm:$0xff]  ;;  %v9280_v2 = vand.u32 4294901760, %v7919_v26 }
 0x27a   :  { %2642 = vmatpush1.msra.mxu0 %v2641_v60  ;;  %4252 = vrot.lane.b32.xlu0 %v4239_v55, %s7437_s26  ;;  %v2380_v31 = vsel %vm2375_vm10, %v7993_v5, %v2372_v45  ;;  %v2381_v19 = vsel %vm2375_vm10, %v2372_v45, %v2374_v16  ;;  %v6792_v5 = vpack.c.bf16 %v8083_v0, %v8061_v37  ;;  %v9282_v29 = vand.u32 4294901760, %v8030_v7  ;;  %v9286_v16 = vld [vmem:[#allocation27_spill] sm:$0xff] }
 0x27b   :  { %3211 = vmatpush1.msra.mxu1 %v3210_v48  ;;  %6741 = vmatprep.subr.bf16.mxu0 %v6740_v12  ;;  %2392 = vst [vmem:[#allocation4 + $0xb0] sm:$0xf0] %v2380_v31  ;;  %2393 = vst.msk [vmem:[#allocation4 + $0xb8] sm:$0xf0] %vm2130_vm14, %v2381_v19  ;;  %v6756_v55 = vpack.c.bf16 %v9281_v46, %v9280_v2  ;;  %v9283_v43 = vand.u32 4294901760, %v8050_v50  ;;  %v9284_v60 = vand.u32 4294901760, %v7925_v18 }
 0x27c   :  { %2699 = vmatmul.mubr.f32.vlgmr.msra.gmra.mrb[4].mxu0 %v7901_v13  ;;  %6789 = vmatprep.subr.bf16.mxu1 %v6788_v33  ;;  %v9285_v48 = vand.u32 4294901760, %v7921_v27  ;;  %v9287_v22 = vand.u32 4294901760, %v7972_v52  ;;  %v9288_v26 = vand.u32 4294901760, %v8010_v44  ;;  %v9289_v7 = vand.u32 4294901760, %v7936_v35 }
 0x27d   :  { %6743 = vmatpush1.bf16.msra.mxu0 %v6742_v3  ;;  %3268 = vmatmul.mubr.f32.vlgmr.msra.gmra.mrb[4].mxu1 %v7901_v13  ;;  %v2418_v58 = vpop.permute.xlu0 %2417  ;;  %v2416_v28 = vpop.permute.xlu1 %2415  ;;  %v6804_v59 = vpack.c.bf16 %v9283_v43, %v9282_v29  ;;  %v9290_v50 = vand.u32 4294901760, %v7941_v36  ;;  %v9291_v18 = vand.u32 4294901760, %v8061_v37  ;;  %v9292_v27 = vand.u32 4294901760, %v8083_v0  ;;  %v2443_v0 = vld [vmem:[#allocation4 + $0x20] sm:$0xff] }
 0x27e   :  { %6745 = vmatprep.subr.bf16.mxu0 %v6744_v42  ;;  %6791 = vmatpush1.bf16.msra.mxu1 %v6790_v47  ;;  %v2424_v17 = vsel %vm2419_vm13, %v8046_v20, %v2416_v28  ;;  %v2425_v1 = vsel %vm2419_vm13, %v2416_v28, %v2418_v58  ;;  %v9276_v20 = vld [vmem:[#allocation30_spill] sm:$0xff]  ;;  %v6758_v12 = vpack.c.bf16 %v9285_v48, %v9284_v60  ;;  %v9293_v52 = vand.u32 4294901760, %v8035_v9 }
 0x27f   :  { %6793 = vmatprep.subr.bf16.mxu1 %v6792_v5  ;;  %2789 = vmatprep.mubr.f32.mxu0 %v9273_v41  ;;  %2436 = vst [vmem:[#allocation4 + $0xe0] sm:$0xf] %v2424_v17  ;;  %2437 = vst.msk [vmem:[#allocation4 + $0xe8] sm:$0xf] %vm2090_vm4, %v2425_v1  ;;  %v6760_v45 = vpack.c.bf16 %v9288_v26, %v9287_v22  ;;  %v6806_v33 = vpack.c.bf16 %v9290_v50, %v9289_v7  ;;  %v9294_v44 = vand.u32 4294901760, %v8044_v14  ;;  %v2450_v9 = vld [vmem:[#allocation4 + $0x58] sm:$0xff] }
 0x280   :  { %3358 = vmatprep.mubr.f32.mxu1 %v9273_v41  ;;  %v6808_v31 = vpack.c.bf16 %v9292_v27, %v9291_v18  ;;  %v9295_v35 = vand.u32 4294901760, %v8015_v51  ;;  %v9296_v36 = vand.u32 4294901760, %v8057_v57  ;;  %v2444_v14 = vld [vmem:[#allocation4 + $0x28] sm:$0xff]  ;;  %v2449_v37 = vld [vmem:[#allocation4 + $0x50] sm:$0xff]  ;;  %v3639_v57 = vand.u32 4294901760, %v2450_v9 }
 0x281   :  { %6747 = vmatpush1.bf16.msra.mxu0 %v6746_v32  ;;  %v6762_v19 = vpack.c.bf16 %v9294_v44, %v9293_v52 }
 0x282   :  { %2731 = vmatprep.subr.mxu0 %v8133_v39  ;;  %6795 = vmatpush1.bf16.msra.mxu1 %v6794_v40  ;;  %v6810_v3 = vpack.c.bf16 %v9296_v36, %v9295_v35  ;;  %v2462_v51 = vld [vmem:[#allocation4 + $0xb8] sm:$0xff]  ;;  %v3635_v39 = vand.u32 4294901760, %v2444_v14 }
 0x283   :  { %3300 = vmatprep.subr.mxu1 %v8168_v6  ;;  %v2456_v6 = vld [vmem:[#allocation4 + $0x88] sm:$0xff] }
 0x285   :  { %2734 = vmatpush1.msra.mxu0 %v8160_v38  ;;  %v3647_v38 = vand.u32 4294901760, %v2462_v51 }
 0x286   :  { %6749 = vmatprep.subr.bf16.mxu0 %v7881_v53  ;;  %3303 = vmatpush1.msra.mxu1 %v8146_v30  ;;  %v3637_v30 = vand.u32 4294901760, %v2443_v0  ;;  %v2467_v28 = vld [vmem:[#allocation4 + $0xe0] sm:$0xf] }
 0x287   :  { %2792 = vmatmul.mubr.f32.vlgmr.msra.gmra.mrb[4].mxu0 %v7917_v25  ;;  %6797 = vmatprep.subr.bf16.mxu1 %v8048_v24 }
 0x288   :  { %6751 = vmatpush1.bf16.msra.mxu0 %v7883_v54  ;;  %3361 = vmatmul.mubr.f32.vlgmr.msra.gmra.mrb[4].mxu1 %v7917_v25 }
 0x289   :  { %6753 = vmatprep.subr.bf16.mxu0 %v7931_v34  ;;  %6799 = vmatpush1.bf16.msra.mxu1 %v8021_v11 }
 0x28a   :  { %6801 = vmatprep.subr.bf16.mxu1 %v9276_v20  ;;  %2872 = vmatprep.mubr.f32.mxu0 %v9273_v41 }
 0x28b   :  { %3441 = vmatprep.mubr.f32.mxu1 %v9273_v41 }
 0x28c   :  { %6755 = vmatpush1.bf16.msra.mxu0 %v9277_v4 }
 0x28d   :  { %2815 = vmatprep.subr.mxu0 %v9278_v63  ;;  %6803 = vmatpush1.bf16.msra.mxu1 %v9279_v62 }
 0x28e   :  { %3384 = vmatprep.subr.mxu1 %v8143_v49 }
 0x290   :  { %2817 = vmatpush1.msra.mxu0 %v8141_v10 }
 0x291   :  { %6757 = vmatprep.subr.bf16.mxu0 %v6756_v55  ;;  %3386 = vmatpush1.msra.mxu1 %v8107_v61 }
 0x292   :  { %2876 = vmatmul.mubr.f32.vlgmr.msra.gmra.mrb[4].mxu0 %v9286_v16  ;;  %6805 = vmatprep.subr.bf16.mxu1 %v6804_v59 }
 0x293   :  { %6759 = vmatpush1.bf16.msra.mxu0 %v6758_v12  ;;  %3445 = vmatmul.mubr.f32.vlgmr.msra.gmra.mrb[4].mxu1 %v9286_v16 }
 0x294   :  { %6761 = vmatprep.subr.bf16.mxu0 %v6760_v45  ;;  %6807 = vmatpush1.bf16.msra.mxu1 %v6806_v33 }
 0x295   :  { %6809 = vmatprep.subr.bf16.mxu1 %v6808_v31  ;;  %2976 = vmatprep.mubr.f32.mxu0 %v9273_v41 }
 0x296   :  { %3545 = vmatprep.mubr.f32.mxu1 %v9273_v41 }
 0x297   :  { %6763 = vmatpush1.bf16.msra.mxu0 %v6762_v19 }
 0x298   :  { %2917 = vmatprep.subr.mxu0 %v2633_v21  ;;  %6811 = vmatpush1.bf16.msra.mxu1 %v6810_v3  ;;  %v3641_v21 = vand.u32 4294901760, %v2449_v37 }
 0x299   :  { %3486 = vmatprep.subr.mxu1 %v3202_v15  ;;  %v2468_v15 = vld [vmem:[#allocation4 + $0xe8] sm:$0xf] }
 0x29a   :  { %v8325_v42 = vsub.f32 %v2449_v37, %v3641_v21  ;;  %v2495_v58 = vsel %vm149_vm0, %v2468_v15, 0  ;;  %v8352_v2 = vpack.c.bf16 %v3641_v21, %v3637_v30 }
 0x29b   :  { %2921 = vmatpush1.msra.mxu0 %v2639_v23  ;;  %v2461_v23 = vld [vmem:[#allocation4 + $0xb0] sm:$0xff] }
 0x29c   :  { %6765 = vmatprep.subr.bf16.mxu0 %v7881_v53  ;;  %3490 = vmatpush1.msra.mxu1 %v3208_v8  ;;  %v8320_v53 = vsub.f32 %v2450_v9, %v3639_v57  ;;  %v2455_v8 = vld [vmem:[#allocation4 + $0x80] sm:$0xff]  ;;  %v3649_v47 = vand.u32 4294901760, %v2461_v23 }
 0x29d   :  { %2978 = vmatmul.mubr.f32.vlgmr.msra.gmra.mrb[4].mxu0 %v7901_v13  ;;  %6813 = vmatprep.subr.bf16.mxu1 %v8048_v24  ;;  %v3643_v24 = vand.u32 4294901760, %v2456_v6  ;;  %v3645_v5 = vand.u32 4294901760, %v2455_v8 }
 0x29e   :  { %6767 = vmatpush1.bf16.msra.mxu0 %v7883_v54  ;;  %3547 = vmatmul.mubr.f32.vlgmr.msra.gmra.mrb[4].mxu1 %v7901_v13  ;;  %v8323_v54 = vsub.f32 %v2444_v14, %v3635_v39  ;;  %v3735_v1 = vand.u32 4294901760, %v8320_v53  ;;  %v8339_v32 = vsub.f32 %v2461_v23, %v3649_v47 }
 0x29f   :  { %6769 = vmatprep.subr.bf16.mxu0 %v7931_v34  ;;  %6815 = vmatpush1.bf16.msra.mxu1 %v8021_v11  ;;  %v8328_v34 = vsub.f32 %v2462_v51, %v3647_v38  ;;  %v8332_v11 = vsub.f32 %v2443_v0, %v3637_v30  ;;  %v8336_v17 = vsub.f32 %v2456_v6, %v3643_v24 }
 0x2a0   :  { %6817 = vmatprep.subr.bf16.mxu1 %v9276_v20  ;;  %3058 = vmatprep.mubr.f32.mxu0 %v9273_v41  ;;  %v3723_v40 = vand.u32 4294901760, %v8323_v54  ;;  %v3741_v20 = vand.u32 4294901760, %v8325_v42  ;;  %v8354_v46 = vsub.f32 %v2455_v8, %v3645_v5  ;;  %v3736_v29 = vsub.f32 %v8320_v53, %v3735_v1 }
 0x2a1   :  { %3627 = vmatprep.mubr.f32.mxu1 %v9273_v41  ;;  %v3729_v55 = vand.u32 4294901760, %v8332_v11  ;;  %v3747_v43 = vand.u32 4294901760, %v8336_v17  ;;  %v3765_v60 = vand.u32 4294901760, %v8339_v32  ;;  %v8384_v26 = vpack.c.bf16 %v3649_v47, %v3645_v5 }
 0x2a2   :  { %6771 = vmatpush1.bf16.msra.mxu0 %v9277_v4  ;;  %v8344_v4 = vpack.c.bf16 %v3639_v57, %v3635_v39  ;;  %v3742_v59 = vsub.f32 %v8325_v42, %v3741_v20  ;;  %v3724_v48 = vsub.f32 %v8323_v54, %v3723_v40  ;;  %v3753_v7 = vand.u32 4294901760, %v8354_v46 }
 0x2a3   :  { %3001 = vmatprep.subr.mxu0 %v9278_v63  ;;  %6819 = vmatpush1.bf16.msra.mxu1 %v9279_v62  ;;  %v8346_v63 = vand.u32 4294901760, %v2495_v58  ;;  %v2492_v62 = vsel %vm149_vm0, %v2467_v28, 0  ;;  %v3730_v45 = vsub.f32 %v8332_v11, %v3729_v55  ;;  %v3737_v50 = vand.u32 4294901760, %v3736_v29 }
 0x2a4   :  { %3570 = vmatprep.subr.mxu1 %v8143_v49  ;;  %v3759_v49 = vand.u32 4294901760, %v8328_v34  ;;  %v3748_v33 = vsub.f32 %v8336_v17, %v3747_v43  ;;  %v3743_v27 = vand.u32 4294901760, %v3742_v59  ;;  %v3766_v31 = vsub.f32 %v8339_v32, %v3765_v60 }
 0x2a5   :  { %v8381_v22 = vsub.f32 %v2495_v58, %v8346_v63  ;;  %v3725_v52 = vand.u32 4294901760, %v3724_v48  ;;  %v3731_v35 = vand.u32 4294901760, %v3730_v45  ;;  %v3754_v36 = vsub.f32 %v8354_v46, %v3753_v7 }
 0x2a6   :  { %3003 = vmatpush1.msra.mxu0 %v8141_v10  ;;  %v8359_v10 = vpack.c.bf16 %v3647_v38, %v3643_v24  ;;  %v3760_v12 = vsub.f32 %v8328_v34, %v3759_v49  ;;  %v3749_v9 = vand.u32 4294901760, %v3748_v33  ;;  %v3767_v37 = vand.u32 4294901760, %v3766_v31 }
 0x2a7   :  { %3060 = vmatmul.mubr.f32.vlgmr.msra.gmra.mrb[4].mxu0 %v7901_v13  ;;  %3572 = vmatpush1.msra.mxu1 %v8107_v61  ;;  %v8366_v61 = vand.u32 4294901760, %v2492_v62  ;;  %v3771_v19 = vand.u32 4294901760, %v8381_v22  ;;  %v6828_v3 = vpack.c.bf16 %v3737_v50, %v3725_v52  ;;  %v6830_v14 = vpack.c.bf16 %v3743_v27, %v3731_v35 }
 0x2a8   :  { %6821 = vmatprep.subr.bf16.mxu0 %v8344_v4  ;;  %3629 = vmatmul.mubr.f32.vlgmr.msra.gmra.mrb[4].mxu1 %v7901_v13  ;;  %v3761_v44 = vand.u32 4294901760, %v3760_v12  ;;  %v3755_v39 = vand.u32 4294901760, %v3754_v36  ;;  %v6836_v30 = vpack.c.bf16 %v8320_v53, %v8323_v54  ;;  %v6840_v24 = vpack.c.bf16 %v8328_v34, %v8336_v17 }
 0x2a9   :  { %6823 = vmatpush1.bf16.msra.mxu0 %v8352_v2  ;;  %3709 = vmatprep.mubr.f32.mxu0 %v9273_v41  ;;  %v3776_v18 = vsub.f32 %v2492_v62, %v8366_v61  ;;  %v3772_v0 = vsub.f32 %v8381_v22, %v3771_v19  ;;  %v6842_v8 = vpack.c.bf16 %v8339_v32, %v8354_v46 }
 0x2aa   :  { %6825 = vmatprep.subr.bf16.mxu0 %v8359_v10  ;;  %4805 = vmatprep.mubr.f32.mxu1 %v9273_v41  ;;  %v6832_v57 = vpack.c.bf16 %v3761_v44, %v3749_v9  ;;  %v6834_v21 = vpack.c.bf16 %v3767_v37, %v3755_v39  ;;  %v6852_v15 = vpack.c.bf16 %v3735_v1, %v3723_v40 }
 0x2ab   :  { %v3777_v51 = vand.u32 4294901760, %v3776_v18  ;;  %v3773_v38 = vand.u32 4294901760, %v3772_v0  ;;  %v6856_v47 = vpack.c.bf16 %v3759_v49, %v3747_v43  ;;  %v6858_v53 = vpack.c.bf16 %v3765_v60, %v3753_v7 }
 0x2ad   :  { %6827 = vmatpush1.bf16.msra.mxu0 %v8384_v26  ;;  %v3778_v6 = vsub.f32 %v3776_v18, %v3777_v51 }
 0x2ae   :  { %3652 = vmatprep.subr.mxu0 %v8346_v63 }
 0x2af   :  { %v3779_v23 = vand.u32 4294901760, %v3778_v6 }
 0x2b1   :  { %3654 = vmatpush1.msra.mxu0 %v8366_v61 }
 0x2b2   :  { %6829 = vmatprep.subr.bf16.mxu0 %v6828_v3  ;;  %3715 = vmatmul.mubr.f32.vlgmr.msra.gmra.mrb[6].mxu0 %v8008_v56  ;;  %v6838_v56 = vpack.c.bf16 %v8325_v42, %v8332_v11 }
 0x2b3   :  { %6831 = vmatpush1.bf16.msra.mxu0 %v6830_v14  ;;  %3835 = vmatprep.mubr.f32.mxu0 %v9273_v41 }
 0x2b4   :  { %6833 = vmatprep.subr.bf16.mxu0 %v6832_v57 }
 0x2b7   :  { %6835 = vmatpush1.bf16.msra.mxu0 %v6834_v21 }
 0x2b8   :  { %3774 = vmatprep.subr.mxu0 %v3773_v38 }
 0x2bb   :  { %3780 = vmatpush1.msra.mxu0 %v3779_v23 }
 0x2bc   :  { %6837 = vmatprep.subr.bf16.mxu0 %v6836_v30  ;;  %3837 = vmatmul.mubr.f32.vlgmr.msra.gmra.mrb[6].mxu0 %v7901_v13 }
 0x2bd   :  { %6839 = vmatpush1.bf16.msra.mxu0 %v6838_v56  ;;  %3927 = vmatprep.mubr.f32.mxu0 %v9273_v41 }
 0x2be   :  { %6841 = vmatprep.subr.bf16.mxu0 %v6840_v24 }
 0x2c1   :  { %6843 = vmatpush1.bf16.msra.mxu0 %v6842_v8 }
 0x2c2   :  { %3869 = vmatprep.subr.mxu0 %v8381_v22 }
 0x2c5   :  { %3872 = vmatpush1.msra.mxu0 %v3776_v18 }
 0x2c6   :  { %6845 = vmatprep.subr.bf16.mxu0 %v8344_v4  ;;  %3930 = vmatmul.mubr.f32.vlgmr.msra.gmra.mrb[6].mxu0 %v7917_v25  ;;  %v6854_v25 = vpack.c.bf16 %v3741_v20, %v3729_v55 }
 0x2c7   :  { %6847 = vmatpush1.bf16.msra.mxu0 %v8352_v2  ;;  %4010 = vmatprep.mubr.f32.mxu0 %v9273_v41 }
 0x2c8   :  { %6849 = vmatprep.subr.bf16.mxu0 %v8359_v10 }
 0x2cb   :  { %6851 = vmatpush1.bf16.msra.mxu0 %v8384_v26 }
 0x2cc   :  { %3953 = vmatprep.subr.mxu0 %v8346_v63 }
 0x2cf   :  { %3955 = vmatpush1.msra.mxu0 %v8366_v61 }
 0x2d0   :  { %6853 = vmatprep.subr.bf16.mxu0 %v6852_v15  ;;  %4014 = vmatmul.mubr.f32.vlgmr.msra.gmra.mrb[6].mxu0 %v9286_v16 }
 0x2d1   :  { %6855 = vmatpush1.bf16.msra.mxu0 %v6854_v25  ;;  %4114 = vmatprep.mubr.f32.mxu0 %v9273_v41 }
 0x2d2   :  { %6857 = vmatprep.subr.bf16.mxu0 %v6856_v47 }
 0x2d5   :  { %6859 = vmatpush1.bf16.msra.mxu0 %v6858_v53 }
 0x2d6   :  { %4055 = vmatprep.subr.mxu0 %v3771_v19 }
 0x2d9   :  { %4059 = vmatpush1.msra.mxu0 %v3777_v51  ;;  %v4241_v54 = vpop.permute.xlu0 %4240 }
 0x2da   :  { %6861 = vmatprep.subr.bf16.mxu0 %v8344_v4  ;;  %4116 = vmatmul.mubr.f32.vlgmr.msra.gmra.mrb[6].mxu0 %v7901_v13 }
 0x2db   :  { %6863 = vmatpush1.bf16.msra.mxu0 %v8352_v2  ;;  %4196 = vmatprep.mubr.f32.mxu0 %v9273_v41 }
 0x2dc   :  { %6865 = vmatprep.subr.bf16.mxu0 %v8359_v10 }
 0x2dd   :  { %v4245_v34 = vpop.permute.xlu0 %4244 }
 0x2df   :  { %6867 = vmatpush1.bf16.msra.mxu0 %v8384_v26 }
 0x2e0   :  { %4139 = vmatprep.subr.mxu0 %v8346_v63 }
 0x2e2   :  { %v2473_v16 = vpop.permute.xlu1 %2472 }
 0x2e3   :  { %4141 = vmatpush1.msra.mxu0 %v8366_v61 }
 0x2e4   :  { %4198 = vmatmul.mubr.f32.vlgmr.msra.gmra.mrb[6].mxu0 %v7901_v13 }
 0x2e5   :  { %5423 = vmatprep.mubr.f32.mxu0 %v9273_v41 }
 0x2e6   :  { %v4243_v42 = vpop.permute.xlu1 %4242 }
 0x2e7   :  { %v4254_v32 = vsel %vm2241_vm8, %v4241_v54, %v4243_v42  ;;  %v4255_v13 = vsel %vm2241_vm8, %v4243_v42, %v4245_v34  ;;  %v4695_v54 = vld [vmem:[#allocation18] sm:$0xff] }
 0x2e8   :  { %v4249_v58 = vpop.permute.xlu0 %4248 }
 0x2ea   :  { %v4247_v11 = vpop.permute.xlu1 %4246 }
 0x2eb   :  { %v4256_v49 = vsel %vm2241_vm8, %v4245_v34, %v4247_v11  ;;  %v4257_v55 = vsel %vm2241_vm8, %v4247_v11, %v4249_v58 }
 0x2ec   :  { %v4253_v22 = vpop.permute.xlu0 %4252 }
 0x2ee   :  { %v4251_v26 = vpop.permute.xlu1 %4250 }
 0x2ef   :  { %v4259_v18 = vsel %vm2241_vm8, %v4251_v26, %v4253_v22  ;;  %v4258_v27 = vsel %vm2241_vm8, %v4249_v58, %v4251_v26  ;;  %v4663_v22 = vld [vmem:[#allocation17] sm:$0xff] }
 0x37a   :  { %v3061_v5 = vpop.f32.mrb[4].mxu0 }
 0x37b   :  { %v7019_v28 = vadd.f32 %v3061_v5, %v2473_v16  ;;  %v3063_v17 = vpop.f32.mrb[5].mxu0  ;;  %v3630_v1 = vpop.f32.mrb[4].mxu1  ;;  %v4696_v5 = vld [vmem:[#allocation18 + $0x8] sm:$0xff] }
 0x37c   :  { %v7020_v40 = vadd.f32 %v3063_v17, %v2473_v16  ;;  %v7021_v20 = vadd.f32 %v3630_v1, %v2473_v16  ;;  %v3632_v4 = vpop.f32.mrb[5].mxu1 }
 0x37d   :  { %v4204_v63 = vmax.f32 %v7019_v28, 0.0  ;;  %v7022_v62 = vadd.f32 %v3632_v4, %v2473_v16 }
 0x37e   :  { %v4205_v2 = vmax.f32 %v7020_v40, 0.0  ;;  %v4206_v46 = vmax.f32 %v7021_v20, 0.0 }
 0x37f   :  { %v4266_v10 = vmul.f32 %v4254_v32, %v4204_v63  ;;  %v4207_v29 = vmax.f32 %v7022_v62, 0.0 }
 0x380   :  { %v4267_v43 = vmul.f32 %v4255_v13, %v4205_v2  ;;  %v4268_v61 = vmul.f32 %v4256_v49, %v4206_v46 }
 0x381   :  { %v4269_v59 = vmul.f32 %v4257_v55, %v4207_v29 }
 0x382   :  { %v4278_v60 = vcombine.low %v4266_v10, %v4267_v43 }
 0x383   :  { %v4279_v48 = vcombine.low %v4268_v61, %v4269_v59 }
 0x384   :  { %4281 = vrot.lane.b32.xlu1 %v4278_v60, %s7442_s29 }
 0x385   :  { %4283 = vrot.lane.b32.xlu0 %v4279_v48, %s7442_s29 }
 0x3b7   :  { %v4199_v12 = vpop.f32.mrb[6].mxu0 }
 0x3b8   :  { %v7023_v45 = vadd.f32 %v4199_v12, %v2473_v16  ;;  %v4201_v7 = vpop.f32.mrb[7].mxu0 }
 0x3b9   :  { %v7024_v50 = vadd.f32 %v4201_v7, %v2473_v16 }
 0x3ba   :  { %v4208_v33 = vmax.f32 %v7023_v45, 0.0 }
 0x3bb   :  { %v4209_v31 = vmax.f32 %v7024_v50, 0.0 }
 0x3bc   :  { %v4270_v52 = vmul.f32 %v4258_v27, %v4208_v33  ;;  %v4708_v33 = vsel %vm2475_vm12, %v4663_v22, 0  ;;  %v4664_v27 = vld [vmem:[#allocation17 + $0x8] sm:$0xff] }
 0x3bd   :  { %v4271_v44 = vmul.f32 %v4259_v18, %v4209_v31 }
 0x3bf   :  { %v4280_v19 = vcombine.low %v4270_v52, %v4271_v44 }
 0x3c1   :  { %4285 = vrot.lane.b32.xlu1 %v4280_v19, %s7442_s29  ;;  %v8558_v19 = vand.u32 4294901760, %v4708_v33 }
 0x3f6   :  { %v4282_v35 = vpop.permute.xlu1 %4281 }
 0x3f7   :  { %v4287_v36 = vrot.slane %v4282_v35, 4  ;;  %v4284_v3 = vpop.permute.xlu0 %4283 }
 0x3f8   :  { %v4288_v9 = vrot.slane %v4284_v3, 4 }
 0x3f9   :  { %v4291_v14 = vsel %vm4290_vm2, %v4287_v36, %v4282_v35 }
 0x3fa   :  { %4303 = vst.msk [vmem:[#allocation3] sm:$0xff] %vm4302_vm3, %v4291_v14  ;;  %v4292_v37 = vsel %vm149_vm0, %v4287_v36, %v4288_v9  ;;  %v4711_v14 = vsel %vm2475_vm12, %v4664_v27, 0 }
 0x3fb   :  { %v4293_v51 = vsel %vm4290_vm2, %v4292_v37, %v4284_v3 }
 0x3fc   :  { %v8462_v57 = vcombine.high %v4293_v51, %v4293_v51  ;;  %4322 = vst [vmem:[#allocation5 + $0x10] sm:$0xf] %v4293_v51  ;;  %v4333_v6 = vcombine.low %v4293_v51, %v4293_v51 }
 0x3fe   :  { %4323 = vst [vmem:[#allocation5 + $0x18] sm:$0xf] %v8462_v57 }
 0x401   :  { %v4308_v0 = vld [vmem:[#allocation3] sm:$0xff] }
 0x402   :  { %v4314_v39 = vcombine.high %v4308_v0, %v4308_v0  ;;  %4320 = vst [vmem:[#allocation5] sm:$0xf] %v4308_v0  ;;  %4373 = vrot.lane.b32.xlu1 %v4308_v0, %s7436_s2  ;;  %4337 = vrot.lane.b32.xlu0 %v4308_v0, %s7434_s7  ;;  %v4332_v21 = vcombine.low %v4308_v0, %v4308_v0 }
 0x404   :  { %4321 = vst [vmem:[#allocation5 + $0x8] sm:$0xf] %v4314_v39 }
 0x406   :  { %4503 = vrot.lane.b32.xlu1 %v4308_v0, %s7438_s27  ;;  %4416 = vrot.lane.b32.xlu0 %v4308_v0, %s7435_s25 }
 0x40a   :  { %4590 = vrot.lane.b32.xlu1 %v4308_v0, %s7440_s1  ;;  %4375 = vrot.lane.b32.xlu0 %v4314_v39, %s7436_s2 }
 0x40e   :  { %4457 = vrot.lane.b32.xlu1 %v4308_v0, %s7437_s26  ;;  %4335 = vrot.lane.b32.xlu0 %v4332_v21, %s7434_s7 }
 0x412   :  { %4459 = vrot.lane.b32.xlu1 %v4314_v39, %s7437_s26  ;;  %4414 = vrot.lane.b32.xlu0 %v4332_v21, %s7435_s25 }
 0x416   :  { %4546 = vrot.lane.b32.xlu1 %v4314_v39, %s7439_s5  ;;  %4501 = vrot.lane.b32.xlu0 %v4332_v21, %s7438_s27 }
 0x41a   :  { %4377 = vrot.lane.b32.xlu1 %v4293_v51, %s7436_s2  ;;  %4461 = vrot.lane.b32.xlu0 %v4293_v51, %s7437_s26 }
 0x41e   :  { %4339 = vrot.lane.b32.xlu1 %v4333_v6, %s7434_s7  ;;  %4548 = vrot.lane.b32.xlu0 %v4293_v51, %s7439_s5 }
 0x422   :  { %4418 = vrot.lane.b32.xlu1 %v4333_v6, %s7435_s25  ;;  %4505 = vrot.lane.b32.xlu0 %v4333_v6, %s7438_s27 }
 0x426   :  { %4544 = vrot.lane.b32.xlu1 %v4308_v0, %s7439_s5  ;;  %4592 = vrot.lane.b32.xlu0 %v4333_v6, %s7440_s1 }
 0x42a   :  { %4633 = vrot.lane.b32.xlu1 %v4314_v39, %s7441_s28  ;;  %4588 = vrot.lane.b32.xlu0 %v4332_v21, %s7440_s1  ;;  %v8565_v21 = vsub.f32 %v4708_v33, %v8558_v19 }
 0x42e   :  { %4631 = vrot.lane.b32.xlu1 %v4308_v0, %s7441_s28  ;;  %4635 = vrot.lane.b32.xlu0 %v4293_v51, %s7441_s28 }
 0x432   :  { %4341 = vrot.lane.b32.xlu0 %v4293_v51, %s7434_s7 }
 0x433   :  { %v4286_v38 = vpop.permute.xlu1 %4285 }
 0x434   :  { %v4289_v23 = vrot.slane %v4286_v38, 4 }
 0x436   :  { %v4294_v30 = vsel %vm149_vm0, %v4288_v9, %v4289_v23  ;;  %4307 = vst.msk [vmem:[#allocation3 + $0x18] sm:$0xf] %vm4306_vm15, %v4289_v23  ;;  %4420 = vrot.lane.b32.xlu0 %v4293_v51, %s7435_s25 }
 0x437   :  { %v4295_v56 = vsel %vm4290_vm2, %v4294_v30, %v4286_v38  ;;  %v8568_v30 = vand.u32 4294901760, %v4711_v14 }
 0x438   :  { %v4316_v24 = vcombine.high %v4295_v56, %v4295_v56  ;;  %4324 = vst [vmem:[#allocation5 + $0x20] sm:$0xf] %v4295_v56  ;;  %v4412_v16 = vcombine.low %v4295_v56, %v4295_v56 }
 0x43a   :  { %4325 = vst.msk [vmem:[#allocation5 + $0x28] sm:$0xf] %vm2090_vm4, %v4316_v24  ;;  %4507 = vrot.lane.b32.xlu0 %v4293_v51, %s7438_s27 }
 0x43d   :  { %v4449_v8 = vld [vmem:[#allocation3 + $0x18] sm:$0xf] }
 0x43e   :  { %4469 = vrot.lane.b32.xlu1 %v4449_v8, %s7437_s26  ;;  %4594 = vrot.lane.b32.xlu0 %v4293_v51, %s7440_s1  ;;  %v4536_v15 = vld [vmem:[#allocation3 + $0x18] sm:$0xf] }
 0x43f   :  { %v7202_v25 = vld [vmem:[#allocation3 + $0x18] ss:$0 sps:$4 sm:$0xff]  }
 0x440   :  { %v7203_v47 = vld [vmem:[#allocation3 + $0x18] ss:$0 sps:$4 sm:$0xff]  }
 0x441   :  { %v7204_v53 = vld [vmem:[#allocation3 + $0x18] ss:$0 sps:$4 sm:$0xff]  }
 0x442   :  { %4556 = vrot.lane.b32.xlu1 %v4536_v15, %s7439_s5  ;;  %4379 = vrot.lane.b32.xlu0 %v8462_v57, %s7436_s2  ;;  %v4623_v11 = vld [vmem:[#allocation3 + $0x18] sm:$0xf] }
 0x446   :  { %4381 = vrot.lane.b32.xlu1 %v4295_v56, %s7436_s2  ;;  %4463 = vrot.lane.b32.xlu0 %v8462_v57, %s7437_s26 }
 0x44a   :  { %4426 = vrot.lane.b32.xlu1 %v7202_v25, %s7435_s25  ;;  %4550 = vrot.lane.b32.xlu0 %v8462_v57, %s7439_s5 }
 0x44e   :  { %4465 = vrot.lane.b32.xlu1 %v4295_v56, %s7437_s26  ;;  %4424 = vrot.lane.b32.xlu0 %v4295_v56, %s7435_s25 }
 0x452   :  { %4513 = vrot.lane.b32.xlu1 %v7203_v47, %s7438_s27  ;;  %4345 = vrot.lane.b32.xlu0 %v4295_v56, %s7434_s7 }
 0x456   :  { %4552 = vrot.lane.b32.xlu1 %v4295_v56, %s7439_s5  ;;  %4511 = vrot.lane.b32.xlu0 %v4295_v56, %s7438_s27 }
 0x45a   :  { %4600 = vrot.lane.b32.xlu1 %v7204_v53, %s7440_s1  ;;  %4598 = vrot.lane.b32.xlu0 %v4295_v56, %s7440_s1 }
 0x45e   :  { %4343 = vrot.lane.b32.xlu1 %v4412_v16, %s7434_s7  ;;  %4467 = vrot.lane.b32.xlu0 %v4316_v24, %s7437_s26 }
 0x462   :  { %4422 = vrot.lane.b32.xlu1 %v4412_v16, %s7435_s25  ;;  %4554 = vrot.lane.b32.xlu0 %v4316_v24, %s7439_s5 }
 0x466   :  { %4383 = vrot.lane.b32.xlu1 %v4316_v24, %s7436_s2  ;;  %4637 = vrot.lane.b32.xlu0 %v8462_v57, %s7441_s28 }
 0x46a   :  { %4509 = vrot.lane.b32.xlu1 %v4412_v16, %s7438_s27  ;;  %4641 = vrot.lane.b32.xlu0 %v4316_v24, %s7441_s28 }
 0x46e   :  { %4596 = vrot.lane.b32.xlu1 %v4412_v16, %s7440_s1  ;;  %4699 = vperm.xlu0 %7192, %v4695_v54  }
 0x472   :  { %4639 = vrot.lane.b32.xlu1 %v4295_v56, %s7441_s28 }
 0x474   :  { %v4338_v42 = vpop.permute.xlu0 %4337  ;;  %v4374_v34 = vpop.permute.xlu1 %4373 }
 0x476   :  { %4643 = vrot.lane.b32.xlu1 %v4623_v11, %s7441_s28  ;;  %v8585_v11 = vand.u32 4294901760, %v8565_v21 }
 0x478   :  { %v4417_v58 = vpop.permute.xlu0 %4416  ;;  %v4504_v28 = vpop.permute.xlu1 %4503 }
 0x47a   :  { %4704 = vperm.xlu1 %7193, %v4696_v5  }
 0x47c   :  { %v4376_v17 = vpop.permute.xlu0 %4375  ;;  %v4591_v1 = vpop.permute.xlu1 %4590 }
 0x47d   :  { %v4385_v32 = vsel %vm2153_vm6, %v4374_v34, %v4376_v17 }
 0x47e   :  { %4396 = vst [vmem:[#allocation5 + $0x30] sm:$0xf] %v4385_v32 }
 0x480   :  { %v4336_v40 = vpop.permute.xlu0 %4335  ;;  %v4458_v20 = vpop.permute.xlu1 %4457 }
 0x481   :  { %v4347_v4 = vsel %vm2113_vm5, %v4336_v40, %v4338_v42 }
 0x482   :  { %4358 = vst [vmem:[#allocation5] sm:$0xf0] %v4347_v4 }
 0x484   :  { %v4415_v63 = vpop.permute.xlu0 %4414  ;;  %v4460_v13 = vpop.permute.xlu1 %4459 }
 0x485   :  { %v4428_v62 = vsel %vm2197_vm7, %v4415_v63, %v4417_v58  ;;  %v4471_v49 = vsel %vm2241_vm8, %v4458_v20, %v4460_v13 }
 0x486   :  { %4440 = vst [vmem:[#allocation5 + $0x30] sm:$0xf0] %v4428_v62  ;;  %4483 = vst [vmem:[#allocation5 + $0x60] sm:$0xf] %v4471_v49 }
 0x488   :  { %v4502_v2 = vpop.permute.xlu0 %4501  ;;  %v4547_v46 = vpop.permute.xlu1 %4546 }
 0x489   :  { %v4515_v55 = vsel %vm2286_vm9, %v4502_v2, %v4504_v28  ;;  %v4665_v44 = vld [vmem:[#allocation5] sm:$0xff] }
 0x48a   :  { %4527 = vst [vmem:[#allocation5 + $0x60] sm:$0xf0] %v4515_v55  ;;  %v4733_v51 = vand.u32 4294901760, %v4665_v44 }
 0x48c   :  { %v8531_v10 = vpop.permute.xlu0 %4461  ;;  %v8533_v29 = vpop.permute.xlu1 %4377  ;;  %v8574_v25 = vsub.f32 %v4665_v44, %v4733_v51 }
 0x48d   :  { %v4472_v43 = vsel %vm2241_vm8, %v4460_v13, %v8531_v10  ;;  %v4386_v61 = vsel %vm2153_vm6, %v4376_v17, %v8533_v29  ;;  %v4671_v18 = vld [vmem:[#allocation5 + $0x30] sm:$0xff] }
 0x48e   :  { %4484 = vst [vmem:[#allocation5 + $0x68] sm:$0xf] %v4472_v43  ;;  %4397 = vst [vmem:[#allocation5 + $0x38] sm:$0xf] %v4386_v61  ;;  %v4737_v9 = vand.u32 4294901760, %v4671_v18  ;;  %v4836_v13 = vand.u32 4294901760, %v8574_v25 }
 0x490   :  { %v8539_v59 = vpop.permute.xlu0 %4548  ;;  %v8541_v60 = vpop.permute.xlu1 %4339  ;;  %v8570_v24 = vsub.f32 %v4671_v18, %v4737_v9  ;;  %v4837_v33 = vsub.f32 %v8574_v25, %v4836_v13 }
 0x491   :  { %v4559_v48 = vsel %vm2330_vm11, %v4547_v46, %v8539_v59  ;;  %v4348_v12 = vsel %vm2113_vm5, %v4338_v42, %v8541_v60  ;;  %v4677_v39 = vld [vmem:[#allocation5 + $0x60] sm:$0xff] }
 0x492   :  { %4571 = vst [vmem:[#allocation5 + $0x98] sm:$0xf] %v4559_v48  ;;  %4359 = vst [vmem:[#allocation5 + $0x8] sm:$0xf0] %v4348_v12  ;;  %v4741_v47 = vand.u32 4294901760, %v4677_v39  ;;  %v4848_v20 = vand.u32 4294901760, %v8570_v24  ;;  %v4809_v48 = vsub.f32 %v8565_v21, %v8585_v11 }
 0x494   :  { %v8547_v26 = vpop.permute.xlu0 %4505  ;;  %v8549_v45 = vpop.permute.xlu1 %4418  ;;  %v8599_v4 = vsub.f32 %v4677_v39, %v4741_v47 }
 0x495   :  { %v4516_v7 = vsel %vm2286_vm9, %v4504_v28, %v8547_v26  ;;  %v4429_v50 = vsel %vm2197_vm7, %v4417_v58, %v8549_v45  ;;  %v8590_v28 = vpack.c.bf16 %v4737_v9, %v4733_v51  ;;  %v8648_v51 = vand.u32 4294901760, %v4809_v48 }
 0x496   :  { %4528 = vst [vmem:[#allocation5 + $0x68] sm:$0xf0] %v4516_v7  ;;  %4441 = vst [vmem:[#allocation5 + $0x38] sm:$0xf0] %v4429_v50  ;;  %v4849_v7 = vsub.f32 %v8570_v24, %v4848_v20  ;;  %v4860_v18 = vand.u32 4294901760, %v8599_v4 }
 0x498   :  { %v8556_v31 = vpop.permute.xlu0 %4592  ;;  %v4545_v52 = vpop.permute.xlu1 %4544 }
 0x499   :  { %v4603_v35 = vsel %vm2375_vm10, %v4591_v1, %v8556_v31  ;;  %v4558_v36 = vsel %vm2330_vm11, %v4545_v52, %v4547_v46  ;;  %v4666_v3 = vld [vmem:[#allocation5 + $0x8] sm:$0xff] }
 0x49a   :  { %4615 = vst [vmem:[#allocation5 + $0x98] sm:$0xf0] %v4603_v35  ;;  %4570 = vst [vmem:[#allocation5 + $0x90] sm:$0xf] %v4558_v36  ;;  %v4731_v37 = vand.u32 4294901760, %v4666_v3 }
 0x49c   :  { %v4589_v57 = vpop.permute.xlu0 %4588  ;;  %v4634_v0 = vpop.permute.xlu1 %4633  ;;  %v8572_v15 = vsub.f32 %v4666_v3, %v4731_v37 }
 0x49d   :  { %v4602_v6 = vsel %vm2375_vm10, %v4589_v57, %v4591_v1  ;;  %v4672_v38 = vld [vmem:[#allocation5 + $0x38] sm:$0xff]  ;;  %v4678_v23 = vld [vmem:[#allocation5 + $0x68] sm:$0xff]  ;;  %v8593_v1 = vsub.f32 %v4711_v14, %v8568_v30 }
 0x49e   :  { %4614 = vst [vmem:[#allocation5 + $0x90] sm:$0xf0] %v4602_v6  ;;  %v4735_v56 = vand.u32 4294901760, %v4672_v38  ;;  %v4739_v8 = vand.u32 4294901760, %v4678_v23  ;;  %v4830_v63 = vand.u32 4294901760, %v8572_v15  ;;  %v4850_v6 = vand.u32 4294901760, %v4849_v7 }
 0x49f   :  { %v8619_v12 = vand.u32 4294901760, %v8593_v1 }
 0x4a0   :  { %v8576_v53 = vpop.permute.xlu0 %4635  ;;  %v4632_v16 = vpop.permute.xlu1 %4631  ;;  %v8578_v54 = vpack.c.bf16 %v4735_v56, %v4731_v37  ;;  %v8580_v42 = vsub.f32 %v4672_v38, %v4735_v56  ;;  %v8582_v34 = vsub.f32 %v4678_v23, %v4739_v8  ;;  %v4831_v50 = vsub.f32 %v8572_v15, %v4830_v63 }
 0x4a1   :  { %v4646_v5 = vsel %vm2419_vm13, %v4634_v0, %v8576_v53  ;;  %v4645_v58 = vsel %vm2419_vm13, %v4632_v16, %v4634_v0  ;;  %v4684_v17 = vld [vmem:[#allocation5 + $0x98] sm:$0xff]  ;;  %v4820_v57 = vsub.f32 %v8593_v1, %v8619_v12  ;;  %v4838_v16 = vand.u32 4294901760, %v4837_v33 }
 0x4a2   :  { %4658 = vst [vmem:[#allocation5 + $0xc8] sm:$0xf] %v4646_v5  ;;  %4657 = vst [vmem:[#allocation5 + $0xc0] sm:$0xf] %v4645_v58  ;;  %6869 = vmatprep.subr.bf16.mxu1 %v8578_v54  ;;  %v4743_v32 = vand.u32 4294901760, %v4684_v17  ;;  %v4842_v40 = vand.u32 4294901760, %v8580_v42  ;;  %v4861_v58 = vsub.f32 %v8599_v4, %v4860_v18 }
 0x4a3   :  { %6871 = vmatpush1.bf16.msra.mxu1 %v8590_v28  ;;  %v4854_v46 = vand.u32 4294901760, %v8582_v34  ;;  %v4832_v56 = vand.u32 4294901760, %v4831_v50  ;;  %v6878_v48 = vpack.c.bf16 %v4850_v6, %v4838_v16  ;;  %v8681_v50 = vand.u32 4294901760, %v4820_v57 }
 0x4a4   :  { %v8603_v62 = vpop.permute.xlu0 %4341  ;;  %v8605_v49 = vpack.c.bf16 %v4743_v32, %v4739_v8  ;;  %v8607_v2 = vsub.f32 %v4684_v17, %v4743_v32  ;;  %v4843_v61 = vsub.f32 %v8580_v42, %v4842_v40 }
 0x4a5   :  { %v4349_v55 = vsel %vm2113_vm5, %v8541_v60, %v8603_v62  ;;  %v4683_v43 = vld [vmem:[#allocation5 + $0x90] sm:$0xff]  ;;  %v4855_v35 = vsub.f32 %v8582_v34, %v4854_v46 }
 0x4a6   :  { %4360 = vst [vmem:[#allocation5 + $0x10] sm:$0xf0] %v4349_v55  ;;  %6873 = vmatprep.subr.bf16.mxu1 %v8605_v49  ;;  %v4745_v22 = vand.u32 4294901760, %v4683_v43  ;;  %v4866_v60 = vand.u32 4294901760, %v8607_v2  ;;  %v4844_v37 = vand.u32 4294901760, %v4843_v61 }
 0x4a7   :  { %v4856_v5 = vand.u32 4294901760, %v4855_v35 }
 0x4a8   :  { %v8633_v27 = vpop.permute.xlu0 %4420  ;;  %v8635_v52 = vpack.c.bf16 %v4745_v22, %v4741_v47  ;;  %v8637_v44 = vsub.f32 %v4683_v43, %v4745_v22  ;;  %v4867_v36 = vsub.f32 %v8607_v2, %v4866_v60  ;;  %v6876_v43 = vpack.c.bf16 %v4844_v37, %v4832_v56 }
 0x4a9   :  { %v4430_v3 = vsel %vm2197_vm7, %v8549_v45, %v8633_v27  ;;  %v4690_v9 = vld [vmem:[#allocation5 + $0xc8] sm:$0xf]  ;;  %v4689_v14 = vld [vmem:[#allocation5 + $0xc0] sm:$0xf] }
 0x4aa   :  { %4442 = vst [vmem:[#allocation5 + $0x40] sm:$0xf0] %v4430_v3  ;;  %6875 = vmatpush1.bf16.msra.mxu1 %v8635_v52  ;;  %v4717_v0 = vsel %vm149_vm0, %v4690_v9, 0  ;;  %v4714_v39 = vsel %vm149_vm0, %v4689_v14, 0  ;;  %v4872_v38 = vand.u32 4294901760, %v8637_v44  ;;  %v4868_v8 = vand.u32 4294901760, %v4867_v36 }
 0x4ab   :  { %v8656_v23 = vand.u32 4294901760, %v4717_v0  ;;  %v8658_v45 = vand.u32 4294901760, %v4714_v39  ;;  %v4862_v3 = vand.u32 4294901760, %v4861_v58  ;;  %v6886_v58 = vpack.c.bf16 %v8570_v24, %v8574_v25 }
 0x4ac   :  { %v8660_v47 = vpop.permute.xlu0 %4507  ;;  %v4873_v17 = vsub.f32 %v8637_v44, %v4872_v38  ;;  %v6880_v7 = vpack.c.bf16 %v4868_v8, %v4856_v5  ;;  %v6884_v8 = vpack.c.bf16 %v8580_v42, %v8572_v15  ;;  %v6904_v42 = vpack.c.bf16 %v4866_v60, %v4854_v46 }
 0x4ad   :  { %v4517_v32 = vsel %vm2286_vm9, %v8547_v26, %v8660_v47  ;;  %4748 = vmatprep.subr.mxu1 %v8656_v23  ;;  %v8673_v55 = vsub.f32 %v4714_v39, %v8658_v45  ;;  %v8676_v61 = vsub.f32 %v4717_v0, %v8656_v23 }
 0x4ae   :  { %4529 = vst [vmem:[#allocation5 + $0x70] sm:$0xf0] %v4517_v32  ;;  %4750 = vmatpush1.msra.mxu1 %v8658_v45  ;;  %v4874_v22 = vand.u32 4294901760, %v4873_v17 }
 0x4af   :  { %6877 = vmatprep.subr.bf16.mxu1 %v6876_v43  ;;  %4811 = vmatmul.mubr.f32.vlgmr.msra.gmra.mrb[6].mxu1 %v8648_v51  ;;  %v4878_v26 = vand.u32 4294901760, %v8676_v61  ;;  %v4884_v33 = vand.u32 4294901760, %v8673_v55 }
 0x4b0   :  { %v8684_v35 = vpop.permute.xlu1 %4469  ;;  %v8686_v36 = vpop.permute.xlu0 %4594  ;;  %6879 = vmatpush1.bf16.msra.mxu1 %v6878_v48  ;;  %4816 = vmatprep.mubr.f32.mxu1 %v9273_v41  ;;  %v6882_v37 = vpack.c.bf16 %v4874_v22, %v4862_v3  ;;  %v6890_v22 = vpack.c.bf16 %v8637_v44, %v8599_v4 }
 0x4b1   :  { %v4604_v9 = vsel %vm2375_vm10, %v8556_v31, %v8686_v36  ;;  %6881 = vmatprep.subr.bf16.mxu1 %v6880_v7  ;;  %v4879_v14 = vsub.f32 %v8676_v61, %v4878_v26  ;;  %v4885_v57 = vsub.f32 %v8673_v55, %v4884_v33 }
 0x4b2   :  { %4616 = vst [vmem:[#allocation5 + $0xa0] sm:$0xf0] %v4604_v9 }
 0x4b3   :  { %v4880_v0 = vand.u32 4294901760, %v4879_v14  ;;  %4822 = vmatmul.mubr.f32.gmra.mrb[8].mxu1 %v8681_v50  ;;  %v4886_v56 = vand.u32 4294901760, %v4885_v57 }
 0x4b4   :  { %v8699_v39 = vpop.permute.xlu1 %4556  ;;  %v4380_v6 = vpop.permute.xlu0 %4379  ;;  %6883 = vmatpush1.bf16.msra.mxu1 %v6882_v37  ;;  %4942 = vmatprep.mubr.f32.mxu1 %v9273_v41 }
 0x4b5   :  { %v4387_v31 = vsel %vm2153_vm6, %v8533_v29, %v4380_v6  ;;  %4881 = vmatprep.subr.mxu1 %v4880_v0  ;;  %v6888_v29 = vpack.c.bf16 %v8607_v2, %v8582_v34  ;;  %v6906_v34 = vpack.c.bf16 %v4872_v38, %v4860_v18 }
 0x4b6   :  { %4398 = vst [vmem:[#allocation5 + $0x40] sm:$0xf] %v4387_v31 }
 0x4b8   :  { %v8706_v16 = vpop.permute.xlu1 %4381  ;;  %v4464_v5 = vpop.permute.xlu0 %4463  ;;  %4887 = vmatpush1.msra.mxu1 %v4886_v56  ;;  %v6900_v56 = vpack.c.bf16 %v4842_v40, %v4830_v63 }
 0x4b9   :  { %v4388_v17 = vsel %vm2153_vm6, %v4380_v6, %v8706_v16  ;;  %v4473_v32 = vsel %vm2241_vm8, %v8531_v10, %v4464_v5  ;;  %6885 = vmatprep.subr.bf16.mxu1 %v6884_v8  ;;  %4944 = vmatmul.mubr.f32.vlgmr.msra.gmra.mrb[6].mxu1 %v8558_v19  ;;  %v8752_v8 = vld [vmem:[#allocation5 + $0x10] sm:$0xff] }
 0x4ba   :  { %4399 = vst [vmem:[#allocation5 + $0x48] sm:$0xf] %v4388_v17  ;;  %4485 = vst [vmem:[#allocation5 + $0x70] sm:$0xf] %v4473_v32  ;;  %6887 = vmatpush1.bf16.msra.mxu1 %v6886_v58  ;;  %4949 = vmatprep.mubr.f32.mxu1 %v9273_v41  ;;  %v6902_v17 = vpack.c.bf16 %v4848_v20, %v4836_v13  ;;  %v5351_v24 = vand.u32 4294901760, %v8752_v8 }
 0x4bb   :  { %6889 = vmatprep.subr.bf16.mxu1 %v6888_v29 }
 0x4bc   :  { %v4427_v43 = vpop.permute.xlu1 %4426  ;;  %v4551_v48 = vpop.permute.xlu0 %4550  ;;  %v8790_v4 = vsub.f32 %v8752_v8, %v5351_v24 }
 0x4bd   :  { %v4560_v10 = vsel %vm2330_vm11, %v8539_v59, %v4551_v48  ;;  %4951 = vmatmul.mubr.f32.gmra.mrb[8].mxu1 %v8568_v30  ;;  %v8761_v32 = vld [vmem:[#allocation5 + $0x40] sm:$0xff] }
 0x4be   :  { %4572 = vst [vmem:[#allocation5 + $0xa0] sm:$0xf] %v4560_v10  ;;  %6891 = vmatpush1.bf16.msra.mxu1 %v6890_v22  ;;  %5041 = vmatprep.mubr.f32.mxu1 %v9273_v41  ;;  %v5355_v25 = vand.u32 4294901760, %v8761_v32 }
 0x4bf   :  { %4983 = vmatprep.subr.mxu1 %v8676_v61 }
 0x4c0   :  { %v4466_v7 = vpop.permute.xlu1 %4465  ;;  %v8725_v3 = vpop.permute.xlu0 %4424 }
 0x4c1   :  { %v4474_v9 = vsel %vm2241_vm8, %v4464_v5, %v4466_v7  ;;  %v4433_v14 = vsel %vm2197_vm7, %v8725_v3, %v4427_v43  ;;  %v9256_v43 = vand.u32 4294901760, %v8790_v4 }
 0x4c2   :  { %4486 = vst [vmem:[#allocation5 + $0x78] sm:$0xf] %v4474_v9  ;;  %4445 = vst.msk [vmem:[#allocation5 + $0x58] sm:$0xf0] %vm2130_vm14, %v4433_v14  ;;  %4986 = vmatpush1.msra.mxu1 %v8673_v55 }
 0x4c3   :  { %6893 = vmatprep.subr.bf16.mxu1 %v8578_v54  ;;  %5044 = vmatmul.mubr.f32.vlgmr.msra.gmra.mrb[6].mxu1 %v8565_v21 }
 0x4c4   :  { %v4514_v59 = vpop.permute.xlu1 %4513  ;;  %v4346_v37 = vpop.permute.xlu0 %4345  ;;  %6895 = vmatpush1.bf16.msra.mxu1 %v8590_v28  ;;  %5049 = vmatprep.mubr.f32.mxu1 %v9273_v41 }
 0x4c5   :  { %4363 = vst.msk [vmem:[#allocation5 + $0x28] sm:$0xf0] %vm2130_vm14, %v4346_v37  ;;  %6897 = vmatprep.subr.bf16.mxu1 %v8605_v49  ;;  %v8801_v38 = vld [vmem:[#allocation5 + $0xa0] sm:$0xff] }
 0x4c6   :  { %v5363_v22 = vand.u32 4294901760, %v8801_v38 }
 0x4c7   :  { %5052 = vmatmul.mubr.f32.gmra.mrb[8].mxu1 %v8593_v1 }
 0x4c8   :  { %v4553_v57 = vpop.permute.xlu1 %4552  ;;  %v8739_v0 = vpop.permute.xlu0 %4511  ;;  %6899 = vmatpush1.bf16.msra.mxu1 %v8635_v52  ;;  %5132 = vmatprep.mubr.f32.mxu1 %v9273_v41 }
 0x4c9   :  { %v4561_v6 = vsel %vm2330_vm11, %v4551_v48, %v4553_v57  ;;  %v4520_v31 = vsel %vm2286_vm9, %v8739_v0, %v4514_v59  ;;  %5075 = vmatprep.subr.mxu1 %v8656_v23  ;;  %v4679_v48 = vld [vmem:[#allocation5 + $0x70] sm:$0xff] }
 0x4ca   :  { %4573 = vst [vmem:[#allocation5 + $0xa8] sm:$0xf] %v4561_v6  ;;  %4532 = vst.msk [vmem:[#allocation5 + $0x88] sm:$0xf0] %vm2130_vm14, %v4520_v31 }
 0x4cc   :  { %v4601_v5 = vpop.permute.xlu1 %4600  ;;  %v8754_v58 = vpop.permute.xlu0 %4598  ;;  %5077 = vmatpush1.msra.mxu1 %v8658_v45  ;;  %v8799_v44 = vld [vmem:[#allocation5 + $0x28] sm:$0xff] }
 0x4cd   :  { %v4607_v15 = vsel %vm2375_vm10, %v8754_v58, %v4601_v5  ;;  %6901 = vmatprep.subr.bf16.mxu1 %v6900_v56  ;;  %5136 = vmatmul.mubr.f32.vlgmr.msra.gmra.mrb[6].mxu1 %v8585_v11 }
 0x4ce   :  { %4619 = vst.msk [vmem:[#allocation5 + $0xb8] sm:$0xf0] %vm2130_vm14, %v4607_v15  ;;  %6903 = vmatpush1.bf16.msra.mxu1 %v6902_v17  ;;  %5141 = vmatprep.mubr.f32.mxu1 %v9273_v41 }
 0x4cf   :  { %6905 = vmatprep.subr.bf16.mxu1 %v6904_v42 }
 0x4d0   :  { %v4344_v40 = vpop.permute.xlu1 %4343  ;;  %v4468_v20 = vpop.permute.xlu0 %4467 }
 0x4d1   :  { %v4350_v63 = vsel %vm2113_vm5, %v8603_v62, %v4344_v40  ;;  %v4351_v13 = vsel %vm2113_vm5, %v4344_v40, %v4346_v37  ;;  %v4475_v2 = vsel %vm2241_vm8, %v4466_v7, %v4468_v20  ;;  %v4476_v46 = vsel %vm2241_vm8, %v4468_v20, %v8684_v35  ;;  %5145 = vmatmul.mubr.f32.gmra.mrb[8].mxu1 %v8619_v12 }
 0x4d2   :  { %4361 = vst [vmem:[#allocation5 + $0x18] sm:$0xf0] %v4350_v63  ;;  %4362 = vst [vmem:[#allocation5 + $0x20] sm:$0xf0] %v4351_v13  ;;  %6907 = vmatpush1.bf16.msra.mxu1 %v6906_v34  ;;  %5245 = vmatprep.mubr.f32.mxu1 %v9273_v41  ;;  %v8797_v62 = vsub.f32 %v8761_v32, %v5355_v25 }
 0x4d3   :  { %4487 = vst [vmem:[#allocation5 + $0x80] sm:$0xf] %v4475_v2  ;;  %4488 = vst.msk [vmem:[#allocation5 + $0x88] sm:$0xf] %vm2090_vm4, %v4476_v46  ;;  %5186 = vmatprep.subr.mxu1 %v4878_v26 }
 0x4d4   :  { %v4423_v60 = vpop.permute.xlu1 %4422  ;;  %v4555_v18 = vpop.permute.xlu0 %4554 }
 0x4d5   :  { %v4431_v35 = vsel %vm2197_vm7, %v8633_v27, %v4423_v60  ;;  %v4432_v29 = vsel %vm2197_vm7, %v4423_v60, %v8725_v3  ;;  %v4562_v61 = vsel %vm2330_vm11, %v4553_v57, %v4555_v18  ;;  %v4563_v26 = vsel %vm2330_vm11, %v4555_v18, %v8699_v39 }
 0x4d6   :  { %4443 = vst [vmem:[#allocation5 + $0x48] sm:$0xf0] %v4431_v35  ;;  %4444 = vst [vmem:[#allocation5 + $0x50] sm:$0xf0] %v4432_v29  ;;  %5190 = vmatpush1.msra.mxu1 %v4884_v33  ;;  %v5967_v27 = vand.u32 4294901760, %v8799_v44  ;;  %v9255_v39 = vand.u32 4294901760, %v8797_v62 }
 0x4d7   :  { %4574 = vst [vmem:[#allocation5 + $0xb0] sm:$0xf] %v4562_v61  ;;  %4575 = vst.msk [vmem:[#allocation5 + $0xb8] sm:$0xf] %vm2090_vm4, %v4563_v26  ;;  %6909 = vmatprep.subr.bf16.mxu1 %v8578_v54  ;;  %5247 = vmatmul.mubr.f32.vlgmr.msra.gmra.mrb[6].mxu1 %v8558_v19  ;;  %v5359_v3 = vand.u32 4294901760, %v4679_v48 }
 0x4d8   :  { %v4384_v10 = vpop.permute.xlu1 %4383  ;;  %v8819_v7 = vpop.permute.xlu0 %4637  ;;  %6911 = vmatpush1.bf16.msra.mxu1 %v8590_v28  ;;  %5252 = vmatprep.mubr.f32.mxu1 %v9273_v41  ;;  %v8833_v28 = vsub.f32 %v8790_v4, %v9256_v43 }
 0x4d9   :  { %v4389_v55 = vsel %vm2153_vm6, %v8706_v16, %v4384_v10  ;;  %4401 = vst.msk [vmem:[#allocation5 + $0x58] sm:$0xf] %vm2090_vm4, %v4384_v10  ;;  %v4647_v54 = vsel %vm2419_vm13, %v8576_v53, %v8819_v7  ;;  %6913 = vmatprep.subr.bf16.mxu1 %v8605_v49  ;;  %v4668_v33 = vld [vmem:[#allocation5 + $0x18] sm:$0xff]  ;;  %v8839_v16 = vsub.f32 %v8799_v44, %v5967_v27  ;;  %v4669_v9 = vld [vmem:[#allocation5 + $0x20] sm:$0xff] }
 0x4da   :  { %4400 = vst [vmem:[#allocation5 + $0x50] sm:$0xf] %v4389_v55  ;;  %4659 = vst [vmem:[#allocation5 + $0xd0] sm:$0xf] %v4647_v54  ;;  %v8842_v53 = vsub.f32 %v8801_v38, %v5363_v22  ;;  %v8847_v49 = vsub.f32 %v8797_v62, %v9255_v39  ;;  %v5349_v6 = vand.u32 4294901760, %v4668_v33  ;;  %v4682_v31 = vld [vmem:[#allocation5 + $0x88] sm:$0xff]  ;;  %v8856_v15 = vsub.f32 %v4679_v48, %v5359_v3 }
 0x4db   :  { %5254 = vmatmul.mubr.f32.gmra.mrb[8].mxu1 %v8568_v30  ;;  %v5969_v17 = vand.u32 4294901760, %v4669_v9  ;;  %v5975_v13 = vand.u32 4294901760, %v4682_v31  ;;  %v8884_v18 = vpack.c.bf16 %v5363_v22, %v5359_v3 }
 0x4dc   :  { %v4510_v14 = vpop.permute.xlu1 %4509  ;;  %6915 = vmatpush1.bf16.msra.mxu1 %v8635_v52  ;;  %5334 = vmatprep.mubr.f32.mxu1 %v9273_v41  ;;  %v5456_v52 = vand.u32 4294901760, %v8833_v28  ;;  %v9248_v42 = vand.u32 4294901760, %v8842_v53  ;;  %v4642_v61 = vpop.permute.xlu0 %4641 }
 0x4dd   :  { %v4518_v59 = vsel %vm2286_vm9, %v8660_v47, %v4510_v14  ;;  %v4519_v37 = vsel %vm2286_vm9, %v4510_v14, %v8739_v0  ;;  %5277 = vmatprep.subr.mxu1 %v8656_v23  ;;  %v4674_v57 = vld [vmem:[#allocation5 + $0x48] sm:$0xff]  ;;  %v8863_v47 = vpack.c.bf16 %v5355_v25, %v5351_v24  ;;  %v5468_v23 = vand.u32 4294901760, %v8847_v49 }
 0x4de   :  { %v4688_v56 = vld [vmem:[#allocation5 + $0xb8] sm:$0xff]  ;;  %4530 = vst [vmem:[#allocation5 + $0x78] sm:$0xf0] %v4518_v59  ;;  %4531 = vst [vmem:[#allocation5 + $0x80] sm:$0xf0] %v4519_v37  ;;  %v5353_v5 = vand.u32 4294901760, %v4674_v57  ;;  %v8878_v25 = vsub.f32 %v4668_v33, %v5349_v6  ;;  %v8882_v60 = vsub.f32 %v4669_v9, %v5969_v17  ;;  %v8901_v29 = vsub.f32 %v8842_v53, %v9248_v42 }
 0x4df   :  { %v9250_v0 = vand.u32 4294901760, %v8839_v16  ;;  %v5979_v8 = vand.u32 4294901760, %v4688_v56  ;;  %v8920_v14 = vpack.c.bf16 %v5468_v23, %v5456_v52 }
 0x4e0   :  { %v4597_v40 = vpop.permute.xlu1 %4596  ;;  %5279 = vmatpush1.msra.mxu1 %v8658_v45  ;;  %v8869_v20 = vpack.c.bf16 %v5353_v5, %v5349_v6  ;;  %v8871_v34 = vsub.f32 %v4674_v57, %v5353_v5  ;;  %v4676_v63 = vld [vmem:[#allocation5 + $0x58] sm:$0xff]  ;;  %v9258_v9 = vand.u32 4294901760, %v8878_v25 }
 0x4e1   :  { %v4605_v32 = vsel %vm2375_vm10, %v8686_v36, %v4597_v40  ;;  %v4606_v24 = vsel %vm2375_vm10, %v4597_v40, %v8754_v58  ;;  %5336 = vmatmul.mubr.f32.vlgmr.msra.gmra.mrb[6].mxu1 %v8558_v19  ;;  %v5971_v2 = vand.u32 4294901760, %v4676_v63  ;;  %v4675_v46 = vld [vmem:[#allocation5 + $0x50] sm:$0xff]  ;;  %v9249_v36 = vand.u32 4294901760, %v8856_v15 }
 0x4e2   :  { %4617 = vst [vmem:[#allocation5 + $0xa8] sm:$0xf0] %v4605_v32  ;;  %4618 = vst [vmem:[#allocation5 + $0xb0] sm:$0xf0] %v4606_v24  ;;  %6917 = vmatprep.subr.bf16.mxu0 %v8869_v20  ;;  %5341 = vmatprep.mubr.f32.mxu1 %v9273_v41  ;;  %v5973_v45 = vand.u32 4294901760, %v4675_v46  ;;  %v9257_v38 = vand.u32 4294901760, %v8871_v34  ;;  %v8896_v35 = vsub.f32 %v8839_v16, %v9250_v0 }
 0x4e3   :  { %6919 = vmatpush1.bf16.msra.mxu0 %v8863_v47  ;;  %v8890_v58 = vpack.c.bf16 %v5971_v2, %v5967_v27  ;;  %v8903_v48 = vsub.f32 %v4676_v63, %v5971_v2  ;;  %v8907_v44 = vpack.c.bf16 %v5979_v8, %v5975_v13  ;;  %v8909_v27 = vsub.f32 %v4682_v31, %v5975_v13  ;;  %v4691_v28 = vld [vmem:[#allocation5 + $0xd0] sm:$0xf] }
 0x4e4   :  { %v4640_v26 = vpop.permute.xlu1 %4639  ;;  %v8905_v22 = vpack.c.bf16 %v5973_v45, %v5969_v17  ;;  %v8916_v54 = vsub.f32 %v4675_v46, %v5973_v45  ;;  %v8927_v59 = vsub.f32 %v8856_v15, %v9249_v36  ;;  %v8930_v37 = vsub.f32 %v4688_v56, %v5979_v8 }
 0x4e5   :  { %v4648_v10 = vsel %vm2419_vm13, %v8819_v7, %v4640_v26  ;;  %v4649_v55 = vsel %vm2419_vm13, %v4640_v26, %v4642_v61  ;;  %6965 = vmatprep.subr.bf16.mxu1 %v8890_v58  ;;  %5343 = vmatmul.mubr.f32.gmra.mrb[8].mxu1 %v8568_v30  ;;  %v4680_v33 = vld [vmem:[#allocation5 + $0x78] sm:$0xff]  ;;  %v4681_v3 = vld [vmem:[#allocation5 + $0x80] sm:$0xff]  ;;  %v9251_v7 = vand.u32 4294901760, %v8882_v60  ;;  %v5461_v6 = vsub.f32 %v8871_v34, %v9257_v38 }
 0x4e6   :  { %4660 = vst [vmem:[#allocation5 + $0xd8] sm:$0xf] %v4648_v10  ;;  %4661 = vst [vmem:[#allocation5 + $0xe0] sm:$0xf] %v4649_v55  ;;  %6967 = vmatpush1.bf16.msra.mxu1 %v8905_v22  ;;  %v5357_v49 = vand.u32 4294901760, %v4680_v33  ;;  %6041 = vmatprep.mubr.f32.mxu1 %v9273_v41  ;;  %v5977_v57 = vand.u32 4294901760, %v4681_v3  ;;  %v5449_v8 = vsub.f32 %v8878_v25, %v9258_v9 }
 0x4e7   :  { %6969 = vmatprep.subr.bf16.mxu1 %v8907_v44  ;;  %v4720_v52 = vsel %vm149_vm0, %v4691_v28, 0  ;;  %v6068_v23 = vand.u32 4294901760, %v8896_v35  ;;  %v9260_v40 = vand.u32 4294901760, %v8909_v27  ;;  %v9253_v32 = vand.u32 4294901760, %v8903_v48 }
 0x4e8   :  { %v4644_v5 = vpop.permute.xlu1 %4643  ;;  %v8936_v17 = vsub.f32 %v4680_v33, %v5357_v49  ;;  %v9252_v24 = vand.u32 4294901760, %v8916_v54  ;;  %v8952_v26 = vsub.f32 %v4681_v3, %v5977_v57  ;;  %v8954_v10 = vand.u32 4294901760, %v4720_v52 }
 0x4e9   :  { %v4650_v63 = vsel %vm2419_vm13, %v4642_v61, %v4644_v5  ;;  %v4686_v56 = vld [vmem:[#allocation5 + $0xa8] sm:$0xff]  ;;  %v4687_v13 = vld [vmem:[#allocation5 + $0xb0] sm:$0xff]  ;;  %v6073_v61 = vsub.f32 %v8882_v60, %v9251_v7  ;;  %v5462_v55 = vand.u32 4294901760, %v5461_v6  ;;  %v9259_v33 = vand.u32 4294901760, %v8930_v37 }
 0x4ea   :  { %4662 = vst.msk [vmem:[#allocation5 + $0xe8] sm:$0xf] %vm2090_vm4, %v4650_v63  ;;  %v5361_v2 = vand.u32 4294901760, %v4686_v56  ;;  %v5981_v46 = vand.u32 4294901760, %v4687_v13  ;;  %v9254_v45 = vand.u32 4294901760, %v8936_v17  ;;  %v5450_v0 = vand.u32 4294901760, %v5449_v8 }
 0x4eb   :  { %v6079_v6 = vsub.f32 %v8903_v48, %v9253_v32  ;;  %v6103_v32 = vsub.f32 %v8930_v37, %v9259_v33  ;;  %v9263_v39 = vand.u32 4294901760, %v8952_v26  ;;  %vm6652_vm4 = vcmask 89088  }
 0x4ec   :  { %v8957_v28 = vpack.c.bf16 %v5361_v2, %v5357_v49  ;;  %v8959_v5 = vsub.f32 %v4686_v56, %v5361_v2  ;;  %v8961_v63 = vpack.c.bf16 %v5981_v46, %v5977_v57  ;;  %v8963_v42 = vsub.f32 %v4687_v13, %v5981_v46 }
 0x4ed   :  { %v4692_v36 = vld [vmem:[#allocation5 + $0xd8] sm:$0xf]  ;;  %v5473_v3 = vsub.f32 %v8936_v17, %v9254_v45  ;;  %v4693_v7 = vld [vmem:[#allocation5 + $0xe0] sm:$0xf]  ;;  %v6085_v49 = vsub.f32 %v8916_v54, %v9252_v24  ;;  %v8984_v46 = vsub.f32 %v4720_v52, %v8954_v10  ;;  %v6091_v45 = vsub.f32 %v8909_v27, %v9260_v40 }
 0x4ee   :  { %6921 = vmatprep.subr.bf16.mxu0 %v8957_v28  ;;  %6971 = vmatpush1.bf16.msra.mxu1 %v8961_v63  ;;  %v4723_v57 = vsel %vm149_vm0, %v4692_v36, 0  ;;  %v9261_v56 = vand.u32 4294901760, %v8959_v5  ;;  %v4726_v13 = vsel %vm149_vm0, %v4693_v7, 0  ;;  %v9262_v8 = vand.u32 4294901760, %v8963_v42 }
 0x4ef   :  { %6923 = vmatpush1.bf16.msra.mxu0 %v8884_v18  ;;  %v8981_v2 = vand.u32 4294901760, %v4723_v57  ;;  %v8986_v24 = vand.u32 4294901760, %v4726_v13  ;;  %v6924_v36 = vpack.c.bf16 %v5462_v55, %v5450_v0  ;;  %v5474_v43 = vand.u32 4294901760, %v5473_v3 }
 0x4f0   :  { %v5485_v7 = vsub.f32 %v8959_v5, %v9261_v56  ;;  %v6080_v38 = vand.u32 4294901760, %v6079_v6  ;;  %v6086_v9 = vand.u32 4294901760, %v6085_v49  ;;  %v6109_v40 = vsub.f32 %v8963_v42, %v9262_v8 }
 0x4f1   :  { %5366 = vmatprep.subr.mxu0 %v8981_v2  ;;  %v4694_v52 = vld [vmem:[#allocation5 + $0xe8] sm:$0xf]  ;;  %v9000_v31 = vsub.f32 %v4723_v57, %v8981_v2  ;;  %v9004_v33 = vsub.f32 %v4726_v13, %v8986_v24  ;;  %v6104_v3 = vand.u32 4294901760, %v6103_v32  ;;  %v5502_v49 = vand.u32 4294901760, %v8984_v46 }
 0x4f2   :  { %v4729_v0 = vsel %vm149_vm0, %v4694_v52, 0  ;;  %v5486_v55 = vand.u32 4294901760, %v5485_v7  ;;  %v6074_v7 = vand.u32 4294901760, %v6073_v61  ;;  %v5480_v13 = vand.u32 4294901760, %v8927_v59 }
 0x4f3   :  { %5368 = vmatpush1.msra.mxu0 %v8954_v10  ;;  %v9010_v56 = vand.u32 4294901760, %v4729_v0  ;;  %v5496_v6 = vand.u32 4294901760, %v9000_v31  ;;  %v6097_v52 = vsub.f32 %v8952_v26, %v9263_v39  ;;  %v6972_v32 = vpack.c.bf16 %v6080_v38, %v6068_v23 }
 0x4f4   :  { %6925 = vmatprep.subr.bf16.mxu0 %v6924_v36  ;;  %5429 = vmatmul.mubr.f32.vlgmr.msra.gmra.mrb[8].mxu0 %v8648_v51  ;;  %v6928_v57 = vpack.c.bf16 %v5486_v55, %v5474_v43  ;;  %v6092_v8 = vand.u32 4294901760, %v6091_v45  ;;  %v6974_v59 = vpack.c.bf16 %v6086_v9, %v6074_v7  ;;  %v9297_v61 = vand.u32 4294901760, %v8901_v29 }
 0x4f5   :  { %6927 = vmatpush1.bf16.msra.mxu0 %v8920_v14  ;;  %5984 = vmatprep.subr.mxu1 %v9010_v56  ;;  %v5497_v36 = vsub.f32 %v9000_v31, %v5496_v6  ;;  %v9027_v43 = vsub.f32 %v4729_v0, %v9010_v56  ;;  %v6110_v55 = vand.u32 4294901760, %v6109_v40  ;;  %v6120_v39 = vand.u32 4294901760, %v9004_v33 }
 0x4f6   :  { %6929 = vmatprep.subr.bf16.mxu0 %v6928_v57  ;;  %5986 = vmatpush1.msra.mxu1 %v8986_v24  ;;  %v6930_v14 = vpack.c.bf16 %v9297_v61, %v5480_v13  ;;  %v6976_v38 = vpack.c.bf16 %v6104_v3, %v6092_v8  ;;  %v5503_v23 = vsub.f32 %v8984_v46, %v5502_v49  ;;  %v6098_v9 = vand.u32 4294901760, %v6097_v52 }
 0x4f7   :  { %6973 = vmatprep.subr.bf16.mxu1 %v6972_v32  ;;  %6047 = vmatmul.mubr.f32.vlgmr.msra.gmra.mrb[10].mxu1 %v8648_v51  ;;  %v5498_v35 = vand.u32 4294901760, %v5497_v36  ;;  %v6114_v45 = vand.u32 4294901760, %v9027_v43  ;;  %v6121_v40 = vsub.f32 %v9004_v33, %v6120_v39  ;;  %v6932_v3 = vpack.c.bf16 %v8871_v34, %v8878_v25 }
 0x4f8   :  { %6975 = vmatpush1.bf16.msra.mxu1 %v6974_v59  ;;  %5434 = vmatprep.mubr.f32.mxu0 %v9273_v41  ;;  %v6978_v51 = vpack.c.bf16 %v6110_v55, %v6098_v9  ;;  %v5504_v8 = vand.u32 4294901760, %v5503_v23  ;;  %v6934_v57 = vpack.c.bf16 %v8797_v62, %v8790_v4  ;;  %v6936_v13 = vpack.c.bf16 %v8959_v5, %v8936_v17 }
 0x4f9   :  { %6931 = vmatpush1.bf16.msra.mxu0 %v6930_v14  ;;  %6977 = vmatprep.subr.bf16.mxu1 %v6976_v38  ;;  %v6115_v29 = vsub.f32 %v9027_v43, %v6114_v45  ;;  %v6122_v7 = vand.u32 4294901760, %v6121_v40  ;;  %v6980_v52 = vpack.c.bf16 %v8903_v48, %v8839_v16  ;;  %v6938_v32 = vpack.c.bf16 %v8842_v53, %v8856_v15 }
 0x4fa   :  { %5499 = vmatprep.subr.mxu0 %v5498_v35  ;;  %5440 = vmatmul.mubr.f32.gmra.mrb[10].mxu0 %v8681_v50  ;;  %v6984_v36 = vpack.c.bf16 %v8930_v37, %v8909_v27  ;;  %v6986_v59 = vpack.c.bf16 %v8963_v42, %v8952_v26  ;;  %v9299_v61 = vand.u32 4294901760, %v8871_v34  ;;  %v9300_v55 = vand.u32 4294901760, %v8790_v4 }
 0x4fb   :  { %6052 = vmatprep.mubr.f32.mxu1 %v9273_v41  ;;  %v6116_v0 = vand.u32 4294901760, %v6115_v29  ;;  %5560 = vmatprep.mubr.f32.mxu0 %v9273_v41  ;;  %v9301_v38 = vand.u32 4294901760, %v8797_v62  ;;  %v9304_v23 = vand.u32 4294901760, %v8839_v16  ;;  %v9305_v9 = vand.u32 4294901760, %v8903_v48 }
 0x4fc   :  { %6979 = vmatpush1.bf16.msra.mxu1 %v6978_v51  ;;  %v9306_v4 = vand.u32 4294901760, %v8882_v60  ;;  %v9307_v62 = vand.u32 4294901760, %v8916_v54  ;;  %v9309_v16 = vand.u32 4294901760, %v8842_v53  ;;  %v9310_v48 = vand.u32 4294901760, %v8909_v27 }
 0x4fd   :  { %5505 = vmatpush1.msra.mxu0 %v5504_v8  ;;  %6117 = vmatprep.subr.mxu1 %v6116_v0  ;;  %v6950_v35 = vpack.c.bf16 %v9301_v38, %v9300_v55  ;;  %v6996_v29 = vpack.c.bf16 %v9305_v9, %v9304_v23  ;;  %v9311_v40 = vand.u32 4294901760, %v8930_v37  ;;  %vm6645_vm0 = vcmask 1047720  }
 0x4fe   :  { %6933 = vmatprep.subr.bf16.mxu0 %v6932_v3  ;;  %6058 = vmatmul.mubr.f32.gmra.mrb[12].mxu1 %v8681_v50  ;;  %v6982_v50 = vpack.c.bf16 %v8916_v54, %v8882_v60  ;;  %v6998_v51 = vpack.c.bf16 %v9307_v62, %v9306_v4 }
 0x4ff   :  { %5562 = vmatmul.mubr.f32.vlgmr.msra.gmra.mrb[8].mxu0 %v8558_v19  ;;  %6178 = vmatprep.mubr.f32.mxu1 %v9273_v41  ;;  %v7000_v8 = vpack.c.bf16 %v9311_v40, %v9310_v48 }
 0x500   :  { %6935 = vmatpush1.bf16.msra.mxu0 %v6934_v57  ;;  %6123 = vmatpush1.msra.mxu1 %v6122_v7 }
 0x501   :  { %6937 = vmatprep.subr.bf16.mxu0 %v6936_v13  ;;  %6981 = vmatprep.subr.bf16.mxu1 %v6980_v52 }
 0x502   :  { %6180 = vmatmul.mubr.f32.vlgmr.msra.gmra.mrb[10].mxu1 %v8558_v19  ;;  %5567 = vmatprep.mubr.f32.mxu0 %v9273_v41 }
 0x503   :  { %6983 = vmatpush1.bf16.msra.mxu1 %v6982_v50  ;;  %5569 = vmatmul.mubr.f32.gmra.mrb[10].mxu0 %v8568_v30 }
 0x504   :  { %6939 = vmatpush1.bf16.msra.mxu0 %v6938_v32  ;;  %6985 = vmatprep.subr.bf16.mxu1 %v6984_v36 }
 0x505   :  { %5601 = vmatprep.subr.mxu0 %v9000_v31  ;;  %6185 = vmatprep.mubr.f32.mxu1 %v9273_v41 }
 0x506   :  { %5659 = vmatprep.mubr.f32.mxu0 %v9273_v41  ;;  %6187 = vmatmul.mubr.f32.gmra.mrb[12].mxu1 %v8568_v30 }
 0x507   :  { %6987 = vmatpush1.bf16.msra.mxu1 %v6986_v59  ;;  %6277 = vmatprep.mubr.f32.mxu1 %v9273_v41 }
 0x508   :  { %5604 = vmatpush1.msra.mxu0 %v8984_v46  ;;  %6219 = vmatprep.subr.mxu1 %v9027_v43 }
 0x509   :  { %6941 = vmatprep.subr.bf16.mxu0 %v8869_v20  ;;  %5662 = vmatmul.mubr.f32.vlgmr.msra.gmra.mrb[8].mxu0 %v8565_v21 }
 0x50a   :  { %6943 = vmatpush1.bf16.msra.mxu0 %v8863_v47  ;;  %5667 = vmatprep.mubr.f32.mxu0 %v9273_v41 }
 0x50b   :  { %6945 = vmatprep.subr.bf16.mxu0 %v8957_v28  ;;  %6222 = vmatpush1.msra.mxu1 %v9004_v33 }
 0x50c   :  { %6989 = vmatprep.subr.bf16.mxu1 %v8890_v58  ;;  %6280 = vmatmul.mubr.f32.vlgmr.msra.gmra.mrb[10].mxu1 %v8565_v21  ;;  %v9298_v21 = vand.u32 4294901760, %v8878_v25  ;;  %v9303_v25 = vand.u32 4294901760, %v8959_v5 }
 0x50d   :  { %6991 = vmatpush1.bf16.msra.mxu1 %v8905_v22  ;;  %5670 = vmatmul.mubr.f32.gmra.mrb[10].mxu0 %v8593_v1 }
 0x50e   :  { %6947 = vmatpush1.bf16.msra.mxu0 %v8884_v18  ;;  %6993 = vmatprep.subr.bf16.mxu1 %v8907_v44  ;;  %v6948_v14 = vpack.c.bf16 %v9299_v61, %v9298_v21 }
 0x50f   :  { %5693 = vmatprep.subr.mxu0 %v8981_v2  ;;  %6285 = vmatprep.mubr.f32.mxu1 %v9273_v41 }
 0x510   :  { %5750 = vmatprep.mubr.f32.mxu0 %v9273_v41  ;;  %6288 = vmatmul.mubr.f32.gmra.mrb[12].mxu1 %v8593_v1  ;;  %v9302_v1 = vand.u32 4294901760, %v8936_v17  ;;  %v9308_v17 = vand.u32 4294901760, %v8856_v15  ;;  %v9313_v15 = vand.u32 4294901760, %v8963_v42 }
 0x511   :  { %6995 = vmatpush1.bf16.msra.mxu1 %v8961_v63  ;;  %6368 = vmatprep.mubr.f32.mxu1 %v9273_v41 }
 0x512   :  { %5695 = vmatpush1.msra.mxu0 %v8954_v10  ;;  %6311 = vmatprep.subr.mxu1 %v9010_v56  ;;  %v6952_v34 = vpack.c.bf16 %v9303_v25, %v9302_v1  ;;  %v6954_v5 = vpack.c.bf16 %v9309_v16, %v9308_v17 }
 0x513   :  { %6949 = vmatprep.subr.bf16.mxu0 %v6948_v14  ;;  %5754 = vmatmul.mubr.f32.vlgmr.msra.gmra.mrb[8].mxu0 %v8585_v11 }
 0x514   :  { %6951 = vmatpush1.bf16.msra.mxu0 %v6950_v35  ;;  %5759 = vmatprep.mubr.f32.mxu0 %v9273_v41 }
 0x515   :  { %6953 = vmatprep.subr.bf16.mxu0 %v6952_v34  ;;  %6313 = vmatpush1.msra.mxu1 %v8986_v24 }
 0x516   :  { %6997 = vmatprep.subr.bf16.mxu1 %v6996_v29  ;;  %6372 = vmatmul.mubr.f32.vlgmr.msra.gmra.mrb[10].mxu1 %v8585_v11  ;;  %v9312_v11 = vand.u32 4294901760, %v8952_v26 }
 0x517   :  { %6999 = vmatpush1.bf16.msra.mxu1 %v6998_v51  ;;  %5763 = vmatmul.mubr.f32.gmra.mrb[10].mxu0 %v8619_v12 }
 0x518   :  { %6955 = vmatpush1.bf16.msra.mxu0 %v6954_v5  ;;  %7001 = vmatprep.subr.bf16.mxu1 %v7000_v8  ;;  %v7002_v60 = vpack.c.bf16 %v9313_v15, %v9312_v11 }
 0x519   :  { %5804 = vmatprep.subr.mxu0 %v5496_v6  ;;  %6377 = vmatprep.mubr.f32.mxu1 %v9273_v41 }
 0x51a   :  { %5863 = vmatprep.mubr.f32.mxu0 %v9273_v41  ;;  %6381 = vmatmul.mubr.f32.gmra.mrb[12].mxu1 %v8619_v12  ;;  %v4700_v12 = vpop.permute.xlu0 %4699 }
 0x51b   :  { %7003 = vmatpush1.bf16.msra.mxu1 %v7002_v60  ;;  %6481 = vmatprep.mubr.f32.mxu1 %v9273_v41 }
 0x51c   :  { %5808 = vmatpush1.msra.mxu0 %v5502_v49  ;;  %6422 = vmatprep.subr.mxu1 %v6114_v45 }
 0x51d   :  { %6957 = vmatprep.subr.bf16.mxu0 %v8869_v20  ;;  %5865 = vmatmul.mubr.f32.vlgmr.msra.gmra.mrb[8].mxu0 %v8558_v19  ;;  %v4705_v20 = vpop.permute.xlu1 %4704 }
 0x51e   :  { %6959 = vmatpush1.bf16.msra.mxu0 %v8863_v47  ;;  %5870 = vmatprep.mubr.f32.mxu0 %v9273_v41 }
 0x51f   :  { %6961 = vmatprep.subr.bf16.mxu0 %v8957_v28  ;;  %6426 = vmatpush1.msra.mxu1 %v6120_v39 }
 0x520   :  { %7005 = vmatprep.subr.bf16.mxu1 %v8890_v58  ;;  %6483 = vmatmul.mubr.f32.vlgmr.msra.gmra.mrb[10].mxu1 %v8558_v19 }
 0x521   :  { %7007 = vmatpush1.bf16.msra.mxu1 %v8905_v22  ;;  %5872 = vmatmul.mubr.f32.gmra.mrb[10].mxu0 %v8568_v30 }
 0x522   :  { %6963 = vmatpush1.bf16.msra.mxu0 %v8884_v18  ;;  %7009 = vmatprep.subr.bf16.mxu1 %v8907_v44 }
 0x523   :  { %5895 = vmatprep.subr.mxu0 %v8981_v2  ;;  %6488 = vmatprep.mubr.f32.mxu1 %v9273_v41 }
 0x524   :  { %5952 = vmatprep.mubr.f32.mxu0 %v9273_v41  ;;  %6490 = vmatmul.mubr.f32.gmra.mrb[12].mxu1 %v8568_v30 }
 0x525   :  { %7011 = vmatpush1.bf16.msra.mxu1 %v8961_v63  ;;  %6570 = vmatprep.mubr.f32.mxu1 %v9273_v41 }
 0x526   :  { %5897 = vmatpush1.msra.mxu0 %v8954_v10  ;;  %6513 = vmatprep.subr.mxu1 %v9010_v56 }
 0x527   :  { %5954 = vmatmul.mubr.f32.vlgmr.msra.gmra.mrb[8].mxu0 %v8558_v19 }
 0x528   :  { %5959 = vmatprep.mubr.f32.mxu0 %v9273_v41 }
 0x529   :  { %6515 = vmatpush1.msra.mxu1 %v8986_v24 }
 0x52a   :  { %6572 = vmatmul.mubr.f32.vlgmr.msra.gmra.mrb[10].mxu1 %v8558_v19 }
 0x52b   :  { %5961 = vmatmul.mubr.f32.gmra.mrb[10].mxu0 %v8568_v30  ;;  %6577 = vmatprep.mubr.f32.mxu1 %v9273_v41 }
 0x52e   :  { %6579 = vmatmul.mubr.f32.gmra.mrb[12].mxu1 %v8568_v30 }
 0x5b4   :  { %v5337_v39 = vpop.f32.mrb[6].mxu1 }
 0x5b5   :  { %v7025_v53 = vadd.f32 %v5337_v39, %v4700_v12  ;;  %v5339_v47 = vpop.f32.mrb[7].mxu1 }
 0x5b6   :  { %v7026_v42 = vadd.f32 %v5339_v47, %v4700_v12 }
 0x5b7   :  { %6597 = vrot.lane.b32.xlu0 %v7025_v53, %s7442_s29 }
 0x5b8   :  { %v5344_v18 = vpop.f32.mrb[8].mxu1  ;;  %6599 = vrot.lane.b32.xlu1 %v7026_v42, %s7442_s29 }
 0x5b9   :  { %v7027_v58 = vadd.f32 %v5344_v18, %v4705_v20  ;;  %v5346_v22 = vpop.f32.mrb[9].mxu1 }
 0x5ba   :  { %v7028_v19 = vadd.f32 %v5346_v22, %v4705_v20 }
 0x5bb   :  { %6609 = vrot.lane.b32.xlu0 %v7027_v58, %s7442_s29 }
 0x5bc   :  { %6611 = vrot.lane.b32.xlu1 %v7028_v19, %s7442_s29 }
 0x5fa   :  { %v5955_v41 = vpop.f32.mrb[8].mxu0 }
 0x5fb   :  { %v7029_v30 = vadd.f32 %v5955_v41, %v4700_v12  ;;  %v5957_v44 = vpop.f32.mrb[9].mxu0 }
 0x5fc   :  { %v7030_v27 = vadd.f32 %v5957_v44, %v4700_v12 }
 0x5fd   :  { %v6573_v54 = vpop.f32.mrb[10].mxu1  ;;  %6601 = vrot.lane.b32.xlu0 %v7029_v30, %s7442_s29 }
 0x5fe   :  { %v5962_v37 = vpop.f32.mrb[10].mxu0  ;;  %v6575_v31 = vpop.f32.mrb[11].mxu1  ;;  %6603 = vrot.lane.b32.xlu1 %v7030_v27, %s7442_s29  ;;  %v7033_v63 = vadd.f32 %v6573_v54, %v4700_v12 }
 0x5ff   :  { %v7031_v24 = vadd.f32 %v5962_v37, %v4705_v20  ;;  %v5964_v26 = vpop.f32.mrb[11].mxu0  ;;  %v7034_v56 = vadd.f32 %v6575_v31, %v4700_v12 }
 0x600   :  { %v7032_v10 = vadd.f32 %v5964_v26, %v4705_v20 }
 0x601   :  { %v6580_v33 = vpop.f32.mrb[12].mxu1  ;;  %6613 = vrot.lane.b32.xlu0 %v7031_v24, %s7442_s29 }
 0x602   :  { %v6582_v28 = vpop.f32.mrb[13].mxu1  ;;  %6615 = vrot.lane.b32.xlu1 %v7032_v10, %s7442_s29  ;;  %v7035_v2 = vadd.f32 %v6580_v33, %v4705_v20 }
 0x603   :  { %v7036_v46 = vadd.f32 %v6582_v28, %v4705_v20 }
 0x605   :  { %6605 = vrot.lane.b32.xlu0 %v7033_v63, %s7442_s29 }
 0x606   :  { %6607 = vrot.lane.b32.xlu1 %v7034_v56, %s7442_s29 }
 0x609   :  { %6617 = vrot.lane.b32.xlu0 %v7035_v2, %s7442_s29 }
 0x60a   :  { %6619 = vrot.lane.b32.xlu1 %v7036_v46, %s7442_s29 }
 0x629   :  { %v6598_v6 = vpop.permute.xlu0 %6597 }
 0x62a   :  { %6646 = vst.msk [vmem:[#allocation20] sm:$0xff] %vm6645_vm0, %v6598_v6  ;;  %v6600_v49 = vpop.permute.xlu1 %6599 }
 0x62b   :  { %v6621_v43 = vsel %vm4290_vm2, %v6598_v6, %v6600_v49 }
 0x62c   :  { %6647 = vst [vmem:[#allocation20 + $0x8] sm:$0xff] %v6621_v43 }
 0x62d   :  { %v6610_v45 = vpop.permute.xlu0 %6609 }
 0x62e   :  { %6654 = vst.msk [vmem:[#allocation20 + $0x38] sm:$0xff] %vm6645_vm0, %v6610_v45  ;;  %v6612_v0 = vpop.permute.xlu1 %6611 }
 0x62f   :  { %v6626_v3 = vsel %vm4290_vm2, %v6610_v45, %v6612_v0 }
 0x630   :  { %6655 = vst [vmem:[#allocation20 + $0x40] sm:$0xff] %v6626_v3 }
 0x66f   :  { %v6602_v57 = vpop.permute.xlu0 %6601 }
 0x670   :  { %v6622_v7 = vsel %vm4290_vm2, %v6600_v49, %v6602_v57  ;;  %v6604_v13 = vpop.permute.xlu1 %6603 }
 0x671   :  { %6648 = vst [vmem:[#allocation20 + $0x10] sm:$0xff] %v6622_v7  ;;  %v6623_v52 = vsel %vm4290_vm2, %v6602_v57, %v6604_v13 }
 0x672   :  { %6649 = vst [vmem:[#allocation20 + $0x18] sm:$0xff] %v6623_v52 }
 0x673   :  { %v6614_v50 = vpop.permute.xlu0 %6613 }
 0x674   :  { %v6627_v32 = vsel %vm4290_vm2, %v6612_v0, %v6614_v50  ;;  %v6616_v36 = vpop.permute.xlu1 %6615 }
 0x675   :  { %6656 = vst [vmem:[#allocation20 + $0x48] sm:$0xff] %v6627_v32  ;;  %v6628_v59 = vsel %vm4290_vm2, %v6614_v50, %v6616_v36 }
 0x676   :  { %6657 = vst [vmem:[#allocation20 + $0x50] sm:$0xff] %v6628_v59 }
 0x677   :  { %v6606_v21 = vpop.permute.xlu0 %6605 }
 0x678   :  { %v6624_v61 = vsel %vm4290_vm2, %v6604_v13, %v6606_v21  ;;  %v6608_v14 = vpop.permute.xlu1 %6607 }
 0x679   :  { %6650 = vst [vmem:[#allocation20 + $0x20] sm:$0xff] %v6624_v61  ;;  %v6625_v55 = vsel %vm4290_vm2, %v6606_v21, %v6608_v14  ;;  %6653 = vst.msk [vmem:[#allocation20 + $0x30] sm:$0xff] %vm6652_vm4, %v6608_v14 }
 0x67a   :  { %6651 = vst [vmem:[#allocation20 + $0x28] sm:$0xff] %v6625_v55 }
 0x67b   :  { %v6618_v38 = vpop.permute.xlu0 %6617 }
 0x67c   :  { %v6629_v35 = vsel %vm4290_vm2, %v6616_v36, %v6618_v38  ;;  %v6620_v1 = vpop.permute.xlu1 %6619 }
 0x67d   :  { %6658 = vst [vmem:[#allocation20 + $0x58] sm:$0xff] %v6629_v35  ;;  %v6630_v25 = vsel %vm4290_vm2, %v6618_v38, %v6620_v1  ;;  %6660 = vst.msk [vmem:[#allocation20 + $0x68] sm:$0xff] %vm6652_vm4, %v6620_v1 }
 0x67e   :  { %6659 = vst [vmem:[#allocation20 + $0x60] sm:$0xff] %v6630_v25 }
 0x67f   :  { %7398 = shalt.err (!%p7395_p12)
}
 0x680   :  { %s7399_s4 = scalar_lea.hbm %s9216_s8, 1792 }
 0x681   :  { %p7400_p13 = scmp.ne.s32.totalorder %s9216_s8, %s7399_s4  ;;  %p7403_p0 = scmp.lt.u32.totalorder %s7399_s4, %s9216_s8 }
 0x683   :  { %p7405_p1 = pnand %p7403_p0, %p7400_p13 }
 0x685   :  { %7408 = shalt.err (!%p7405_p1)
}
 0x686   :  { %s7444_s0 = smov 896   ;;  %s7445_s11 = smov 56  }
 0x687   :  { %6672 = dma.vmem_to_hbm [thread:$0]  %s6667_s12, 1792, %s9216_s8, [#allocation8], %s7444_s0, %s7444_s0, %s7445_s11  }
 0x688   :  { %7419 = dma.done.wait [#allocation8], 1792  }
 0x689   :  { %7420 = vsyncadd [#allocation8], 4294965504 }
 0x68a   :  { %6676 = vsyncpa [#allocation7], 1 }
 0x68b   :  { %6677 = vsyncpa [#allocation10], 1 }
 0x68c   :  { %6678 = vsyncpa [#allocation13], 1 }
 0x68d   :  { %6679 = vsyncpa [#allocation16], 1 }
 0x68e   :  { %6680 = vsyncpa [#allocation19], 1 }
 0x68f   :  { %6681 = vsyncpa [#allocation8], 1 }

</bundles_post_ra>
